<compile_context>
chip_gen: v6e
topology: v6e:2x2x1
jax: 0.10.0
libtpu: 0.0.40
codegen_flags: <defaults>
</compile_context>

<pallas_src>
import functools

import jax
import jax.numpy as jnp
from jax import lax
from jax.experimental import pallas as pl
from jax.experimental.pallas import tpu as pltpu


def _round_up(x: int, m: int) -> int:
    return ((x + m - 1) // m) * m


# --------------------------------------------------------------------------
# Kernel
# --------------------------------------------------------------------------
def cbow_kernel(idx_ref,   # VMEM [TILE_M, CONTEXT] int32 token ids
                w1e_ref,   # VMEM [V_pad, H_pad] bf16   (folded emb @ w1)
                b1_ref,    # VMEM [1, H_pad]     f32
                w2_ref,    # VMEM [H_pad, V_pad] f32
                b2_ref,    # VMEM [1, V_pad]     f32 (-1e30 in padded vocab cols)
                out_ref):  # VMEM [TILE_M, V_pad] f32 log-probabilities
    tile_m, context = idx_ref.shape
    v_pad = w1e_ref.shape[0]

    # --- embedding-bag sum expressed as a matmul --------------------------
    # counts[m, v] = number of times vocab id v appears in example m's context.
    # NOTE: out-of-range ids match nothing and contribute zero (nn.Embedding
    # would raise on such inputs).
    idx = idx_ref[...]                                            # (TILE_M, C)
    vocab_ids = lax.broadcasted_iota(jnp.int32, (1, v_pad), 1)    # 1-vreg lane iota
    counts = jnp.zeros((tile_m, v_pad), jnp.float32)
    for c in range(context):              # small static context -> fully unrolled
        counts = counts + (idx[:, c:c + 1] == vocab_ids).astype(jnp.float32)

    # --- hidden = relu(sum_emb @ w1 + b1) == relu(counts @ (emb @ w1) + b1) --
    # counts values are small integers -> bf16 cast is exact; bf16 x bf16 MXU
    # path with f32 accumulation.
    h = jnp.dot(counts.astype(jnp.bfloat16), w1e_ref[...],
                preferred_element_type=jnp.float32) + b1_ref[...]
    h = jnp.maximum(h, 0.0)

    # --- linear2 (kept f32: activation quantization is not reproducible) ----
    logits = jnp.dot(h, w2_ref[...],
                     preferred_element_type=jnp.float32) + b2_ref[...]

    # --- log_softmax over vocab (padded cols hold ~-1e30 -> exp == 0), f32 ---
    m = jnp.max(logits, axis=-1, keepdims=True)
    shifted = logits - m
    lse = jnp.log(jnp.sum(jnp.exp(shifted), axis=-1, keepdims=True))
    out_ref[...] = shifted - lse


# --------------------------------------------------------------------------
# One-time parameter prep (do this once, not per call)
# --------------------------------------------------------------------------
def prepare_cbow_params(emb, w1, b1, w2, b2):
    """Fold emb@w1, pad everything to lane-dense (128-multiple) sizes, cast the
    folded matmul operand to bf16.  Returns (w1e_p, b1_p, w2_p, b2_p)."""
    V, D = emb.shape
    H = w1.shape[1]
    assert w1.shape == (D, H) and b1.shape == (1, H)
    assert w2.shape == (H, V) and b2.shape == (1, V)

    v_pad = _round_up(V, 128)
    h_pad = _round_up(H, 128)

    # Algebraic fold: bag @ w1 == counts @ (emb @ w1).
    w1e = jnp.dot(emb.astype(jnp.float32), w1.astype(jnp.float32))       # (V, H)
    w1e_p = jnp.pad(w1e, ((0, v_pad - V), (0, h_pad - H))).astype(jnp.bfloat16)
    b1_p = jnp.pad(b1.astype(jnp.float32), ((0, 0), (0, h_pad - H)))
    w2_p = jnp.pad(w2.astype(jnp.float32), ((0, h_pad - H), (0, v_pad - V)))
    b2_p = jnp.pad(b2.astype(jnp.float32), ((0, 0), (0, v_pad - V)),
                   constant_values=jnp.float32(-1e30))   # kills exp() in pad cols
    return w1e_p, b1_p, w2_p, b2_p


# --------------------------------------------------------------------------
# jit'd padded forward
# --------------------------------------------------------------------------
@functools.partial(jax.jit, static_argnames=("vocab_size", "tile_m"))
def _cbow_forward_padded(indices, w1e_p, b1_p, w2_p, b2_p, *, vocab_size, tile_m):
    B, C = indices.shape
    v_pad, h_pad = w1e_p.shape
    b_pad = _round_up(B, tile_m)

    idx_p = jnp.pad(indices.astype(jnp.int32), ((0, b_pad - B), (0, 0)))

    out = pl.pallas_call(
        cbow_kernel,
        out_shape=jax.ShapeDtypeStruct((b_pad, v_pad), jnp.float32),
        grid=(b_pad // tile_m,),
        in_specs=[
            pl.BlockSpec((tile_m, C), lambda i: (i, 0)),     # per-tile token ids
            # Constant index_maps -> weights DMA'd once, VMEM-resident.
            pl.BlockSpec((v_pad, h_pad), lambda i: (0, 0)),  # folded emb@w1 (bf16)
            pl.BlockSpec((1, h_pad), lambda i: (0, 0)),      # b1
            pl.BlockSpec((h_pad, v_pad), lambda i: (0, 0)),  # w2
            pl.BlockSpec((1, v_pad), lambda i: (0, 0)),      # b2 (-1e30 pad)
        ],
        out_specs=pl.BlockSpec((tile_m, v_pad), lambda i: (i, 0)),
        compiler_params=pltpu.CompilerParams(
            dimension_semantics=("parallel",),   # batch tiles shard across TCs
        ),
    )(idx_p, w1e_p, b1_p, w2_p, b2_p)

    # Lane-dense slab out of the kernel; slice fuses under jit.
    return out[:B, :vocab_size]


# --------------------------------------------------------------------------
# Host-side wrappers
# --------------------------------------------------------------------------
def _num_tensorcores_per_chip() -> int:
    try:
        kind = jax.devices()[0].device_kind.lower()
    except Exception:
        return 1
    return 2 if ("v7" in kind or "7x" in kind) else 1


def _default_tile_m(batch: int) -> int:
    b8 = _round_up(max(batch, 1), 8)
    if _num_tensorcores_per_chip() >= 2:
        # v7x: keep >= 2 parallel grid tiles so both TensorCores get work.
        return min(128, b8)
    # Single TC (v5e / v6e): fewer, taller serial tiles (less per-step overhead).
    return min(256, b8)


def cbow_forward_batched(indices, params, vocab_size, *, tile_m=None):
    """Batched CBOW forward: indices [B, CONTEXT] int -> log-probs [B, V]."""
    if tile_m is None:
        tile_m = _default_tile_m(indices.shape[0])
    w1e_p, b1_p, w2_p, b2_p = params
    return _cbow_forward_padded(indices, w1e_p, b1_p, w2_p, b2_p,
                                vocab_size=vocab_size, tile_m=tile_m)


def cbow_forward(inputs, params, vocab_size):
    """Exact equivalent of CBOW.forward: 1-D context ids -> (1, V) log-probs."""
    return cbow_forward_batched(inputs[None, :], params, vocab_size)


# --------------------------------------------------------------------------
# References
# --------------------------------------------------------------------------
def cbow_reference_f32(indices, emb, w1, b1, w2, b2):
    """Pure-f32 mirror of the PyTorch module."""
    bag = jnp.sum(emb[indices], axis=1)                    # (B, D)
    h = jnp.maximum(bag @ w1 + b1, 0.0)                    # (B, H)
    logits = h @ w2 + b2                                   # (B, V)
    return jax.nn.log_softmax(logits, axis=-1)


def cbow_reference_kernel_math(indices, params, vocab_size):
    """Plain-JAX mirror of the kernel's exact math (same bf16 rounding points)."""
    w1e_p, b1_p, w2_p, b2_p = params
    v_pad = w1e_p.shape[0]
    onehot = (indices[:, :, None].astype(jnp.int32) ==
              jnp.arange(v_pad, dtype=jnp.int32)[None, None, :])
    counts = onehot.astype(jnp.float32).sum(axis=1)                      # (B, V_pad)
    h = jnp.dot(counts.astype(jnp.bfloat16), w1e_p,
                preferred_element_type=jnp.float32) + b1_p
    h = jnp.maximum(h, 0.0)
    logits = jnp.dot(h, w2_p, preferred_element_type=jnp.float32) + b2_p
    return jax.nn.log_softmax(logits, axis=-1)[:, :vocab_size]


# --------------------------------------------------------------------------
if __name__ == "__main__":
    VOCAB = 64
    EMBED = 32
    HIDDEN = 128      # fixed by the module (nn.Linear(embed_dim, 128))
    CONTEXT = 8
    BATCH = 256       # 2 parallel tiles on v7x, 1 big tile on v5e/v6e

    key = jax.random.PRNGKey(0)
    k_emb, k_w1, k_b1, k_w2, k_b2, k_idx = jax.random.split(key, 6)

    # Deterministic synthetic parameters (shapes match nn.Embedding / nn.Linear;
    # nn.Linear stores weight as (out, in) -> pre-transposed to (in, out)).
    emb = jax.random.normal(k_emb, (VOCAB, EMBED), dtype=jnp.float32)
    w1 = jax.random.normal(k_w1, (HIDDEN, EMBED), dtype=jnp.float32).T * 0.1
    b1 = jax.random.normal(k_b1, (1, HIDDEN), dtype=jnp.float32) * 0.1
    w2 = jax.random.normal(k_w2, (VOCAB, HIDDEN), dtype=jnp.float32).T * 0.1
    b2 = jax.random.normal(k_b2, (1, VOCAB), dtype=jnp.float32) * 0.1

    indices = jax.random.randint(k_idx, (BATCH, CONTEXT), 0, VOCAB, dtype=jnp.int32)

    # One-time prep (fold + pad + bf16 cast), then batched forward under jit.
    params = prepare_cbow_params(emb, w1, b1, w2, b2)
    log_probs = cbow_forward_batched(indices, params, VOCAB)
    log_probs = jax.block_until_ready(log_probs)
    assert log_probs.shape == (BATCH, VOCAB)

    # Tight check against a reference using the kernel's exact rounding points.
    ref_exact = cbow_reference_kernel_math(indices, params, VOCAB)
    assert jnp.allclose(log_probs, ref_exact, atol=1e-4, rtol=1e-4), \
        "mismatch vs kernel-math reference"

    # Loose sanity check against the pure-f32 module reference (bf16 W1e shifts
    # log-probs by O(1e-2)).
    ref_f32 = cbow_reference_f32(indices, emb, w1, b1, w2, b2)
    assert jnp.allclose(log_probs, ref_f32, atol=1e-1), \
        "drifted too far from f32 module reference"

    # Single-example path == original nn.Module forward semantics.
    single = cbow_forward(indices[0], params, VOCAB)
    single = jax.block_until_ready(single)
    assert single.shape == (1, VOCAB)
    assert jnp.allclose(single, ref_exact[:1], atol=1e-4, rtol=1e-4), \
        "single-example mismatch"

    print("KERNEL_OK")
</pallas_src>

<mosaic_0001>
module attributes {stable_mosaic.version = 11 : i64} {
  func.func @cbow_kernel(%arg0: i32, %arg1: memref<256x8xi32, #tpu.memory_space<vmem>>, %arg2: memref<128x128xbf16, #tpu.memory_space<vmem>>, %arg3: memref<1x128xf32, #tpu.memory_space<vmem>>, %arg4: memref<128x128xf32, #tpu.memory_space<vmem>>, %arg5: memref<1x128xf32, #tpu.memory_space<vmem>>, %arg6: memref<256x128xf32, #tpu.memory_space<vmem>>) attributes {dimension_semantics = [#tpu.dimension_semantics<parallel>], iteration_bounds = array<i64: 1>, scalar_prefetch = 0 : i64, scratch_operands = 0 : i64, tpu.core_type = #tpu.core_type<tc>, window_params = [{transform_indices = @transform_0, window_bounds = array<i64: 256, 8>}, {pipeline_mode = #tpu.pipeline_mode<synchronous>, transform_indices = @transform_1, window_bounds = array<i64: 128, 128>}, {pipeline_mode = #tpu.pipeline_mode<synchronous>, transform_indices = @transform_2, window_bounds = array<i64: 1, 128>}, {pipeline_mode = #tpu.pipeline_mode<synchronous>, transform_indices = @transform_3, window_bounds = array<i64: 128, 128>}, {pipeline_mode = #tpu.pipeline_mode<synchronous>, transform_indices = @transform_4, window_bounds = array<i64: 1, 128>}, {transform_indices = @transform_5, window_bounds = array<i64: 256, 128>}]} {
    %c0 = arith.constant 0 : index
    %c0_0 = arith.constant 0 : index
    %0 = vector.load %arg1[%c0, %c0_0] : memref<256x8xi32, #tpu.memory_space<vmem>>, vector<256x8xi32>
    %1 = tpu.iota {dimensions = array<i32: 1>} : vector<1x128xi32>
    %cst = arith.constant 0.000000e+00 : f32
    %2 = vector.broadcast %cst : f32 to vector<256x128xf32>
    %3 = vector.extract_strided_slice %0 {offsets = [0, 0], sizes = [256, 1], strides = [1, 1]} : vector<256x8xi32> to vector<256x1xi32>
    %4 = vector.broadcast %3 : vector<256x1xi32> to vector<256x128xi32>
    %5 = vector.broadcast %1 : vector<1x128xi32> to vector<256x128xi32>
    %6 = arith.cmpi eq, %4, %5 : vector<256x128xi32>
    %7 = arith.extui %6 : vector<256x128xi1> to vector<256x128xi32>
    %8 = arith.sitofp %7 : vector<256x128xi32> to vector<256x128xf32>
    %9 = arith.addf %2, %8 : vector<256x128xf32>
    %10 = vector.extract_strided_slice %0 {offsets = [0, 1], sizes = [256, 1], strides = [1, 1]} : vector<256x8xi32> to vector<256x1xi32>
    %11 = vector.broadcast %10 : vector<256x1xi32> to vector<256x128xi32>
    %12 = vector.broadcast %1 : vector<1x128xi32> to vector<256x128xi32>
    %13 = arith.cmpi eq, %11, %12 : vector<256x128xi32>
    %14 = arith.extui %13 : vector<256x128xi1> to vector<256x128xi32>
    %15 = arith.sitofp %14 : vector<256x128xi32> to vector<256x128xf32>
    %16 = arith.addf %9, %15 : vector<256x128xf32>
    %17 = vector.extract_strided_slice %0 {offsets = [0, 2], sizes = [256, 1], strides = [1, 1]} : vector<256x8xi32> to vector<256x1xi32>
    %18 = vector.broadcast %17 : vector<256x1xi32> to vector<256x128xi32>
    %19 = vector.broadcast %1 : vector<1x128xi32> to vector<256x128xi32>
    %20 = arith.cmpi eq, %18, %19 : vector<256x128xi32>
    %21 = arith.extui %20 : vector<256x128xi1> to vector<256x128xi32>
    %22 = arith.sitofp %21 : vector<256x128xi32> to vector<256x128xf32>
    %23 = arith.addf %16, %22 : vector<256x128xf32>
    %24 = vector.extract_strided_slice %0 {offsets = [0, 3], sizes = [256, 1], strides = [1, 1]} : vector<256x8xi32> to vector<256x1xi32>
    %25 = vector.broadcast %24 : vector<256x1xi32> to vector<256x128xi32>
    %26 = vector.broadcast %1 : vector<1x128xi32> to vector<256x128xi32>
    %27 = arith.cmpi eq, %25, %26 : vector<256x128xi32>
    %28 = arith.extui %27 : vector<256x128xi1> to vector<256x128xi32>
    %29 = arith.sitofp %28 : vector<256x128xi32> to vector<256x128xf32>
    %30 = arith.addf %23, %29 : vector<256x128xf32>
    %31 = vector.extract_strided_slice %0 {offsets = [0, 4], sizes = [256, 1], strides = [1, 1]} : vector<256x8xi32> to vector<256x1xi32>
    %32 = vector.broadcast %31 : vector<256x1xi32> to vector<256x128xi32>
    %33 = vector.broadcast %1 : vector<1x128xi32> to vector<256x128xi32>
    %34 = arith.cmpi eq, %32, %33 : vector<256x128xi32>
    %35 = arith.extui %34 : vector<256x128xi1> to vector<256x128xi32>
    %36 = arith.sitofp %35 : vector<256x128xi32> to vector<256x128xf32>
    %37 = arith.addf %30, %36 : vector<256x128xf32>
    %38 = vector.extract_strided_slice %0 {offsets = [0, 5], sizes = [256, 1], strides = [1, 1]} : vector<256x8xi32> to vector<256x1xi32>
    %39 = vector.broadcast %38 : vector<256x1xi32> to vector<256x128xi32>
    %40 = vector.broadcast %1 : vector<1x128xi32> to vector<256x128xi32>
    %41 = arith.cmpi eq, %39, %40 : vector<256x128xi32>
    %42 = arith.extui %41 : vector<256x128xi1> to vector<256x128xi32>
    %43 = arith.sitofp %42 : vector<256x128xi32> to vector<256x128xf32>
    %44 = arith.addf %37, %43 : vector<256x128xf32>
    %45 = vector.extract_strided_slice %0 {offsets = [0, 6], sizes = [256, 1], strides = [1, 1]} : vector<256x8xi32> to vector<256x1xi32>
    %46 = vector.broadcast %45 : vector<256x1xi32> to vector<256x128xi32>
    %47 = vector.broadcast %1 : vector<1x128xi32> to vector<256x128xi32>
    %48 = arith.cmpi eq, %46, %47 : vector<256x128xi32>
    %49 = arith.extui %48 : vector<256x128xi1> to vector<256x128xi32>
    %50 = arith.sitofp %49 : vector<256x128xi32> to vector<256x128xf32>
    %51 = arith.addf %44, %50 : vector<256x128xf32>
    %52 = vector.extract_strided_slice %0 {offsets = [0, 7], sizes = [256, 1], strides = [1, 1]} : vector<256x8xi32> to vector<256x1xi32>
    %53 = vector.broadcast %52 : vector<256x1xi32> to vector<256x128xi32>
    %54 = vector.broadcast %1 : vector<1x128xi32> to vector<256x128xi32>
    %55 = arith.cmpi eq, %53, %54 : vector<256x128xi32>
    %56 = arith.extui %55 : vector<256x128xi1> to vector<256x128xi32>
    %57 = arith.sitofp %56 : vector<256x128xi32> to vector<256x128xf32>
    %58 = arith.addf %51, %57 : vector<256x128xf32>
    %59 = arith.truncf %58 : vector<256x128xf32> to vector<256x128xbf16>
    %c0_1 = arith.constant 0 : index
    %c0_2 = arith.constant 0 : index
    %60 = vector.load %arg2[%c0_1, %c0_2] : memref<128x128xbf16, #tpu.memory_space<vmem>>, vector<128x128xbf16>
    %cst_3 = arith.constant dense<0.000000e+00> : vector<256x128xf32>
    %61 = tpu.matmul %59, %60, %cst_3 {dimension_numbers = #tpu.dot_dimension_numbers<[1], [0], [0], [1], [0, 0, 1, 1], [], []>} : vector<256x128xbf16>, vector<128x128xbf16>, vector<256x128xf32> -> vector<256x128xf32>
    %c0_4 = arith.constant 0 : index
    %c0_5 = arith.constant 0 : index
    %62 = vector.load %arg3[%c0_4, %c0_5] : memref<1x128xf32, #tpu.memory_space<vmem>>, vector<1x128xf32>
    %63 = vector.broadcast %62 : vector<1x128xf32> to vector<256x128xf32>
    %64 = arith.addf %61, %63 : vector<256x128xf32>
    %cst_6 = arith.constant 0.000000e+00 : f32
    %65 = vector.broadcast %cst_6 : f32 to vector<256x128xf32>
    %66 = arith.maximumf %64, %65 : vector<256x128xf32>
    %c0_7 = arith.constant 0 : index
    %c0_8 = arith.constant 0 : index
    %67 = vector.load %arg4[%c0_7, %c0_8] : memref<128x128xf32, #tpu.memory_space<vmem>>, vector<128x128xf32>
    %cst_9 = arith.constant dense<0.000000e+00> : vector<256x128xf32>
    %68 = tpu.matmul %66, %67, %cst_9 {dimension_numbers = #tpu.dot_dimension_numbers<[1], [0], [0], [1], [0, 0, 1, 1], [], []>} : vector<256x128xf32>, vector<128x128xf32>, vector<256x128xf32> -> vector<256x128xf32>
    %c0_10 = arith.constant 0 : index
    %c0_11 = arith.constant 0 : index
    %69 = vector.load %arg5[%c0_10, %c0_11] : memref<1x128xf32, #tpu.memory_space<vmem>>, vector<1x128xf32>
    %70 = vector.broadcast %69 : vector<1x128xf32> to vector<256x128xf32>
    %71 = arith.addf %68, %70 : vector<256x128xf32>
    %cst_12 = arith.constant dense<0xFF800000> : vector<256xf32>
    %72 = vector.multi_reduction <maximumf>, %71, %cst_12 [1] : vector<256x128xf32> to vector<256xf32>
    %73 = vector.shape_cast %72 : vector<256xf32> to vector<256x1xf32>
    %74 = vector.broadcast %73 : vector<256x1xf32> to vector<256x128xf32>
    %75 = arith.subf %71, %74 : vector<256x128xf32>
    %76 = math.exp %75 : vector<256x128xf32>
    %cst_13 = arith.constant dense<0.000000e+00> : vector<256xf32>
    %77 = vector.multi_reduction <add>, %76, %cst_13 [1] : vector<256x128xf32> to vector<256xf32>
    %78 = vector.shape_cast %77 : vector<256xf32> to vector<256x1xf32>
    %79 = math.log %78 : vector<256x1xf32>
    %80 = vector.broadcast %79 : vector<256x1xf32> to vector<256x128xf32>
    %81 = arith.subf %75, %80 : vector<256x128xf32>
    %c0_14 = arith.constant 0 : index
    %c0_15 = arith.constant 0 : index
    %82 = vector.load %arg6[%c0_14, %c0_15] : memref<256x128xf32, #tpu.memory_space<vmem>>, vector<256x128xf32>
    tpu.vector_store %arg6[%c0_14, %c0_15], %81 {strides = array<i32>} : memref<256x128xf32, #tpu.memory_space<vmem>>, vector<256x128xf32>,
    return
  }
  func.func @transform_0(%arg0: i32) -> (i32, i32) {
    %c0_i32 = arith.constant 0 : i32
    %c0_i32_0 = arith.constant 0 : i32
    return %arg0, %c0_i32 : i32, i32
  }
  func.func @transform_1(%arg0: i32) -> (i32, i32) {
    %c0_i32 = arith.constant 0 : i32
    %c0_i32_0 = arith.constant 0 : i32
    %c0_i32_1 = arith.constant 0 : i32
    return %c0_i32, %c0_i32_0 : i32, i32
  }
  func.func @transform_2(%arg0: i32) -> (i32, i32) {
    %c0_i32 = arith.constant 0 : i32
    %c0_i32_0 = arith.constant 0 : i32
    %c0_i32_1 = arith.constant 0 : i32
    return %c0_i32, %c0_i32_0 : i32, i32
  }
  func.func @transform_3(%arg0: i32) -> (i32, i32) {
    %c0_i32 = arith.constant 0 : i32
    %c0_i32_0 = arith.constant 0 : i32
    %c0_i32_1 = arith.constant 0 : i32
    return %c0_i32, %c0_i32_0 : i32, i32
  }
  func.func @transform_4(%arg0: i32) -> (i32, i32) {
    %c0_i32 = arith.constant 0 : i32
    %c0_i32_0 = arith.constant 0 : i32
    %c0_i32_1 = arith.constant 0 : i32
    return %c0_i32, %c0_i32_0 : i32, i32
  }
  func.func @transform_5(%arg0: i32) -> (i32, i32) {
    %c0_i32 = arith.constant 0 : i32
    %c0_i32_0 = arith.constant 0 : i32
    return %arg0, %c0_i32 : i32, i32
  }
}

</mosaic_0001>

<bundles_post_ra>
// kernel: _cbow_forward_padded.1
= control target key start
LH: loop header
LB: loop body
LE: loop exit
PB: predicated region body
PF: predicated region fallthrough
CT: control target
= control target key end

     0   :  { %v3414_v0 = vmov 0   ;;  %v3415_v33 = vmov 1   ;;  %v3416_v38 = vmov 2   ;;  %s5816_s0 = inlined_call_operand.vmem [shape: s32[256,8], index: 0, kind: input, shape index: {}]   ;;  %s5817_s1 = inlined_call_operand.vmem [shape: bf16[128,128], index: 1, kind: input, shape index: {}]   ;;  %s5818_s3 = inlined_call_operand.vmem [shape: f32[128,128], index: 3, kind: input, shape index: {}]   ;;  %s5819_s2 = inlined_call_operand.vmem [shape: f32[1,128], index: 2, kind: input, shape index: {}]   ;;  %s5820_s4 = inlined_call_operand.vmem [shape: f32[1,128], index: 4, kind: input, shape index: {}]   ;;  %s5821_s5 = inlined_call_operand.vmem [shape: f32[256,128], index: 5, kind: output, shape index: {}]  }
   0x1   :  { %3207 = vset.pattern.permute.xlu1 %v3414_v0  ;;  %3206 = vset.pattern.permute.xlu0 %v3414_v0  ;;  %v3456_v1 = vld [vmem:[%s5816_s0 + $0x10] sm:$0xff]  ;;  %v3461_v2 = vld [vmem:[%s5816_s0] sm:$0xff]  ;;  %v3468_v3 = vld [vmem:[%s5816_s0 + $0x18] sm:$0xff] }
   0x2   :  { %62 = vperm.xlu1 %3207, %v3456_v1   ;;  %56 = vperm.xlu0 %3206, %v3461_v2   ;;  %v3473_v4 = vld [vmem:[%s5816_s0 + $0x8] sm:$0xff]  ;;  %v3485_v6 = vld [vmem:[%s5816_s0 + $0x20] sm:$0xff]  ;;  %v3492_v7 = vld [vmem:[%s5816_s0 + $0x38] sm:$0xff] }
   0x3   :  { %v3480_v5 = vld [vmem:[%s5816_s0 + $0x28] sm:$0xff]  ;;  %v3497_v8 = vld [vmem:[%s5816_s0 + $0x30] sm:$0xff]  ;;  %v3509_v10 = vld [vmem:[%s5816_s0 + $0x40] sm:$0xff] }
   0x4   :  { %v3504_v9 = vld [vmem:[%s5816_s0 + $0x48] sm:$0xff]  ;;  %v3516_v11 = vld [vmem:[%s5816_s0 + $0x58] sm:$0xff]  ;;  %v3521_v12 = vld [vmem:[%s5816_s0 + $0x50] sm:$0xff] }
   0x5   :  { %v3528_v13 = vld [vmem:[%s5816_s0 + $0x68] sm:$0xff]  ;;  %v3533_v14 = vld [vmem:[%s5816_s0 + $0x60] sm:$0xff]  ;;  %v3540_v15 = vld [vmem:[%s5816_s0 + $0x78] sm:$0xff] }
   0x6   :  { %65 = vperm.xlu1 %3207, %v3468_v3   ;;  %59 = vperm.xlu0 %3206, %v3473_v4   ;;  %v3545_v16 = vld [vmem:[%s5816_s0 + $0x70] sm:$0xff]  ;;  %v3552_v17 = vld [vmem:[%s5816_s0 + $0x88] sm:$0xff]  ;;  %v3557_v18 = vld [vmem:[%s5816_s0 + $0x80] sm:$0xff] }
   0x7   :  { %v3564_v19 = vld [vmem:[%s5816_s0 + $0x98] sm:$0xff]  ;;  %v3569_v20 = vld [vmem:[%s5816_s0 + $0x90] sm:$0xff]  ;;  %v3576_v21 = vld [vmem:[%s5816_s0 + $0xa8] sm:$0xff] }
   0x8   :  { %v3581_v22 = vld [vmem:[%s5816_s0 + $0xa0] sm:$0xff]  ;;  %v3588_v23 = vld [vmem:[%s5816_s0 + $0xb8] sm:$0xff]  ;;  %v3593_v24 = vld [vmem:[%s5816_s0 + $0xb0] sm:$0xff] }
   0x9   :  { %v3600_v25 = vld [vmem:[%s5816_s0 + $0xc8] sm:$0xff]  ;;  %v3605_v26 = vld [vmem:[%s5816_s0 + $0xc0] sm:$0xff]  ;;  %v3612_v27 = vld [vmem:[%s5816_s0 + $0xd8] sm:$0xff] }
   0xa   :  { %71 = vperm.xlu1 %3207, %v3480_v5   ;;  %68 = vperm.xlu0 %3206, %v3485_v6   ;;  %v3617_v28 = vld [vmem:[%s5816_s0 + $0xd0] sm:$0xff]  ;;  %v3624_v29 = vld [vmem:[%s5816_s0 + $0xe8] sm:$0xff]  ;;  %v3629_v30 = vld [vmem:[%s5816_s0 + $0xe0] sm:$0xff] }
   0xb   :  { %v3636_v31 = vld [vmem:[%s5816_s0 + $0xf8] sm:$0xff]  ;;  %v3641_v32 = vld [vmem:[%s5816_s0 + $0xf0] sm:$0xff] }
   0xe   :  { %77 = vperm.xlu1 %3207, %v3492_v7   ;;  %74 = vperm.xlu0 %3206, %v3497_v8  }
  0x12   :  { %83 = vperm.xlu1 %3207, %v3504_v9   ;;  %80 = vperm.xlu0 %3206, %v3509_v10  }
  0x16   :  { %89 = vperm.xlu1 %3207, %v3516_v11   ;;  %86 = vperm.xlu0 %3206, %v3521_v12  }
  0x1a   :  { %95 = vperm.xlu1 %3207, %v3528_v13   ;;  %92 = vperm.xlu0 %3206, %v3533_v14  }
  0x1e   :  { %101 = vperm.xlu1 %3207, %v3540_v15   ;;  %98 = vperm.xlu0 %3206, %v3545_v16  }
  0x22   :  { %107 = vperm.xlu1 %3207, %v3552_v17   ;;  %104 = vperm.xlu0 %3206, %v3557_v18  }
  0x26   :  { %113 = vperm.xlu1 %3207, %v3564_v19   ;;  %110 = vperm.xlu0 %3206, %v3569_v20  }
  0x2a   :  { %119 = vperm.xlu1 %3207, %v3576_v21   ;;  %116 = vperm.xlu0 %3206, %v3581_v22  }
  0x2e   :  { %125 = vperm.xlu1 %3207, %v3588_v23   ;;  %122 = vperm.xlu0 %3206, %v3593_v24  }
  0x32   :  { %131 = vperm.xlu1 %3207, %v3600_v25   ;;  %128 = vperm.xlu0 %3206, %v3605_v26  }
  0x36   :  { %137 = vperm.xlu1 %3207, %v3612_v27   ;;  %134 = vperm.xlu0 %3206, %v3617_v28  }
  0x3a   :  { %143 = vperm.xlu1 %3207, %v3624_v29   ;;  %140 = vperm.xlu0 %3206, %v3629_v30  }
  0x3e   :  { %149 = vperm.xlu1 %3207, %v3636_v31   ;;  %146 = vperm.xlu0 %3206, %v3641_v32  }
  0x42   :  { %3209 = vset.pattern.permute.xlu1 %v3415_v33  ;;  %3208 = vset.pattern.permute.xlu0 %v3415_v33 }
  0x43   :  { %283 = vperm.xlu1 %3209, %v3473_v4   ;;  %280 = vperm.xlu0 %3208, %v3461_v2  }
  0x47   :  { %286 = vperm.xlu1 %3209, %v3456_v1   ;;  %289 = vperm.xlu0 %3208, %v3468_v3  }
  0x4b   :  { %292 = vperm.xlu1 %3209, %v3485_v6   ;;  %295 = vperm.xlu0 %3208, %v3480_v5  }
  0x4f   :  { %298 = vperm.xlu1 %3209, %v3497_v8   ;;  %301 = vperm.xlu0 %3208, %v3492_v7  }
  0x53   :  { %304 = vperm.xlu1 %3209, %v3509_v10   ;;  %307 = vperm.xlu0 %3208, %v3504_v9  }
  0x57   :  { %310 = vperm.xlu1 %3209, %v3521_v12   ;;  %313 = vperm.xlu0 %3208, %v3516_v11  }
  0x5b   :  { %316 = vperm.xlu1 %3209, %v3533_v14   ;;  %319 = vperm.xlu0 %3208, %v3528_v13  }
  0x5f   :  { %322 = vperm.xlu1 %3209, %v3545_v16   ;;  %325 = vperm.xlu0 %3208, %v3540_v15  }
  0x63   :  { %328 = vperm.xlu1 %3209, %v3557_v18   ;;  %331 = vperm.xlu0 %3208, %v3552_v17  }
  0x67   :  { %334 = vperm.xlu1 %3209, %v3569_v20   ;;  %337 = vperm.xlu0 %3208, %v3564_v19  }
  0x6b   :  { %340 = vperm.xlu1 %3209, %v3581_v22   ;;  %343 = vperm.xlu0 %3208, %v3576_v21  }
  0x6f   :  { %346 = vperm.xlu1 %3209, %v3593_v24   ;;  %349 = vperm.xlu0 %3208, %v3588_v23  }
  0x73   :  { %352 = vperm.xlu1 %3209, %v3605_v26   ;;  %355 = vperm.xlu0 %3208, %v3600_v25  }
  0x77   :  { %358 = vperm.xlu1 %3209, %v3617_v28   ;;  %361 = vperm.xlu0 %3208, %v3612_v27  }
  0x7b   :  { %364 = vperm.xlu1 %3209, %v3629_v30   ;;  %367 = vperm.xlu0 %3208, %v3624_v29  }
  0x7d   :  { %v3675_v34 = vpop.permute.xlu1 %62  ;;  %v3677_v35 = vpop.permute.xlu0 %56 }
  0x7f   :  { %370 = vperm.xlu1 %3209, %v3641_v32   ;;  %373 = vperm.xlu0 %3208, %v3636_v31  }
  0x81   :  { %v3681_v36 = vpop.permute.xlu1 %65  ;;  %v3683_v37 = vpop.permute.xlu0 %59 }
  0x83   :  { %3210 = vset.pattern.permute.xlu1 %v3416_v38  ;;  %3211 = vset.pattern.permute.xlu0 %v3416_v38 }
  0x84   :  { %504 = vperm.xlu1 %3210, %v3461_v2   ;;  %507 = vperm.xlu0 %3211, %v3473_v4  }
  0x85   :  { %v3687_v39 = vpop.permute.xlu1 %71  ;;  %v3689_v40 = vpop.permute.xlu0 %68 }
  0x88   :  { %510 = vperm.xlu1 %3210, %v3456_v1   ;;  %516 = vperm.xlu0 %3211, %v3485_v6  }
  0x89   :  { %v3693_v41 = vpop.permute.xlu1 %77  ;;  %v3695_v42 = vpop.permute.xlu0 %74 }
  0x8c   :  { %513 = vperm.xlu1 %3210, %v3468_v3   ;;  %522 = vperm.xlu0 %3211, %v3497_v8  }
  0x8d   :  { %v3699_v43 = vpop.permute.xlu1 %83  ;;  %v3701_v44 = vpop.permute.xlu0 %80 }
  0x8e   :  { %5845 = vst [vmem:[#allocation2_spill] sm:$0xff] %v3699_v43  ;;  %5846 = vst [vmem:[#allocation3_spill] sm:$0xff] %v3701_v44 }
  0x90   :  { %519 = vperm.xlu1 %3210, %v3480_v5   ;;  %528 = vperm.xlu0 %3211, %v3509_v10  }
  0x91   :  { %v3705_v45 = vpop.permute.xlu1 %89  ;;  %v3707_v46 = vpop.permute.xlu0 %86 }
  0x92   :  { %5847 = vst [vmem:[#allocation4_spill] sm:$0xff] %v3705_v45  ;;  %5848 = vst [vmem:[#allocation5_spill] sm:$0xff] %v3707_v46  ;;  %v5898_v46 = vmov 7  }
  0x94   :  { %525 = vperm.xlu1 %3210, %v3492_v7   ;;  %534 = vperm.xlu0 %3211, %v3521_v12  }
  0x95   :  { %v3711_v47 = vpop.permute.xlu1 %95  ;;  %v3713_v48 = vpop.permute.xlu0 %92 }
  0x96   :  { %5849 = vst [vmem:[#allocation6_spill] sm:$0xff] %v3711_v47  ;;  %5850 = vst [vmem:[#allocation7_spill] sm:$0xff] %v3713_v48 }
  0x98   :  { %531 = vperm.xlu1 %3210, %v3504_v9   ;;  %540 = vperm.xlu0 %3211, %v3533_v14  }
  0x99   :  { %v3717_v49 = vpop.permute.xlu1 %101  ;;  %v3719_v50 = vpop.permute.xlu0 %98 }
  0x9a   :  { %5851 = vst [vmem:[#allocation8_spill] sm:$0xff] %v3717_v49  ;;  %5852 = vst [vmem:[#allocation9_spill] sm:$0xff] %v3719_v50 }
  0x9c   :  { %537 = vperm.xlu1 %3210, %v3516_v11   ;;  %546 = vperm.xlu0 %3211, %v3545_v16  }
  0x9d   :  { %v3723_v51 = vpop.permute.xlu1 %107  ;;  %v3725_v52 = vpop.permute.xlu0 %104 }
  0x9e   :  { %5853 = vst [vmem:[#allocation10_spill] sm:$0xff] %v3723_v51  ;;  %5854 = vst [vmem:[#allocation11_spill] sm:$0xff] %v3725_v52 }
  0xa0   :  { %543 = vperm.xlu1 %3210, %v3528_v13   ;;  %552 = vperm.xlu0 %3211, %v3557_v18  }
  0xa1   :  { %v3729_v53 = vpop.permute.xlu1 %113  ;;  %v3731_v54 = vpop.permute.xlu0 %110 }
  0xa2   :  { %5855 = vst [vmem:[#allocation12_spill] sm:$0xff] %v3729_v53  ;;  %5856 = vst [vmem:[#allocation13_spill] sm:$0xff] %v3731_v54 }
  0xa4   :  { %549 = vperm.xlu1 %3210, %v3540_v15   ;;  %558 = vperm.xlu0 %3211, %v3569_v20  }
  0xa5   :  { %v3735_v55 = vpop.permute.xlu1 %119  ;;  %v3737_v56 = vpop.permute.xlu0 %116 }
  0xa6   :  { %5857 = vst [vmem:[#allocation14_spill] sm:$0xff] %v3735_v55  ;;  %5858 = vst [vmem:[#allocation15_spill] sm:$0xff] %v3737_v56 }
  0xa8   :  { %555 = vperm.xlu1 %3210, %v3552_v17   ;;  %564 = vperm.xlu0 %3211, %v3581_v22  }
  0xa9   :  { %v3741_v57 = vpop.permute.xlu1 %125  ;;  %v3743_v58 = vpop.permute.xlu0 %122 }
  0xaa   :  { %5859 = vst [vmem:[#allocation16_spill] sm:$0xff] %v3741_v57  ;;  %5860 = vst [vmem:[#allocation17_spill] sm:$0xff] %v3743_v58 }
  0xac   :  { %561 = vperm.xlu1 %3210, %v3564_v19   ;;  %570 = vperm.xlu0 %3211, %v3593_v24  }
  0xad   :  { %v3747_v59 = vpop.permute.xlu1 %131  ;;  %v3749_v60 = vpop.permute.xlu0 %128 }
  0xae   :  { %5861 = vst [vmem:[#allocation18_spill] sm:$0xff] %v3747_v59  ;;  %5862 = vst [vmem:[#allocation19_spill] sm:$0xff] %v3749_v60  ;;  %v5826_v60 = vmov 3  }
  0xb0   :  { %567 = vperm.xlu1 %3210, %v3576_v21   ;;  %576 = vperm.xlu0 %3211, %v3605_v26  }
  0xb1   :  { %v3753_v61 = vpop.permute.xlu1 %137  ;;  %v3755_v62 = vpop.permute.xlu0 %134 }
  0xb2   :  { %5863 = vst [vmem:[#allocation20_spill] sm:$0xff] %v3753_v61  ;;  %5864 = vst [vmem:[#allocation21_spill] sm:$0xff] %v3755_v62 }
  0xb4   :  { %573 = vperm.xlu1 %3210, %v3588_v23   ;;  %582 = vperm.xlu0 %3211, %v3617_v28  }
  0xb5   :  { %v3759_v63 = vpop.permute.xlu1 %143  ;;  %v3761_v0 = vpop.permute.xlu0 %140 }
  0xb6   :  { %5865 = vst [vmem:[#allocation22_spill] sm:$0xff] %v3759_v63  ;;  %5866 = vst [vmem:[#allocation23_spill] sm:$0xff] %v3761_v0  ;;  %v5824_v63 = vmov 6  }
  0xb8   :  { %579 = vperm.xlu1 %3210, %v3600_v25   ;;  %588 = vperm.xlu0 %3211, %v3629_v30  }
  0xb9   :  { %v3765_v33 = vpop.permute.xlu1 %149  ;;  %v3767_v38 = vpop.permute.xlu0 %146 }
  0xba   :  { %5867 = vst [vmem:[#allocation24_spill] sm:$0xff] %v3765_v33  ;;  %5868 = vst [vmem:[#allocation25_spill] sm:$0xff] %v3767_v38 }
  0xbc   :  { %585 = vperm.xlu1 %3210, %v3612_v27   ;;  %594 = vperm.xlu0 %3211, %v3641_v32  }
  0xbe   :  { %v3771_v62 = vpop.permute.xlu1 %283  ;;  %v3773_v61 = vpop.permute.xlu0 %280 }
  0xc0   :  { %591 = vperm.xlu1 %3210, %v3624_v29   ;;  %3216 = vset.pattern.permute.xlu0 %v5824_v63  ;;  %v5828_v63 = vmov 7  }
  0xc1   :  { %1403 = vperm.xlu0 %3216, %v3473_v4  }
  0xc2   :  { %v3778_v0 = vpop.permute.xlu1 %286  ;;  %v3780_v33 = vpop.permute.xlu0 %289 }
  0xc4   :  { %597 = vperm.xlu1 %3210, %v3636_v31  }
  0xc5   :  { %1415 = vperm.xlu0 %3216, %v3480_v5  }
  0xc6   :  { %v3784_v38 = vpop.permute.xlu1 %292  ;;  %v3786_v59 = vpop.permute.xlu0 %295 }
  0xc8   :  { %3212 = vset.pattern.permute.xlu1 %v5826_v60 }
  0xc9   :  { %731 = vperm.xlu1 %3212, %v3473_v4   ;;  %3221 = vset.pattern.permute.xlu0 %v5828_v63 }
  0xca   :  { %v3791_v57 = vpop.permute.xlu1 %298  ;;  %1624 = vperm.xlu0 %3221, %v3461_v2   ;;  %v3794_v58 = vpop.permute.xlu0 %301 }
  0xcd   :  { %734 = vperm.xlu1 %3212, %v3456_v1  }
  0xce   :  { %v3797_v56 = vpop.permute.xlu1 %304  ;;  %1633 = vperm.xlu0 %3221, %v3468_v3   ;;  %v3800_v55 = vpop.permute.xlu0 %307 }
  0xcf   :  { %5869 = vst [vmem:[#allocation26_spill] sm:$0xff] %v3797_v56  ;;  %5870 = vst [vmem:[#allocation27_spill] sm:$0xff] %v3800_v55 }
  0xd1   :  { %740 = vperm.xlu1 %3212, %v3485_v6  }
  0xd2   :  { %v3803_v60 = vpop.permute.xlu1 %310  ;;  %1636 = vperm.xlu0 %3221, %v3485_v6   ;;  %v3806_v63 = vpop.permute.xlu0 %313 }
  0xd3   :  { %5871 = vst [vmem:[#allocation28_spill] sm:$0xff] %v3803_v60  ;;  %5872 = vst [vmem:[#allocation29_spill] sm:$0xff] %v3806_v63 }
  0xd5   :  { %746 = vperm.xlu1 %3212, %v3497_v8  }
  0xd6   :  { %v3809_v53 = vpop.permute.xlu1 %316  ;;  %1645 = vperm.xlu0 %3221, %v3492_v7   ;;  %v3812_v54 = vpop.permute.xlu0 %319 }
  0xd7   :  { %5873 = vst [vmem:[#allocation30_spill] sm:$0xff] %v3809_v53  ;;  %5874 = vst [vmem:[#allocation31_spill] sm:$0xff] %v3812_v54 }
  0xd9   :  { %752 = vperm.xlu1 %3212, %v3509_v10  }
  0xda   :  { %v3815_v51 = vpop.permute.xlu1 %322  ;;  %1648 = vperm.xlu0 %3221, %v3509_v10   ;;  %v3818_v52 = vpop.permute.xlu0 %325 }
  0xdb   :  { %5875 = vst [vmem:[#allocation32_spill] sm:$0xff] %v3815_v51  ;;  %5876 = vst [vmem:[#allocation33_spill] sm:$0xff] %v3818_v52 }
  0xdd   :  { %758 = vperm.xlu1 %3212, %v3521_v12  }
  0xde   :  { %v3821_v60 = vpop.permute.xlu1 %328  ;;  %1657 = vperm.xlu0 %3221, %v3516_v11   ;;  %v3824_v63 = vpop.permute.xlu0 %331 }
  0xdf   :  { %5877 = vst [vmem:[#allocation34_spill] sm:$0xff] %v3821_v60  ;;  %5878 = vst [vmem:[#allocation35_spill] sm:$0xff] %v3824_v63 }
  0xe1   :  { %764 = vperm.xlu1 %3212, %v3533_v14  }
  0xe2   :  { %v3827_v53 = vpop.permute.xlu1 %334  ;;  %1660 = vperm.xlu0 %3221, %v3533_v14   ;;  %v3830_v54 = vpop.permute.xlu0 %337 }
  0xe3   :  { %5879 = vst [vmem:[#allocation36_spill] sm:$0xff] %v3827_v53  ;;  %5880 = vst [vmem:[#allocation37_spill] sm:$0xff] %v3830_v54  ;;  %v5830_v53 = vmov 4  }
  0xe5   :  { %770 = vperm.xlu1 %3212, %v3545_v16  }
  0xe6   :  { %v3833_v51 = vpop.permute.xlu1 %340  ;;  %1678 = vperm.xlu0 %3221, %v3569_v20   ;;  %v3836_v52 = vpop.permute.xlu0 %343 }
  0xe7   :  { %5881 = vst [vmem:[#allocation38_spill] sm:$0xff] %v3833_v51  ;;  %5882 = vst [vmem:[#allocation39_spill] sm:$0xff] %v3836_v52 }
  0xe9   :  { %776 = vperm.xlu1 %3212, %v3557_v18  }
  0xea   :  { %v3839_v60 = vpop.permute.xlu1 %346  ;;  %1687 = vperm.xlu0 %3221, %v3576_v21   ;;  %v3842_v63 = vpop.permute.xlu0 %349 }
  0xeb   :  { %5883 = vst [vmem:[#allocation40_spill] sm:$0xff] %v3839_v60  ;;  %5884 = vst [vmem:[#allocation41_spill] sm:$0xff] %v3842_v63  ;;  %v5888_v60 = vmov 3  }
  0xed   :  { %3213 = vset.pattern.permute.xlu1 %v5830_v53 }
  0xee   :  { %v3845_v54 = vpop.permute.xlu1 %352  ;;  %952 = vperm.xlu1 %3213, %v3461_v2   ;;  %1690 = vperm.xlu0 %3221, %v3593_v24   ;;  %v3849_v51 = vpop.permute.xlu0 %355 }
  0xef   :  { %5885 = vst [vmem:[#allocation42_spill] sm:$0xff] %v3845_v54  ;;  %5886 = vst [vmem:[#allocation43_spill] sm:$0xff] %v3849_v51  ;;  %v5834_v51 = vmov 5  }
  0xf2   :  { %v3851_v52 = vpop.permute.xlu1 %358  ;;  %958 = vperm.xlu1 %3213, %v3456_v1   ;;  %3246 = vset.pattern.permute.xlu0 %v5888_v60  ;;  %v3855_v50 = vpop.permute.xlu0 %361 }
  0xf3   :  { %5887 = vst [vmem:[#allocation44_spill] sm:$0xff] %v3851_v52  ;;  %5889 = vst [vmem:[#allocation45_spill] sm:$0xff] %v3855_v50  ;;  %728 = vperm.xlu0 %3246, %v3461_v2   ;;  %v5894_v50 = vmov 6  }
  0xf6   :  { %v3858_v63 = vpop.permute.xlu1 %364  ;;  %961 = vperm.xlu1 %3213, %v3468_v3   ;;  %v3861_v53 = vpop.permute.xlu0 %367 }
  0xf7   :  { %5890 = vst [vmem:[#allocation46_spill] sm:$0xff] %v3858_v63  ;;  %5891 = vst [vmem:[#allocation47_spill] sm:$0xff] %v3861_v53  ;;  %737 = vperm.xlu0 %3246, %v3468_v3  }
  0xfa   :  { %v3864_v54 = vpop.permute.xlu1 %370  ;;  %3214 = vset.pattern.permute.xlu1 %v5834_v51  ;;  %v3867_v52 = vpop.permute.xlu0 %373 }
  0xfb   :  { %5892 = vst [vmem:[#allocation48_spill] sm:$0xff] %v3864_v54  ;;  %5893 = vst [vmem:[#allocation49_spill] sm:$0xff] %v3867_v52  ;;  %1179 = vperm.xlu1 %3214, %v3473_v4   ;;  %743 = vperm.xlu0 %3246, %v3480_v5  }
  0xff   :  { %1182 = vperm.xlu1 %3214, %v3456_v1   ;;  %v3872_v63 = vpop.permute.xlu1 %504  ;;  %749 = vperm.xlu0 %3246, %v3492_v7   ;;  %v3875_v53 = vpop.permute.xlu0 %507 }
 0x103   :  { %3215 = vset.pattern.permute.xlu1 %v5894_v50  ;;  %v3878_v54 = vpop.permute.xlu1 %510  ;;  %755 = vperm.xlu0 %3246, %v3504_v9   ;;  %v3881_v51 = vpop.permute.xlu0 %516 }
 0x104   :  { %1400 = vperm.xlu1 %3215, %v3461_v2  }
 0x107   :  { %v3884_v52 = vpop.permute.xlu1 %513  ;;  %761 = vperm.xlu0 %3246, %v3516_v11   ;;  %v3887_v49 = vpop.permute.xlu0 %522 }
 0x108   :  { %1406 = vperm.xlu1 %3215, %v3456_v1  }
 0x10b   :  { %v3890_v55 = vpop.permute.xlu1 %519  ;;  %767 = vperm.xlu0 %3246, %v3528_v13   ;;  %v3893_v48 = vpop.permute.xlu0 %528 }
 0x10c   :  { %5895 = vst [vmem:[#allocation50_spill] sm:$0xff] %v3893_v48  ;;  %1409 = vperm.xlu1 %3215, %v3468_v3  }
 0x10f   :  { %v3896_v47 = vpop.permute.xlu1 %525  ;;  %773 = vperm.xlu0 %3246, %v3540_v15   ;;  %v3899_v56 = vpop.permute.xlu0 %534 }
 0x110   :  { %5896 = vst [vmem:[#allocation51_spill] sm:$0xff] %v3896_v47  ;;  %5897 = vst [vmem:[#allocation52_spill] sm:$0xff] %v3899_v56  ;;  %3217 = vset.pattern.permute.xlu1 %v5898_v46  ;;  %v5903_v47 = vmov 4  }
 0x111   :  { %1627 = vperm.xlu1 %3217, %v3473_v4  }
 0x113   :  { %v3903_v45 = vpop.permute.xlu1 %531  ;;  %779 = vperm.xlu0 %3246, %v3552_v17   ;;  %v3906_v44 = vpop.permute.xlu0 %540 }
 0x114   :  { %5899 = vst [vmem:[#allocation53_spill] sm:$0xff] %v3903_v45  ;;  %5900 = vst [vmem:[#allocation54_spill] sm:$0xff] %v3906_v44 }
 0x115   :  { %1630 = vperm.xlu1 %3217, %v3456_v1  }
 0x117   :  { %v3909_v48 = vpop.permute.xlu1 %537  ;;  %785 = vperm.xlu0 %3246, %v3564_v19   ;;  %v3912_v43 = vpop.permute.xlu0 %546 }
 0x118   :  { %5901 = vst [vmem:[#allocation55_spill] sm:$0xff] %v3909_v48  ;;  %5902 = vst [vmem:[#allocation56_spill] sm:$0xff] %v3912_v43 }
 0x119   :  { %3218 = vset.pattern.permute.xlu1 %v5903_v47 }
 0x11a   :  { %964 = vperm.xlu1 %3218, %v3485_v6  }
 0x11b   :  { %v3916_v56 = vpop.permute.xlu1 %543  ;;  %791 = vperm.xlu0 %3246, %v3576_v21   ;;  %v3919_v45 = vpop.permute.xlu0 %552 }
 0x11c   :  { %5904 = vst [vmem:[#allocation57_spill] sm:$0xff] %v3916_v56  ;;  %5905 = vst [vmem:[#allocation58_spill] sm:$0xff] %v3919_v45  ;;  %v5910_v56 = vmov 5  }
 0x11e   :  { %970 = vperm.xlu1 %3218, %v3497_v8  }
 0x11f   :  { %v3922_v44 = vpop.permute.xlu1 %549  ;;  %794 = vperm.xlu0 %3246, %v3593_v24   ;;  %v3925_v1 = vpop.permute.xlu0 %558 }
 0x120   :  { %5906 = vst [vmem:[#allocation59_spill] sm:$0xff] %v3922_v44  ;;  %5907 = vst [vmem:[#allocation60_spill] sm:$0xff] %v3925_v1 }
 0x122   :  { %973 = vperm.xlu1 %3218, %v3492_v7  }
 0x123   :  { %v3928_v43 = vpop.permute.xlu1 %555  ;;  %800 = vperm.xlu0 %3246, %v3605_v26   ;;  %v3931_v48 = vpop.permute.xlu0 %564 }
 0x124   :  { %5908 = vst [vmem:[#allocation61_spill] sm:$0xff] %v3928_v43  ;;  %5909 = vst [vmem:[#allocation62_spill] sm:$0xff] %v3931_v48 }
 0x126   :  { %3219 = vset.pattern.permute.xlu1 %v5910_v56 }
 0x127   :  { %1191 = vperm.xlu1 %3219, %v3480_v5   ;;  %v3935_v45 = vpop.permute.xlu1 %561  ;;  %815 = vperm.xlu0 %3246, %v3624_v29   ;;  %v3938_v44 = vpop.permute.xlu0 %570 }
 0x128   :  { %5911 = vst [vmem:[#allocation63_spill] sm:$0xff] %v3935_v45  ;;  %5912 = vst [vmem:[#allocation64_spill] sm:$0xff] %v3938_v44 }
 0x12b   :  { %1194 = vperm.xlu1 %3219, %v3497_v8   ;;  %v3941_v24 = vpop.permute.xlu1 %567  ;;  %818 = vperm.xlu0 %3246, %v3641_v32   ;;  %v3944_v1 = vpop.permute.xlu0 %576 }
 0x12c   :  { %5913 = vst [vmem:[#allocation65_spill] sm:$0xff] %v3941_v24  ;;  %5914 = vst [vmem:[#allocation66_spill] sm:$0xff] %v3944_v1 }
 0x12f   :  { %3220 = vset.pattern.permute.xlu1 %v5894_v50  ;;  %v3947_v48 = vpop.permute.xlu1 %573  ;;  %3253 = vset.pattern.permute.xlu0 %v5903_v47  ;;  %v3950_v43 = vpop.permute.xlu0 %582 }
 0x130   :  { %5915 = vst [vmem:[#allocation67_spill] sm:$0xff] %v3947_v48  ;;  %5916 = vst [vmem:[#allocation68_spill] sm:$0xff] %v3950_v43  ;;  %1412 = vperm.xlu1 %3220, %v3485_v6   ;;  %955 = vperm.xlu0 %3253, %v3473_v4  }
 0x133   :  { %v3954_v44 = vpop.permute.xlu1 %579  ;;  %v3956_v45 = vpop.permute.xlu0 %588 }
 0x134   :  { %5917 = vst [vmem:[#allocation69_spill] sm:$0xff] %v3954_v44  ;;  %5918 = vst [vmem:[#allocation70_spill] sm:$0xff] %v3956_v45  ;;  %1418 = vperm.xlu1 %3220, %v3497_v8   ;;  %967 = vperm.xlu0 %3253, %v3480_v5  }
 0x137   :  { %v3960_v32 = vpop.permute.xlu1 %585  ;;  %v3962_v1 = vpop.permute.xlu0 %594 }
 0x138   :  { %5919 = vst [vmem:[#allocation71_spill] sm:$0xff] %v3960_v32  ;;  %5920 = vst [vmem:[#allocation72_spill] sm:$0xff] %v3962_v1  ;;  %1421 = vperm.xlu1 %3220, %v3492_v7   ;;  %979 = vperm.xlu0 %3253, %v3504_v9   ;;  %v3263_v1 = vld [vmem:[%s5817_s1 + $0x38] sm:$0xff]  }
 0x139   :  { %3069 = vmatprep.subr.bf16.mxu0 %v3263_v1 }
 0x13a   :  { %3070 = vmatpush3.bf16.msra.mxu0 %v3263_v1  ;;  %v3265_v1 = vld [vmem:[%s5817_s1 + $0x28] sm:$0xff]  }
 0x13b   :  { %v3966_v43 = vpop.permute.xlu1 %591 }
 0x13c   :  { %5921 = vst [vmem:[#allocation73_spill] sm:$0xff] %v3966_v43  ;;  %3222 = vset.pattern.permute.xlu1 %v5898_v46  ;;  %991 = vperm.xlu0 %3253, %v3528_v13   ;;  %v3970_v4 = vpop.permute.xlu0 %1403 }
 0x13d   :  { %1639 = vperm.xlu1 %3222, %v3480_v5  }
 0x13f   :  { %v3973_v45 = vpop.permute.xlu1 %597 }
 0x140   :  { %5922 = vst [vmem:[#allocation74_spill] sm:$0xff] %v3973_v45  ;;  %1000 = vperm.xlu0 %3253, %v3557_v18   ;;  %v3976_v32 = vpop.permute.xlu0 %1415  ;;  %v3264_v45 = vld [vmem:[%s5817_s1 + $0x30] sm:$0xff]  }
 0x141   :  { %1642 = vperm.xlu1 %3222, %v3497_v8   ;;  %3071 = vmatprep.subr.bf16.mxu0 %v3264_v45 }
 0x142   :  { %3072 = vmatpush3.bf16.msra.mxu0 %v3264_v45  ;;  %v3266_v45 = vld [vmem:[%s5817_s1 + $0x20] sm:$0xff]  }
 0x143   :  { %3073 = vmatprep.subr.bf16.mxu0 %v3265_v1 }
 0x144   :  { %v3982_v43 = vpop.permute.xlu1 %731  ;;  %1009 = vperm.xlu0 %3253, %v3564_v19  }
 0x145   :  { %3223 = vset.pattern.permute.xlu1 %v5903_v47  ;;  %v3986_v5 = vpop.permute.xlu0 %1624 }
 0x146   :  { %5923 = vst [vmem:[#allocation75_spill] sm:$0xff] %v3986_v5  ;;  %976 = vperm.xlu1 %3223, %v3509_v10   ;;  %3074 = vmatpush3.bf16.msra.mxu0 %v3265_v1  ;;  %v3267_v1 = vld [vmem:[%s5817_s1 + $0x18] sm:$0xff]  }
 0x147   :  { %3075 = vmatprep.subr.bf16.mxu0 %v3266_v45 }
 0x148   :  { %v3992_v8 = vpop.permute.xlu1 %734  ;;  %1015 = vperm.xlu0 %3253, %v3576_v21  }
 0x149   :  { %v3995_v44 = vpop.permute.xlu0 %1633 }
 0x14a   :  { %5924 = vst [vmem:[#allocation76_spill] sm:$0xff] %v3995_v44  ;;  %982 = vperm.xlu1 %3223, %v3521_v12   ;;  %3076 = vmatpush3.bf16.msra.mxu0 %v3266_v45  ;;  %v3268_v45 = vld [vmem:[%s5817_s1 + $0x10] sm:$0xff]  }
 0x14b   :  { %3077 = vmatprep.subr.bf16.mxu0 %v3267_v1 }
 0x14c   :  { %v4001_v48 = vpop.permute.xlu1 %740  ;;  %1024 = vperm.xlu0 %3253, %v3605_v26  }
 0x14d   :  { %v4004_v24 = vpop.permute.xlu0 %1636 }
 0x14e   :  { %5925 = vst [vmem:[#allocation77_spill] sm:$0xff] %v4004_v24  ;;  %985 = vperm.xlu1 %3223, %v3516_v11   ;;  %3078 = vmatpush3.bf16.msra.mxu0 %v3267_v1  ;;  %v3269_v1 = vld [vmem:[%s5817_s1 + $0x8] sm:$0xff]  }
 0x14f   :  { %3079 = vmatprep.subr.bf16.mxu0 %v3268_v45 }
 0x150   :  { %v4010_v44 = vpop.permute.xlu1 %746  ;;  %1033 = vperm.xlu0 %3253, %v3612_v27  }
 0x151   :  { %5926 = vst [vmem:[#allocation78_spill] sm:$0xff] %v4010_v44  ;;  %v4013_v5 = vpop.permute.xlu0 %1645 }
 0x152   :  { %5927 = vst [vmem:[#allocation79_spill] sm:$0xff] %v4013_v5  ;;  %3224 = vset.pattern.permute.xlu1 %v5910_v56  ;;  %3080 = vmatpush3.bf16.msra.mxu0 %v3268_v45 }
 0x153   :  { %1203 = vperm.xlu1 %3224, %v3504_v9   ;;  %3081 = vmatprep.subr.bf16.mxu0 %v3269_v1 }
 0x154   :  { %v4020_v24 = vpop.permute.xlu1 %752  ;;  %1039 = vperm.xlu0 %3253, %v3624_v29  }
 0x155   :  { %5928 = vst [vmem:[#allocation80_spill] sm:$0xff] %v4020_v24  ;;  %v4023_v44 = vpop.permute.xlu0 %1648 }
 0x156   :  { %5929 = vst [vmem:[#allocation81_spill] sm:$0xff] %v4023_v44  ;;  %3082 = vmatpush3.bf16.msra.mxu0 %v3269_v1 }
 0x157   :  { %1206 = vperm.xlu1 %3224, %v3521_v12  }
 0x158   :  { %v4029_v5 = vpop.permute.xlu1 %758  ;;  %3257 = vset.pattern.permute.xlu0 %v5910_v56 }
 0x159   :  { %5930 = vst [vmem:[#allocation82_spill] sm:$0xff] %v4029_v5  ;;  %1176 = vperm.xlu0 %3257, %v3461_v2   ;;  %v4033_v24 = vpop.permute.xlu0 %1657  ;;  %v3270_v2 = vld [vmem:[%s5817_s1] sm:$0xff]  }
 0x15a   :  { %5931 = vst [vmem:[#allocation83_spill] sm:$0xff] %v4033_v24  ;;  %3083 = vmatprep.subr.bf16.mxu0 %v3270_v2 }
 0x15b   :  { %3225 = vset.pattern.permute.xlu1 %v5894_v50  ;;  %3084 = vmatpush3.bf16.msra.mxu0 %v3270_v2 }
 0x15c   :  { %1424 = vperm.xlu1 %3225, %v3509_v10   ;;  %v4040_v44 = vpop.permute.xlu1 %764 }
 0x15d   :  { %5932 = vst [vmem:[#allocation84_spill] sm:$0xff] %v4040_v44  ;;  %1185 = vperm.xlu0 %3257, %v3468_v3   ;;  %v4043_v5 = vpop.permute.xlu0 %1660 }
 0x15e   :  { %5933 = vst [vmem:[#allocation85_spill] sm:$0xff] %v4043_v5 }
 0x160   :  { %1430 = vperm.xlu1 %3225, %v3521_v12   ;;  %v4049_v45 = vpop.permute.xlu1 %770 }
 0x161   :  { %5934 = vst [vmem:[#allocation86_spill] sm:$0xff] %v4049_v45  ;;  %1188 = vperm.xlu0 %3257, %v3485_v6   ;;  %v4052_v24 = vpop.permute.xlu0 %1678 }
 0x162   :  { %5935 = vst [vmem:[#allocation87_spill] sm:$0xff] %v4052_v24 }
 0x164   :  { %1433 = vperm.xlu1 %3225, %v3516_v11   ;;  %v4055_v1 = vpop.permute.xlu1 %776 }
 0x165   :  { %5936 = vst [vmem:[#allocation88_spill] sm:$0xff] %v4055_v1  ;;  %1197 = vperm.xlu0 %3257, %v3492_v7   ;;  %v4058_v3 = vpop.permute.xlu0 %1687 }
 0x166   :  { %5937 = vst [vmem:[#allocation89_spill] sm:$0xff] %v4058_v3 }
 0x168   :  { %3226 = vset.pattern.permute.xlu1 %v5898_v46 }
 0x169   :  { %1651 = vperm.xlu1 %3226, %v3504_v9   ;;  %v4062_v5 = vpop.permute.xlu1 %952  ;;  %1200 = vperm.xlu0 %3257, %v3509_v10   ;;  %v4065_v2 = vpop.permute.xlu0 %1690 }
 0x16a   :  { %5938 = vst [vmem:[#allocation90_spill] sm:$0xff] %v4065_v2 }
 0x16d   :  { %1654 = vperm.xlu1 %3226, %v3521_v12   ;;  %v4068_v6 = vpop.permute.xlu1 %958  ;;  %1209 = vperm.xlu0 %3257, %v3516_v11  }
 0x16e   :  { %v4071_v24 = vpop.permute.xlu0 %728 }
 0x171   :  { %3227 = vset.pattern.permute.xlu1 %v5903_v47  ;;  %v4074_v7 = vpop.permute.xlu1 %961  ;;  %1212 = vperm.xlu0 %3257, %v3533_v14  }
 0x172   :  { %5939 = vst [vmem:[#allocation91_spill] sm:$0xff] %v4074_v7  ;;  %988 = vperm.xlu1 %3227, %v3533_v14   ;;  %v4078_v3 = vpop.permute.xlu0 %737 }
 0x175   :  { %1221 = vperm.xlu0 %3257, %v3540_v15  }
 0x176   :  { %994 = vperm.xlu1 %3227, %v3545_v16   ;;  %v4082_v10 = vpop.permute.xlu1 %1179  ;;  %v4084_v12 = vpop.permute.xlu0 %743 }
 0x177   :  { %5940 = vst [vmem:[#allocation92_spill] sm:$0xff] %v4082_v10 }
 0x179   :  { %1227 = vperm.xlu0 %3257, %v3552_v17  }
 0x17a   :  { %997 = vperm.xlu1 %3227, %v3540_v15   ;;  %v4088_v11 = vpop.permute.xlu1 %1182  ;;  %v4090_v2 = vpop.permute.xlu0 %749 }
 0x17d   :  { %1236 = vperm.xlu0 %3257, %v3581_v22  }
 0x17e   :  { %3228 = vset.pattern.permute.xlu1 %v5910_v56  ;;  %v4094_v1 = vpop.permute.xlu0 %755 }
 0x17f   :  { %5941 = vst [vmem:[#allocation93_spill] sm:$0xff] %v4094_v1  ;;  %1215 = vperm.xlu1 %3228, %v3528_v13   ;;  %v4097_v45 = vpop.permute.xlu1 %1400 }
 0x181   :  { %1245 = vperm.xlu0 %3257, %v3588_v23  }
 0x182   :  { %v4100_v44 = vpop.permute.xlu0 %761 }
 0x183   :  { %5942 = vst [vmem:[#allocation94_spill] sm:$0xff] %v4100_v44  ;;  %1218 = vperm.xlu1 %3228, %v3545_v16   ;;  %v4103_v10 = vpop.permute.xlu1 %1406 }
 0x185   :  { %1251 = vperm.xlu0 %3257, %v3600_v25  }
 0x186   :  { %v4106_v7 = vpop.permute.xlu0 %767 }
 0x187   :  { %5943 = vst [vmem:[#allocation95_spill] sm:$0xff] %v4106_v7  ;;  %3229 = vset.pattern.permute.xlu1 %v5894_v50  ;;  %v4109_v22 = vpop.permute.xlu1 %1409 }
 0x188   :  { %1436 = vperm.xlu1 %3229, %v3533_v14  }
 0x189   :  { %1260 = vperm.xlu0 %3257, %v3629_v30  }
 0x18a   :  { %v4113_v1 = vpop.permute.xlu0 %773 }
 0x18b   :  { %5944 = vst [vmem:[#allocation96_spill] sm:$0xff] %v4113_v1 }
 0x18c   :  { %1442 = vperm.xlu1 %3229, %v3545_v16   ;;  %v4116_v23 = vpop.permute.xlu1 %1627 }
 0x18d   :  { %1269 = vperm.xlu0 %3257, %v3636_v31  }
 0x18e   :  { %v4119_v44 = vpop.permute.xlu0 %779 }
 0x18f   :  { %5945 = vst [vmem:[#allocation97_spill] sm:$0xff] %v4119_v44 }
 0x190   :  { %1445 = vperm.xlu1 %3229, %v3540_v15   ;;  %v4122_v25 = vpop.permute.xlu1 %1630 }
 0x191   :  { %5946 = vst [vmem:[#allocation98_spill] sm:$0xff] %v4122_v25  ;;  %3259 = vset.pattern.permute.xlu0 %v5894_v50 }
 0x192   :  { %1427 = vperm.xlu0 %3259, %v3504_v9   ;;  %v4126_v14 = vpop.permute.xlu0 %785 }
 0x193   :  { %5947 = vst [vmem:[#allocation99_spill] sm:$0xff] %v4126_v14 }
 0x194   :  { %3230 = vset.pattern.permute.xlu1 %v5898_v46 }
 0x195   :  { %1663 = vperm.xlu1 %3230, %v3528_v13   ;;  %v4130_v1 = vpop.permute.xlu1 %964 }
 0x196   :  { %1439 = vperm.xlu0 %3259, %v3528_v13   ;;  %v4133_v7 = vpop.permute.xlu0 %791 }
 0x197   :  { %5948 = vst [vmem:[#allocation100_spill] sm:$0xff] %v4133_v7 }
 0x199   :  { %3231 = vset.pattern.permute.xlu1 %v5888_v60  ;;  %v4136_v44 = vpop.permute.xlu1 %970 }
 0x19a   :  { %5949 = vst [vmem:[#allocation101_spill] sm:$0xff] %v4136_v44  ;;  %782 = vperm.xlu1 %3231, %v3569_v20   ;;  %v4139_v25 = vpop.permute.xlu0 %794  ;;  %1448 = vperm.xlu0 %3259, %v3557_v18  }
 0x19b   :  { %5950 = vst [vmem:[#allocation102_spill] sm:$0xff] %v4139_v25 }
 0x19d   :  { %v4142_v9 = vpop.permute.xlu1 %973 }
 0x19e   :  { %3232 = vset.pattern.permute.xlu1 %v5898_v46  ;;  %v4145_v14 = vpop.permute.xlu0 %800  ;;  %1457 = vperm.xlu0 %3259, %v3564_v19  }
 0x19f   :  { %5951 = vst [vmem:[#allocation103_spill] sm:$0xff] %v4145_v14  ;;  %1666 = vperm.xlu1 %3232, %v3545_v16  }
 0x1a2   :  { %v4149_v13 = vpop.permute.xlu1 %1191  ;;  %v4151_v7 = vpop.permute.xlu0 %815  ;;  %1463 = vperm.xlu0 %3259, %v3576_v21  }
 0x1a3   :  { %5952 = vst [vmem:[#allocation104_spill] sm:$0xff] %v4151_v7  ;;  %1669 = vperm.xlu1 %3232, %v3540_v15  }
 0x1a6   :  { %v4155_v25 = vpop.permute.xlu1 %1194  ;;  %v4157_v44 = vpop.permute.xlu0 %818  ;;  %1472 = vperm.xlu0 %3259, %v3605_v26  }
 0x1a7   :  { %5953 = vst [vmem:[#allocation105_spill] sm:$0xff] %v4157_v44  ;;  %3233 = vset.pattern.permute.xlu1 %v5903_v47  ;;  %v53_v44 = vlaneseq }
 0x1a8   :  { %1003 = vperm.xlu1 %3233, %v3552_v17  }
 0x1a9   :  { %v4181_v7 = vand.u32 127, %v53_v44 }
 0x1aa   :  { %1481 = vperm.xlu0 %3259, %v3612_v27  }
 0x1ab   :  { %v4163_v16 = vpop.permute.xlu1 %1412  ;;  %v4165_v14 = vpop.permute.xlu0 %955  ;;  %vm151_vm0 = vcmp.eq.s32.totalorder %v3677_v35, %v4181_v7  ;;  %vm152_vm1 = vcmp.eq.s32.totalorder %v3683_v37, %v4181_v7  ;;  %vm376_vm2 = vcmp.eq.s32.totalorder %v3771_v62, %v4181_v7  ;;  %vm375_vm3 = vcmp.eq.s32.totalorder %v3773_v61, %v4181_v7 }
 0x1ac   :  { %1006 = vperm.xlu1 %3233, %v3569_v20   ;;  %vm153_vm4 = vcmp.eq.s32.totalorder %v3675_v34, %v4181_v7  ;;  %vm154_vm5 = vcmp.eq.s32.totalorder %v3681_v36, %v4181_v7  ;;  %vm156_vm6 = vcmp.eq.s32.totalorder %v3687_v39, %v4181_v7  ;;  %vm377_vm7 = vcmp.eq.s32.totalorder %v3778_v0, %v4181_v7 }
 0x1ad   :  { %vm155_vm8 = vcmp.eq.s32.totalorder %v3689_v40, %v4181_v7  ;;  %vm158_vm9 = vcmp.eq.s32.totalorder %v3693_v41, %v4181_v7  ;;  %vm157_vm10 = vcmp.eq.s32.totalorder %v3695_v42, %v4181_v7  ;;  %vm378_vm11 = vcmp.eq.s32.totalorder %v3780_v33, %v4181_v7 }
 0x1ae   :  { %1487 = vperm.xlu0 %3259, %v3624_v29   ;;  %v3422_v29 = vmov 0.0   ;;  %vm379_vm12 = vcmp.eq.s32.totalorder %v3784_v38, %v4181_v7  ;;  %vm380_vm13 = vcmp.eq.s32.totalorder %v3786_v59, %v4181_v7  ;;  %vm381_vm14 = vcmp.eq.s32.totalorder %v3791_v57, %v4181_v7 }
 0x1af   :  { %v4169_v15 = vpop.permute.xlu1 %1418  ;;  %v4171_v21 = vpop.permute.xlu0 %967  ;;  %v2731_v35 = vsel %vm151_vm0, 1.0, %v3422_v29  ;;  %v2732_v37 = vsel %vm152_vm1, 1.0, %v3422_v29  ;;  %v2763_v34 = vsel %vm375_vm3, 1.0, %v3422_v29  ;;  %v2733_v36 = vsel %vm153_vm4, 1.0, %v3422_v29 }
 0x1b0   :  { %3234 = vset.pattern.permute.xlu1 %v5910_v56  ;;  %v2736_v39 = vsel %vm156_vm6, 1.0, %v3422_v29  ;;  %v2765_v40 = vsel %vm377_vm7, 1.0, %v3422_v29  ;;  %v2735_v42 = vsel %vm155_vm8, 1.0, %v3422_v29  ;;  %v2738_v44 = vsel %vm158_vm9, 1.0, %v3422_v29 }
 0x1b1   :  { %1224 = vperm.xlu1 %3234, %v3557_v18   ;;  %v2737_v62 = vsel %vm157_vm10, 1.0, %v3422_v29  ;;  %v471_v33 = vadd.f32 %v2763_v34, %v2731_v35  ;;  %vm382_vm15 = vcmp.eq.s32.totalorder %v3794_v58, %v4181_v7  ;;  %vm599_vm0 = vcmp.eq.s32.totalorder %v3872_v63, %v4181_v7 }
 0x1b2   :  { %3261 = vset.pattern.permute.xlu0 %v5898_v46  ;;  %v2767_v59 = vsel %vm379_vm12, 1.0, %v3422_v29  ;;  %v2768_v38 = vsel %vm380_vm13, 1.0, %v3422_v29  ;;  %vm600_vm1 = vcmp.eq.s32.totalorder %v3875_v53, %v4181_v7  ;;  %vm603_vm3 = vcmp.eq.s32.totalorder %v3881_v51, %v4181_v7 }
 0x1b3   :  { %v4176_v26 = vpop.permute.xlu1 %1421  ;;  %v4178_v27 = vpop.permute.xlu0 %979  ;;  %1702 = vperm.xlu0 %3261, %v3617_v28   ;;  %vm602_vm4 = vcmp.eq.s32.totalorder %v3884_v52, %v4181_v7  ;;  %v2770_v58 = vsel %vm382_vm15, 1.0, %v3422_v29  ;;  %v2795_v53 = vsel %vm599_vm0, 1.0, %v3422_v29  ;;  %vm604_vm6 = vcmp.eq.s32.totalorder %v3890_v55, %v4181_v7 }
 0x1b4   :  { %v475_v63 = vadd.f32 %v2767_v59, %v2735_v42  ;;  %v2796_v51 = vsel %vm600_vm1, 1.0, %v3422_v29  ;;  %vm824_vm8 = vcmp.eq.s32.totalorder %v3982_v43, %v4181_v7  ;;  %vm825_vm9 = vcmp.eq.s32.totalorder %v3992_v8, %v4181_v7  ;;  %v4302_v43 = vld [vmem:[%s5816_s0 + $0xa0] sm:$0xff] }
 0x1b5   :  { %1230 = vperm.xlu1 %3234, %v3569_v20   ;;  %vm1496_vm10 = vcmp.eq.s32.totalorder %v3970_v4, %v4181_v7  ;;  %vm827_vm12 = vcmp.eq.s32.totalorder %v4001_v48, %v4181_v7  ;;  %v5958_v4 = vld [vmem:[#allocation76_spill] sm:$0xff]  ;;  %vm826_vm0 = vcmp.eq.s32.totalorder %v4078_v3, %v4181_v7  ;;  %vm1048_vm1 = vcmp.eq.s32.totalorder %v4165_v14, %v4181_v7 }
 0x1b6   :  { %vm1722_vm15 = vcmp.eq.s32.totalorder %v5958_v4, %v4181_v7 }
 0x1b7   :  { %v4192_v18 = vpop.permute.xlu0 %991  ;;  %1708 = vperm.xlu0 %3261, %v3629_v30   ;;  %v2764_v30 = vsel %vm376_vm2, 1.0, %v3422_v29  ;;  %vm601_vm2 = vcmp.eq.s32.totalorder %v3878_v54, %v4181_v7 }
 0x1b8   :  { %v4203_v28 = vpop.permute.xlu1 %1639  ;;  %v472_v0 = vadd.f32 %v2764_v30, %v2732_v37  ;;  %v476_v37 = vadd.f32 %v2768_v38, %v2736_v39  ;;  %v2797_v52 = vsel %vm601_vm2, 1.0, %v3422_v29  ;;  %v2798_v30 = vsel %vm602_vm4, 1.0, %v3422_v29 }
 0x1b9   :  { %1233 = vperm.xlu1 %3234, %v3564_v19   ;;  %v2734_v19 = vsel %vm154_vm5, 1.0, %v3422_v29  ;;  %vm605_vm5 = vcmp.eq.s32.totalorder %v3887_v49, %v4181_v7  ;;  %v2799_v49 = vsel %vm603_vm3, 1.0, %v3422_v29  ;;  %v695_v39 = vadd.f32 %v2795_v53, %v471_v33 }
 0x1ba   :  { %v2801_v34 = vsel %vm605_vm5, 1.0, %v3422_v29  ;;  %v696_v42 = vadd.f32 %v2796_v51, %v472_v0  ;;  %v699_v38 = vadd.f32 %v2799_v49, %v475_v63  ;;  %v2828_v33 = vsel %vm824_vm8, 1.0, %v3422_v29  ;;  %v5959_v51 = vld [vmem:[#allocation77_spill] sm:$0xff] }
 0x1bb   :  { %v4228_v41 = vpop.permute.xlu0 %1000  ;;  %1717 = vperm.xlu0 %3261, %v3636_v31   ;;  %v473_v31 = vadd.f32 %v2765_v40, %v2733_v36  ;;  %v5956_v36 = vld [vmem:[#allocation51_spill] sm:$0xff]  ;;  %v478_v40 = vadd.f32 %v2770_v58, %v2738_v44  ;;  %vm1049_vm2 = vcmp.eq.s32.totalorder %v4068_v6, %v4181_v7  ;;  %vm1723_vm3 = vcmp.eq.s32.totalorder %v5959_v51, %v4181_v7 }
 0x1bc   :  { %5954 = vst [vmem:[#allocation106_spill] sm:$0xff] %v4228_v41  ;;  %v4237_v61 = vpop.permute.xlu1 %1642  ;;  %v2766_v41 = vsel %vm378_vm11, 1.0, %v3422_v29  ;;  %vm606_vm7 = vcmp.eq.s32.totalorder %v5956_v36, %v4181_v7  ;;  %vm1500_vm11 = vcmp.eq.s32.totalorder %v3976_v32, %v4181_v7  ;;  %v2829_v32 = vsel %vm825_vm9, 1.0, %v3422_v29 }
 0x1bd   :  { %3235 = vset.pattern.permute.xlu1 %v5894_v50  ;;  %v474_v57 = vadd.f32 %v2766_v41, %v2734_v19  ;;  %v2800_v41 = vsel %vm604_vm6, 1.0, %v3422_v29  ;;  %v697_v59 = vadd.f32 %v2797_v52, %v473_v31  ;;  %v5957_v31 = vld [vmem:[#allocation75_spill] sm:$0xff]  ;;  %v4328_v8 = vsel %vm1500_vm11, 1.0, %v3422_v29 }
 0x1be   :  { %1451 = vperm.xlu1 %3235, %v3552_v17   ;;  %v2769_v17 = vsel %vm381_vm14, 1.0, %v3422_v29  ;;  %v4291_v44 = vadd.f32 %v2800_v41, %v476_v37  ;;  %vm1719_vm13 = vcmp.eq.s32.totalorder %v5957_v31, %v4181_v7  ;;  %vm823_vm14 = vcmp.eq.s32.totalorder %v4071_v24, %v4181_v7 }
 0x1bf   :  { %v4255_v35 = vpop.permute.xlu0 %1009  ;;  %v477_v19 = vadd.f32 %v2769_v17, %v2737_v62  ;;  %v2802_v62 = vsel %vm606_vm7, 1.0, %v3422_v29  ;;  %v4325_v17 = vsel %vm1496_vm10, 1.0, %v3422_v29  ;;  %v2831_v24 = vsel %vm827_vm12, 1.0, %v3422_v29 }
 0x1c0   :  { %5955 = vst [vmem:[#allocation107_spill] sm:$0xff] %v4255_v35  ;;  %v698_v35 = vadd.f32 %v2798_v30, %v474_v57  ;;  %v702_v48 = vadd.f32 %v2802_v62, %v478_v40  ;;  %v920_v58 = vadd.f32 %v2828_v33, %v696_v42  ;;  %v4334_v53 = vsel %vm1719_vm13, 1.0, %v3422_v29  ;;  %v3400_v30 = vld [vmem:[%s5816_s0 + $0x80] sm:$0xff] }
 0x1c1   :  { %v4268_v54 = vpop.permute.xlu1 %976  ;;  %v4287_v36 = vadd.f32 %v2801_v34, %v477_v19  ;;  %v921_v3 = vadd.f32 %v2829_v32, %v697_v59  ;;  %v2827_v14 = vsel %vm823_vm14, 1.0, %v3422_v29  ;;  %v4341_v37 = vsel %vm1722_vm15, 1.0, %v3422_v29  ;;  %v5960_v19 = vld [vmem:[#allocation78_spill] sm:$0xff]  ;;  %v5961_v59 = vld [vmem:[#allocation91_spill] sm:$0xff] }
 0x1c2   :  { %1454 = vperm.xlu1 %3235, %v3569_v20   ;;  %v2830_v52 = vsel %vm826_vm0, 1.0, %v3422_v29  ;;  %v2860_v49 = vsel %vm1048_vm1, 1.0, %v3422_v29  ;;  %v4350_v34 = vadd.f32 %v2831_v24, %v699_v38  ;;  %vm829_vm4 = vcmp.eq.s32.totalorder %v5960_v19, %v4181_v7  ;;  %v5962_v38 = vld [vmem:[#allocation92_spill] sm:$0xff] }
 0x1c3   :  { %v4278_v55 = vpop.permute.xlu0 %1015  ;;  %vm1047_vm5 = vcmp.eq.s32.totalorder %v4062_v5, %v4181_v7  ;;  %v2861_v40 = vsel %vm1049_vm2, 1.0, %v3422_v29  ;;  %v919_v41 = vadd.f32 %v2827_v14, %v695_v39  ;;  %vm828_vm6 = vcmp.eq.s32.totalorder %v4084_v12, %v4181_v7 }
 0x1c4   :  { %vm1273_vm7 = vcmp.eq.s32.totalorder %v4088_v11, %v4181_v7  ;;  %vm830_vm8 = vcmp.eq.s32.totalorder %v4090_v2, %v4181_v7  ;;  %vm1050_vm9 = vcmp.eq.s32.totalorder %v5961_v59, %v4181_v7  ;;  %v922_v5 = vadd.f32 %v2830_v52, %v698_v35  ;;  %v3401_v35 = vld [vmem:[%s5816_s0 + $0x88] sm:$0xff] }
 0x1c5   :  { %v4285_v20 = vpop.permute.xlu1 %982  ;;  %vm1272_vm10 = vcmp.eq.s32.totalorder %v5962_v38, %v4181_v7  ;;  %v1144_v6 = vadd.f32 %v2860_v49, %v920_v58  ;;  %v4378_v12 = vsel %vm1723_vm3, 1.0, %v3422_v29  ;;  %v2833_v2 = vsel %vm829_vm4, 1.0, %v3422_v29 }
 0x1c6   :  { %3236 = vset.pattern.permute.xlu1 %v5888_v60  ;;  %v2859_v11 = vsel %vm1047_vm5, 1.0, %v3422_v29  ;;  %v1145_v62 = vadd.f32 %v2861_v40, %v921_v3  ;;  %v2832_v33 = vsel %vm828_vm6, 1.0, %v3422_v29  ;;  %v2893_v31 = vsel %vm1273_vm7, 1.0, %v3422_v29 }
 0x1c7   :  { %788 = vperm.xlu1 %3236, %v4302_v43   ;;  %v4305_v0 = vpop.permute.xlu0 %1024  ;;  %v2834_v32 = vsel %vm830_vm8, 1.0, %v3422_v29  ;;  %vm1495_vm11 = vcmp.eq.s32.totalorder %v4097_v45, %v4181_v7  ;;  %v2862_v4 = vsel %vm1050_vm9, 1.0, %v3422_v29  ;;  %v2892_v24 = vsel %vm1272_vm10, 1.0, %v3422_v29 }
 0x1c8   :  { %vm1497_vm12 = vcmp.eq.s32.totalorder %v4103_v10, %v4181_v7  ;;  %vm1052_vm13 = vcmp.eq.s32.totalorder %v4171_v21, %v4181_v7  ;;  %v925_v3 = vadd.f32 %v2833_v2, %v4287_v36  ;;  %v1368_v14 = vadd.f32 %v2892_v24, %v1144_v6  ;;  %v4410_v36 = vld [vmem:[%s5816_s0 + $0xb8] sm:$0xff]  ;;  %v5965_v2 = vld [vmem:[#allocation79_spill] sm:$0xff] }
 0x1c9   :  { %v4322_v57 = vpop.permute.xlu1 %985  ;;  %v1143_v51 = vadd.f32 %v2859_v11, %v919_v41  ;;  %v1146_v52 = vadd.f32 %v2862_v4, %v922_v5  ;;  %v924_v49 = vadd.f32 %v2832_v33, %v4291_v44  ;;  %v1369_v45 = vadd.f32 %v2893_v31, %v1145_v62  ;;  %v5963_v44 = vld [vmem:[#allocation98_spill] sm:$0xff] }
 0x1ca   :  { %v2923_v19 = vsel %vm1495_vm11, 1.0, %v3422_v29  ;;  %v2925_v10 = vsel %vm1497_vm12, 1.0, %v3422_v29  ;;  %vm1498_vm14 = vcmp.eq.s32.totalorder %v4109_v22, %v4181_v7  ;;  %v2864_v21 = vsel %vm1052_vm13, 1.0, %v3422_v29 }
 0x1cb   :  { %3237 = vset.pattern.permute.xlu1 %v5898_v46  ;;  %v4338_v63 = vpop.permute.xlu0 %1033  ;;  %vm1720_vm0 = vcmp.eq.s32.totalorder %v4116_v23, %v4181_v7  ;;  %vm1721_vm1 = vcmp.eq.s32.totalorder %v5963_v44, %v4181_v7  ;;  %vm1051_vm2 = vcmp.eq.s32.totalorder %v4130_v1, %v4181_v7  ;;  %vm1054_vm4 = vcmp.eq.s32.totalorder %v4142_v9, %v4181_v7 }
 0x1cc   :  { %1672 = vperm.xlu1 %3237, %v3400_v30   ;;  %v926_v30 = vadd.f32 %v2834_v32, %v702_v48  ;;  %v5964_v48 = vld [vmem:[#allocation101_spill] sm:$0xff]  ;;  %v1592_v5 = vadd.f32 %v4325_v17, %v1368_v14  ;;  %v1593_v23 = vadd.f32 %v2925_v10, %v1369_v45  ;;  %v2926_v38 = vsel %vm1498_vm14, 1.0, %v3422_v29 }
 0x1cd   :  { %vm1053_vm3 = vcmp.eq.s32.totalorder %v5964_v48, %v4181_v7  ;;  %vm1276_vm5 = vcmp.eq.s32.totalorder %v4149_v13, %v4181_v7  ;;  %v1148_v1 = vadd.f32 %v2864_v21, %v924_v49  ;;  %vm1726_vm6 = vcmp.eq.s32.totalorder %v5965_v2, %v4181_v7  ;;  %v3403_v32 = vld [vmem:[%s5816_s0 + $0x98] sm:$0xff] }
 0x1ce   :  { %v4366_v42 = vpop.permute.xlu1 %1203  ;;  %v2956_v11 = vsel %vm1720_vm0, 1.0, %v3422_v29  ;;  %v2863_v62 = vsel %vm1051_vm2, 1.0, %v3422_v29  ;;  %v2865_v13 = vsel %vm1053_vm3, 1.0, %v3422_v29  ;;  %v2866_v33 = vsel %vm1054_vm4, 1.0, %v3422_v29 }
 0x1cf   :  { %v4372_v39 = vpop.permute.xlu0 %1039  ;;  %v2896_v4 = vsel %vm1276_vm5, 1.0, %v3422_v29  ;;  %v1816_v49 = vadd.f32 %v2956_v11, %v1592_v5  ;;  %v1147_v45 = vadd.f32 %v2863_v62, %v4350_v34  ;;  %vm1277_vm8 = vcmp.eq.s32.totalorder %v4155_v25, %v4181_v7 }
 0x1d0   :  { %1675 = vperm.xlu1 %3237, %v3401_v35   ;;  %v2957_v35 = vsel %vm1721_vm1, 1.0, %v3422_v29  ;;  %vm1499_vm9 = vcmp.eq.s32.totalorder %v4163_v16, %v4181_v7  ;;  %v1372_v9 = vadd.f32 %v2896_v4, %v1148_v1  ;;  %vm1724_vm10 = vcmp.eq.s32.totalorder %v4203_v28, %v4181_v7  ;;  %v4495_v28 = vld [vmem:[%s5816_s0 + $0xb0] sm:$0xff] }
 0x1d1   :  { %v1817_v10 = vadd.f32 %v2957_v35, %v1593_v23  ;;  %v1150_v21 = vadd.f32 %v2866_v33, %v926_v30  ;;  %v2897_v25 = vsel %vm1277_vm8, 1.0, %v3422_v29  ;;  %vm1501_vm12 = vcmp.eq.s32.totalorder %v4169_v15, %v4181_v7 }
 0x1d2   :  { %v4396_v58 = vpop.permute.xlu1 %1206  ;;  %vm1502_vm13 = vcmp.eq.s32.totalorder %v4176_v26, %v4181_v7  ;;  %v1596_v30 = vadd.f32 %v4328_v8, %v1372_v9  ;;  %vm1725_vm14 = vcmp.eq.s32.totalorder %v4237_v61, %v4181_v7  ;;  %v2962_v15 = vsel %vm1726_vm6, 1.0, %v3422_v29  ;;  %v5967_v9 = vld [vmem:[#allocation3_spill] sm:$0xff] }
 0x1d3   :  { %v2930_v11 = vsel %vm1502_vm13, 1.0, %v3422_v29  ;;  %v2961_v62 = vsel %vm1725_vm14, 1.0, %v3422_v29  ;;  %vm159_vm1 = vcmp.eq.s32.totalorder %v5967_v9, %v4181_v7  ;;  %v5982_v9 = vld [vmem:[#allocation50_spill] sm:$0xff] }
 0x1d4   :  { %3238 = vset.pattern.permute.xlu1 %v5888_v60  ;;  %v1177_v40 = vpop.permute.xlu0 %1176 }
 0x1d5   :  { %vm1271_vm15 = vcmp.eq.s32.totalorder %v1177_v40, %v4181_v7  ;;  %797 = vperm.xlu1 %3238, %v4410_v36  }
 0x1d6   :  { %v2891_v22 = vsel %vm1271_vm15, 1.0, %v3422_v29 }
 0x1d7   :  { %v1367_v41 = vadd.f32 %v2891_v22, %v1143_v51  ;;  %v4424_v59 = vpop.permute.xlu1 %1424 }
 0x1d8   :  { %v1186_v6 = vpop.permute.xlu0 %1185 }
 0x1d9   :  { %vm1274_vm7 = vcmp.eq.s32.totalorder %v1186_v6, %v4181_v7  ;;  %3239 = vset.pattern.permute.xlu1 %v5898_v46  ;;  %v1591_v17 = vadd.f32 %v2923_v19, %v1367_v41  ;;  %v2960_v41 = vsel %vm1724_vm10, 1.0, %v3422_v29 }
 0x1da   :  { %v2894_v31 = vsel %vm1274_vm7, 1.0, %v3422_v29  ;;  %1681 = vperm.xlu1 %3239, %v3403_v32   ;;  %v1820_v1 = vadd.f32 %v2960_v41, %v1596_v30  ;;  %v5976_v30 = vld [vmem:[#allocation28_spill] sm:$0xff] }
 0x1db   :  { %v1370_v24 = vadd.f32 %v2894_v31, %v1146_v52  ;;  %v4453_v14 = vpop.permute.xlu1 %1430  ;;  %v1815_v51 = vadd.f32 %v4334_v53, %v1591_v17  ;;  %v1149_v53 = vadd.f32 %v2865_v13, %v925_v3  ;;  %v2927_v3 = vsel %vm1499_vm9, 1.0, %v3422_v29 }
 0x1dc   :  { %v1189_v19 = vpop.permute.xlu0 %1188  ;;  %vm385_vm10 = vcmp.eq.s32.totalorder %v5976_v30, %v4181_v7 }
 0x1dd   :  { %v1594_v40 = vadd.f32 %v2926_v38, %v1370_v24  ;;  %vm1275_vm11 = vcmp.eq.s32.totalorder %v1189_v19, %v4181_v7  ;;  %v1847_v52 = vpack.c.bf16 %v1816_v49, %v1815_v51  ;;  %v1373_v16 = vadd.f32 %v2897_v25, %v1149_v53  ;;  %v3405_v24 = vld [vmem:[%s5816_s0 + $0xa8] sm:$0xff]  ;;  %v5966_v49 = vld [vmem:[#allocation2_spill] sm:$0xff]  ;;  %v5968_v19 = vld [vmem:[#allocation4_spill] sm:$0xff] }
 0x1de   :  { %v2895_v34 = vsel %vm1275_vm11, 1.0, %v3422_v29  ;;  %3240 = vset.pattern.permute.xlu1 %v5903_v47  ;;  %v2929_v38 = vsel %vm1501_vm12, 1.0, %v3422_v29  ;;  %vm160_vm0 = vcmp.eq.s32.totalorder %v5966_v49, %v4181_v7  ;;  %vm162_vm2 = vcmp.eq.s32.totalorder %v5968_v19, %v4181_v7  ;;  %v5971_v53 = vld [vmem:[#allocation6_spill] sm:$0xff]  ;;  %v5983_v19 = vld [vmem:[#allocation52_spill] sm:$0xff] }
 0x1df   :  { %v1371_v44 = vadd.f32 %v2895_v34, %v1147_v45  ;;  %1012 = vperm.xlu1 %3240, %v4302_v43   ;;  %v4470_v22 = vpop.permute.xlu1 %1433  ;;  %3085 = vmatprep.mubr.bf16.mxu0 %v1847_v52  ;;  %v1818_v48 = vadd.f32 %v4341_v37, %v1594_v40  ;;  %v1597_v13 = vadd.f32 %v2929_v38, %v1373_v16  ;;  %v5969_v40 = vld [vmem:[#allocation5_spill] sm:$0xff]  ;;  %v5970_v52 = vld [vmem:[#allocation26_spill] sm:$0xff]  ;;  %v5973_v34 = vld [vmem:[#allocation27_spill] sm:$0xff] }
 0x1e0   :  { %v1198_v5 = vpop.permute.xlu0 %1197  ;;  %vm161_vm3 = vcmp.eq.s32.totalorder %v5969_v40, %v4181_v7  ;;  %vm383_vm4 = vcmp.eq.s32.totalorder %v5970_v52, %v4181_v7  ;;  %vm164_vm5 = vcmp.eq.s32.totalorder %v5971_v53, %v4181_v7  ;;  %vm384_vm7 = vcmp.eq.s32.totalorder %v5973_v34, %v4181_v7  ;;  %v5977_v16 = vld [vmem:[#allocation29_spill] sm:$0xff] }
 0x1e1   :  { %v1595_v37 = vadd.f32 %v2927_v3, %v1371_v44  ;;  %vm1278_vm15 = vcmp.eq.s32.totalorder %v1198_v5, %v4181_v7  ;;  %v1848_v23 = vpack.c.bf16 %v1818_v48, %v1817_v10  ;;  %v2740_v10 = vsel %vm160_vm0, 1.0, %v3422_v29  ;;  %v5974_v48 = vld [vmem:[#allocation8_spill] sm:$0xff]  ;;  %v5975_v3 = vld [vmem:[#allocation9_spill] sm:$0xff] }
 0x1e2   :  { %v2898_v8 = vsel %vm1278_vm15, 1.0, %v3422_v29  ;;  %v2739_v44 = vsel %vm159_vm1, 1.0, %v3422_v29  ;;  %vm166_vm8 = vcmp.eq.s32.totalorder %v5974_v48, %v4181_v7  ;;  %vm165_vm9 = vcmp.eq.s32.totalorder %v5975_v3, %v4181_v7  ;;  %v5984_v53 = vld [vmem:[#allocation53_spill] sm:$0xff]  ;;  %v5986_v48 = vld [vmem:[#allocation55_spill] sm:$0xff] }
 0x1e3   :  { %v1374_v6 = vadd.f32 %v2898_v8, %v1150_v21  ;;  %1018 = vperm.xlu1 %3240, %v4495_v28   ;;  %3086 = vmatmul.mubr.bf16.vlgmr.msra.gmra.mxu0 %v1848_v23  ;;  %v1819_v61 = vadd.f32 %v4378_v12, %v1595_v37  ;;  %v1821_v12 = vadd.f32 %v2961_v62, %v1597_v13  ;;  %v5972_v21 = vld [vmem:[#allocation7_spill] sm:$0xff]  ;;  %v2742_v5 = vsel %vm162_vm2, 1.0, %v3422_v29 }
 0x1e4   :  { %v4508_v17 = vpop.permute.xlu1 %1651  ;;  %v4510_v35 = vpop.permute.xlu0 %1200  ;;  %vm163_vm6 = vcmp.eq.s32.totalorder %v5972_v21, %v4181_v7  ;;  %v2741_v37 = vsel %vm161_vm3, 1.0, %v3422_v29  ;;  %v2771_v23 = vsel %vm383_vm4, 1.0, %v3422_v29  ;;  %vm386_vm11 = vcmp.eq.s32.totalorder %v5977_v16, %v4181_v7  ;;  %v5979_v62 = vld [vmem:[#allocation31_spill] sm:$0xff]  ;;  %v5985_v21 = vld [vmem:[#allocation54_spill] sm:$0xff]  ;;  %v5987_v16 = vld [vmem:[#allocation57_spill] sm:$0xff] }
 0x1e5   :  { %v1598_v33 = vadd.f32 %v2930_v11, %v1374_v6  ;;  %v1849_v31 = vpack.c.bf16 %v1820_v1, %v1819_v61  ;;  %v2744_v38 = vsel %vm164_vm5, 1.0, %v3422_v29  ;;  %v2743_v8 = vsel %vm163_vm6, 1.0, %v3422_v29  ;;  %v5978_v6 = vld [vmem:[#allocation30_spill] sm:$0xff] }
 0x1e6   :  { %v2772_v1 = vsel %vm384_vm7, 1.0, %v3422_v29  ;;  %vm387_vm12 = vcmp.eq.s32.totalorder %v5978_v6, %v4181_v7  ;;  %v2746_v61 = vsel %vm166_vm8, 1.0, %v3422_v29  ;;  %v2773_v11 = vsel %vm385_vm10, 1.0, %v3422_v29 }
 0x1e7   :  { %1021 = vperm.xlu1 %3240, %v4410_v36   ;;  %3089 = vmatprep.mubr.bf16.mxu0 %v1849_v31  ;;  %v1822_v2 = vadd.f32 %v2962_v15, %v1598_v33  ;;  %v2745_v15 = vsel %vm165_vm9, 1.0, %v3422_v29  ;;  %vm388_vm13 = vcmp.eq.s32.totalorder %v5979_v62, %v4181_v7  ;;  %v479_v33 = vadd.f32 %v2771_v23, %v2739_v44 }
 0x1e8   :  { %v4513_v32 = vpop.permute.xlu1 %1654  ;;  %v4515_v4 = vpop.permute.xlu0 %1209  ;;  %v2774_v31 = vsel %vm386_vm11, 1.0, %v3422_v29  ;;  %v2775_v49 = vsel %vm387_vm12, 1.0, %v3422_v29  ;;  %vm607_vm0 = vcmp.eq.s32.totalorder %v5982_v9, %v4181_v7  ;;  %vm609_vm1 = vcmp.eq.s32.totalorder %v5983_v19, %v4181_v7  ;;  %v5990_v9 = vld [vmem:[#allocation82_spill] sm:$0xff] }
 0x1e9   :  { %v1850_v26 = vpack.c.bf16 %v1822_v2, %v1821_v12  ;;  %v5980_v12 = vld [vmem:[#allocation32_spill] sm:$0xff]  ;;  %v5981_v2 = vld [vmem:[#allocation33_spill] sm:$0xff]  ;;  %v481_v40 = vadd.f32 %v2773_v11, %v2741_v37  ;;  %v2776_v52 = vsel %vm388_vm13, 1.0, %v3422_v29  ;;  %vm608_vm2 = vcmp.eq.s32.totalorder %v5984_v53, %v4181_v7 }
 0x1ea   :  { %vm389_vm14 = vcmp.eq.s32.totalorder %v5980_v12, %v4181_v7  ;;  %vm390_vm15 = vcmp.eq.s32.totalorder %v5981_v2, %v4181_v7  ;;  %vm611_vm3 = vcmp.eq.s32.totalorder %v5985_v21, %v4181_v7  ;;  %v482_v34 = vadd.f32 %v2774_v31, %v2742_v5  ;;  %v5988_v11 = vld [vmem:[#allocation80_spill] sm:$0xff] }
 0x1eb   :  { %3241 = vset.pattern.permute.xlu1 %v5910_v56  ;;  %3090 = vmatmul.mubr.bf16.gmra.mxu0 %v1850_v26  ;;  %v2778_v44 = vsel %vm390_vm15, 1.0, %v3422_v29  ;;  %vm610_vm4 = vcmp.eq.s32.totalorder %v5986_v48, %v4181_v7  ;;  %v483_v30 = vadd.f32 %v2775_v49, %v2743_v8  ;;  %v2803_v37 = vsel %vm607_vm0, 1.0, %v3422_v29  ;;  %v5989_v2 = vld [vmem:[#allocation56_spill] sm:$0xff] }
 0x1ec   :  { %1239 = vperm.xlu1 %3241, %v3405_v24   ;;  %v4521_v51 = vpop.permute.xlu0 %1212  ;;  %v480_v24 = vadd.f32 %v2772_v1, %v2740_v10  ;;  %v2777_v10 = vsel %vm389_vm14, 1.0, %v3422_v29  ;;  %v2805_v23 = vsel %vm609_vm1, 1.0, %v3422_v29  ;;  %vm612_vm5 = vcmp.eq.s32.totalorder %v5987_v16, %v4181_v7  ;;  %v5996_v16 = vld [vmem:[#allocation83_spill] sm:$0xff] }
 0x1ed   :  { %v4525_v45 = vpop.permute.xlu1 %988  ;;  %v484_v5 = vadd.f32 %v2776_v52, %v2744_v38  ;;  %v2804_v1 = vsel %vm608_vm2, 1.0, %v3422_v29  ;;  %v2807_v6 = vsel %vm611_vm3, 1.0, %v3422_v29  ;;  %vm831_vm6 = vcmp.eq.s32.totalorder %v5988_v11, %v4181_v7 }
 0x1ee   :  { %v4607_v8 = vadd.f32 %v2777_v10, %v2745_v15  ;;  %v4609_v31 = vadd.f32 %v2778_v44, %v2746_v61  ;;  %v2806_v12 = vsel %vm610_vm4, 1.0, %v3422_v29  ;;  %vm613_vm7 = vcmp.eq.s32.totalorder %v5989_v2, %v4181_v7  ;;  %v5991_v15 = vld [vmem:[#allocation59_spill] sm:$0xff]  ;;  %v5993_v10 = vld [vmem:[#allocation93_spill] sm:$0xff] }
 0x1ef   :  { %v705_v38 = vadd.f32 %v2805_v23, %v481_v40  ;;  %v2808_v49 = vsel %vm612_vm5, 1.0, %v3422_v29  ;;  %vm833_vm8 = vcmp.eq.s32.totalorder %v5990_v9, %v4181_v7  ;;  %v704_v52 = vadd.f32 %v2804_v1, %v480_v24  ;;  %v5992_v40 = vld [vmem:[#allocation81_spill] sm:$0xff]  ;;  %v5997_v2 = vld [vmem:[#allocation95_spill] sm:$0xff] }
 0x1f0   :  { %1242 = vperm.xlu1 %3241, %v4495_v28   ;;  %v4543_v25 = vpop.permute.xlu0 %1221  ;;  %v707_v53 = vadd.f32 %v2807_v6, %v483_v30  ;;  %vm614_vm9 = vcmp.eq.s32.totalorder %v5991_v15, %v4181_v7  ;;  %v2835_v61 = vsel %vm831_vm6, 1.0, %v3422_v29  ;;  %v706_v21 = vadd.f32 %v2806_v12, %v482_v34  ;;  %v5994_v30 = vld [vmem:[#allocation84_spill] sm:$0xff] }
 0x1f1   :  { %v4552_v41 = vpop.permute.xlu1 %994  ;;  %vm1727_vm10 = vcmp.eq.s32.totalorder %v5992_v40, %v4181_v7  ;;  %vm832_vm11 = vcmp.eq.s32.totalorder %v5993_v10, %v4181_v7  ;;  %v708_v24 = vadd.f32 %v2808_v49, %v484_v5  ;;  %v2837_v48 = vsel %vm833_vm8, 1.0, %v3422_v29 }
 0x1f2   :  { %vm835_vm12 = vcmp.eq.s32.totalorder %v5994_v30, %v4181_v7  ;;  %v4638_v34 = vsel %vm614_vm9, 1.0, %v3422_v29  ;;  %vm1730_vm14 = vcmp.eq.s32.totalorder %v5996_v16, %v4181_v7  ;;  %vm1056_vm15 = vcmp.eq.s32.totalorder %v4178_v27, %v4181_v7 }
 0x1f3   :  { %v4647_v5 = vsel %vm1727_vm10, 1.0, %v3422_v29  ;;  %v2836_v6 = vsel %vm832_vm11, 1.0, %v3422_v29  ;;  %vm1055_vm0 = vcmp.eq.s32.totalorder %v4268_v54, %v4181_v7  ;;  %vm1058_vm1 = vcmp.eq.s32.totalorder %v4322_v57, %v4181_v7 }
 0x1f4   :  { %3242 = vset.pattern.permute.xlu1 %v5894_v50  ;;  %v4570_v13 = vpop.permute.xlu0 %1227  ;;  %v929_v11 = vadd.f32 %v2837_v48, %v705_v38  ;;  %v2839_v12 = vsel %vm835_vm12, 1.0, %v3422_v29  ;;  %vm836_vm2 = vcmp.eq.s32.totalorder %v5997_v2, %v4181_v7  ;;  %v4666_v54 = vsel %vm1730_vm14, 1.0, %v3422_v29 }
 0x1f5   :  { %1460 = vperm.xlu1 %3242, %v4302_v43   ;;  %v4578_v26 = vpop.permute.xlu1 %997  ;;  %v2868_v49 = vsel %vm1056_vm15, 1.0, %v3422_v29  ;;  %vm1279_vm3 = vcmp.eq.s32.totalorder %v4510_v35, %v4181_v7  ;;  %vm1282_vm4 = vcmp.eq.s32.totalorder %v4515_v4, %v4181_v7  ;;  %v928_v9 = vadd.f32 %v2836_v6, %v704_v52 }
 0x1f6   :  { %v2867_v15 = vsel %vm1055_vm0, 1.0, %v3422_v29  ;;  %vm1057_vm5 = vcmp.eq.s32.totalorder %v4285_v20, %v4181_v7  ;;  %v931_v10 = vadd.f32 %v2839_v12, %v707_v53  ;;  %v2840_v48 = vsel %vm836_vm2, 1.0, %v3422_v29 }
 0x1f7   :  { %vm1280_vm6 = vcmp.eq.s32.totalorder %v4366_v42, %v4181_v7  ;;  %v1152_v4 = vadd.f32 %v2868_v49, %v928_v9  ;;  %v2899_v52 = vsel %vm1279_vm3, 1.0, %v3422_v29  ;;  %v2902_v30 = vsel %vm1282_vm4, 1.0, %v3422_v29 }
 0x1f8   :  { %v4594_v3 = vpop.permute.xlu0 %1236  ;;  %vm1060_vm8 = vcmp.eq.s32.totalorder %v4192_v18, %v4181_v7  ;;  %v2869_v57 = vsel %vm1057_vm5, 1.0, %v3422_v29  ;;  %vm1281_vm9 = vcmp.eq.s32.totalorder %v4396_v58, %v4181_v7  ;;  %vm1503_vm10 = vcmp.eq.s32.totalorder %v4424_v59, %v4181_v7  ;;  %v5999_v59 = vld [vmem:[#allocation86_spill] sm:$0xff] }
 0x1f9   :  { %1466 = vperm.xlu1 %3242, %v4495_v28   ;;  %v703_v28 = vadd.f32 %v2803_v37, %v479_v33  ;;  %v4624_v33 = vsel %vm613_vm7, 1.0, %v3422_v29  ;;  %v5995_v37 = vld [vmem:[#allocation94_spill] sm:$0xff]  ;;  %vm1059_vm7 = vcmp.eq.s32.totalorder %v4525_v45, %v4181_v7  ;;  %vm1505_vm11 = vcmp.eq.s32.totalorder %v4453_v14, %v4181_v7 }
 0x1fa   :  { %v4605_v62 = vpop.permute.xlu1 %1215  ;;  %vm834_vm13 = vcmp.eq.s32.totalorder %v5995_v37, %v4181_v7  ;;  %v2871_v58 = vsel %vm1059_vm7, 1.0, %v3422_v29  ;;  %vm837_vm14 = vcmp.eq.s32.totalorder %v5999_v59, %v4181_v7  ;;  %v932_v6 = vadd.f32 %v2840_v48, %v708_v24 }
 0x1fb   :  { %v927_v23 = vadd.f32 %v2835_v61, %v703_v28  ;;  %v2838_v27 = vsel %vm834_vm13, 1.0, %v3422_v29  ;;  %v4662_v28 = vld [vmem:[%s5816_s0 + $0xc8] sm:$0xff]  ;;  %v2870_v61 = vsel %vm1058_vm1, 1.0, %v3422_v29  ;;  %vm1506_vm13 = vcmp.eq.s32.totalorder %v4470_v22, %v4181_v7 }
 0x1fc   :  { %v4617_v19 = vpop.permute.xlu0 %1245  ;;  %v930_v35 = vadd.f32 %v2838_v27, %v706_v21  ;;  %v2900_v21 = vsel %vm1280_vm6, 1.0, %v3422_v29  ;;  %v2872_v12 = vsel %vm1060_vm8, 1.0, %v3422_v29  ;;  %v1153_v27 = vadd.f32 %v2869_v57, %v929_v11 }
 0x1fd   :  { %1469 = vperm.xlu1 %3242, %v4410_v36   ;;  %v1151_v20 = vadd.f32 %v2867_v15, %v927_v23  ;;  %v5998_v23 = vld [vmem:[#allocation85_spill] sm:$0xff]  ;;  %vm1283_vm15 = vcmp.eq.s32.totalorder %v4521_v51, %v4181_v7  ;;  %v1376_v2 = vadd.f32 %v2900_v21, %v1152_v4  ;;  %v2901_v49 = vsel %vm1281_vm9, 1.0, %v3422_v29  ;;  %v4743_v15 = vld [vmem:[%s5816_s0 + $0xd0] sm:$0xff] }
 0x1fe   :  { %v4630_v44 = vpop.permute.xlu1 %1218  ;;  %v1154_v53 = vadd.f32 %v2870_v61, %v930_v35  ;;  %vm1731_vm12 = vcmp.eq.s32.totalorder %v5998_v23, %v4181_v7  ;;  %v2931_v9 = vsel %vm1503_vm10, 1.0, %v3422_v29  ;;  %vm1284_vm0 = vcmp.eq.s32.totalorder %v4605_v62, %v4181_v7  ;;  %v2142_v35 = vld [vmem:[%s5818_s3 + $0x78] sm:$0xff]  ;;  %v2141_v51 = vld [vmem:[%s5818_s3 + $0x70] sm:$0xff] }
 0x1ff   :  { %v2933_v18 = vsel %vm1505_vm11, 1.0, %v3422_v29  ;;  %v2934_v24 = vsel %vm1506_vm13, 1.0, %v3422_v29  ;;  %v1155_v11 = vadd.f32 %v2871_v58, %v931_v10  ;;  %vm1729_vm2 = vcmp.eq.s32.totalorder %v4513_v32, %v4181_v7  ;;  %3117 = vmatprep.subr.mxu1 %v2142_v35 }
 0x200   :  { %v4644_v1 = vpop.permute.xlu0 %1251  ;;  %v1378_v16 = vadd.f32 %v2902_v30, %v1154_v53  ;;  %v2903_v22 = vsel %vm1283_vm15, 1.0, %v3422_v29  ;;  %v1377_v48 = vadd.f32 %v2901_v49, %v1153_v27  ;;  %vm1728_vm3 = vcmp.eq.s32.totalorder %v4508_v17, %v4181_v7  ;;  %3118 = vmatpush3.msra.mxu1 %v2142_v35 }
 0x201   :  { %3243 = vset.pattern.permute.xlu1 %v5888_v60  ;;  %v2904_v4 = vsel %vm1284_vm0, 1.0, %v3422_v29  ;;  %v1156_v30 = vadd.f32 %v2872_v12, %v932_v6  ;;  %v2965_v53 = vsel %vm1729_vm2, 1.0, %v3422_v29  ;;  %v1379_v21 = vadd.f32 %v2903_v22, %v1155_v11  ;;  %3119 = vmatprep.subr.mxu1 %v2141_v51 }
 0x202   :  { %803 = vperm.xlu1 %3243, %v4662_v28   ;;  %v1602_v14 = vadd.f32 %v2934_v24, %v1378_v16  ;;  %v1601_v62 = vadd.f32 %v2933_v18, %v1377_v48  ;;  %v4779_v16 = vld [vmem:[%s5816_s0 + $0xd8] sm:$0xff]  ;;  %v2964_v58 = vsel %vm1728_vm3, 1.0, %v3422_v29  ;;  %3120 = vmatpush3.msra.mxu1 %v2141_v51  ;;  %v710_v17 = vadd.f32 %v4638_v34, %v4609_v31 }
 0x203   :  { %v4673_v38 = vpop.permute.xlu1 %1436  ;;  %v1380_v6 = vadd.f32 %v2904_v4, %v1156_v30  ;;  %vm1062_vm8 = vcmp.eq.s32.totalorder %v4578_v26, %v4181_v7  ;;  %v2967_v24 = vsel %vm1731_vm12, 1.0, %v3422_v29  ;;  %vm1061_vm9 = vcmp.eq.s32.totalorder %v4552_v41, %v4181_v7 }
 0x204   :  { %v4682_v40 = vpop.permute.xlu0 %1260  ;;  %vm1507_vm1 = vcmp.eq.s32.totalorder %v4673_v38, %v4181_v7  ;;  %v1826_v27 = vadd.f32 %v4666_v54, %v1602_v14  ;;  %v1825_v18 = vadd.f32 %v2965_v53, %v1601_v62  ;;  %v2139_v54 = vld [vmem:[%s5818_s3 + $0x60] sm:$0xff]  ;;  %v709_v59 = vadd.f32 %v4624_v33, %v4607_v8  ;;  %v2137_v8 = vld [vmem:[%s5818_s3 + $0x50] sm:$0xff]  ;;  %v2134_v62 = vld [vmem:[%s5818_s3 + $0x38] sm:$0xff] }
 0x205   :  { %v2874_v35 = vsel %vm1062_vm8, 1.0, %v3422_v29  ;;  %vm1286_vm10 = vcmp.eq.s32.totalorder %v4543_v25, %v4181_v7  ;;  %vm1285_vm11 = vcmp.eq.s32.totalorder %v4630_v44, %v4181_v7  ;;  %v2873_v26 = vsel %vm1061_vm9, 1.0, %v3422_v29  ;;  %v2136_v25 = vld [vmem:[%s5818_s3 + $0x48] sm:$0xff] }
 0x206   :  { %3244 = vset.pattern.permute.xlu1 %v5898_v46  ;;  %v1852_v22 = vpack.c.bf16 %v1826_v27, %v1825_v18  ;;  %v2906_v44 = vsel %vm1286_vm10, 1.0, %v3422_v29  ;;  %v2905_v41 = vsel %vm1285_vm11, 1.0, %v3422_v29 }
 0x207   :  { %1684 = vperm.xlu1 %3244, %v4302_v43   ;;  %v4696_v42 = vpop.permute.xlu1 %1442  ;;  %v1375_v43 = vadd.f32 %v2899_v52, %v1151_v20  ;;  %v6000_v52 = vld [vmem:[#allocation96_spill] sm:$0xff]  ;;  %v2935_v20 = vsel %vm1507_vm1, 1.0, %v3422_v29 }
 0x208   :  { %v4705_v37 = vpop.permute.xlu0 %1269  ;;  %vm838_vm5 = vcmp.eq.s32.totalorder %v6000_v52, %v4181_v7  ;;  %v1603_v49 = vadd.f32 %v2935_v20, %v1379_v21  ;;  %vm1509_vm12 = vcmp.eq.s32.totalorder %v4696_v42, %v4181_v7  ;;  %v2135_v42 = vld [vmem:[%s5818_s3 + $0x40] sm:$0xff] }
 0x209   :  { %v1599_v61 = vadd.f32 %v2931_v9, %v1375_v43  ;;  %v2842_v31 = vsel %vm838_vm5, 1.0, %v3422_v29 }
 0x20a   :  { %v1827_v48 = vadd.f32 %v2967_v24, %v1603_v49  ;;  %v2132_v49 = vld [vmem:[%s5818_s3 + $0x28] sm:$0xff] }
 0x20b   :  { %3245 = vset.pattern.permute.xlu1 %v5888_v60  ;;  %v4728_v45 = vpop.permute.xlu1 %1445  ;;  %v1823_v32 = vadd.f32 %v4647_v5, %v1599_v61  ;;  %v2841_v61 = vsel %vm837_vm14, 1.0, %v3422_v29 }
 0x20c   :  { %806 = vperm.xlu1 %3245, %v4743_v15   ;;  %v933_v33 = vadd.f32 %v2841_v61, %v709_v59  ;;  %vm1510_vm13 = vcmp.eq.s32.totalorder %v4728_v45, %v4181_v7  ;;  %v2937_v45 = vsel %vm1509_vm12, 1.0, %v3422_v29  ;;  %v6002_v59 = vld [vmem:[#allocation34_spill] sm:$0xff] }
 0x20d   :  { %v1428_v10 = vpop.permute.xlu0 %1427  ;;  %vm391_vm1 = vcmp.eq.s32.totalorder %v6002_v59, %v4181_v7 }
 0x20e   :  { %vm1504_vm4 = vcmp.eq.s32.totalorder %v1428_v10, %v4181_v7  ;;  %v2138_v10 = vld [vmem:[%s5818_s3 + $0x58] sm:$0xff]  ;;  %v1157_v20 = vadd.f32 %v2873_v26, %v933_v33  ;;  %v2779_v33 = vsel %vm391_vm1, 1.0, %v3422_v29 }
 0x20f   :  { %v2932_v57 = vsel %vm1504_vm4, 1.0, %v3422_v29  ;;  %v6006_v26 = vld [vmem:[#allocation61_spill] sm:$0xff] }
 0x210   :  { %v1600_v43 = vadd.f32 %v2932_v57, %v1376_v2  ;;  %809 = vperm.xlu1 %3245, %v4779_v16   ;;  %v1664_v38 = vpop.permute.xlu1 %1663  ;;  %v2140_v2 = vld [vmem:[%s5818_s3 + $0x68] sm:$0xff]  ;;  %v2938_v57 = vsel %vm1510_vm13, 1.0, %v3422_v29  ;;  %v1381_v53 = vadd.f32 %v2905_v41, %v1157_v20  ;;  %vm616_vm5 = vcmp.eq.s32.totalorder %v6006_v26, %v4181_v7  ;;  %v6009_v20 = vld [vmem:[#allocation13_spill] sm:$0xff] }
 0x211   :  { %v1440_v12 = vpop.permute.xlu0 %1439  ;;  %vm1732_vm6 = vcmp.eq.s32.totalorder %v1664_v38, %v4181_v7  ;;  %3121 = vmatprep.subr.mxu1 %v2140_v2  ;;  %vm169_vm8 = vcmp.eq.s32.totalorder %v6009_v20, %v4181_v7 }
 0x212   :  { %v1824_v9 = vadd.f32 %v2964_v58, %v1600_v43  ;;  %vm1508_vm7 = vcmp.eq.s32.totalorder %v1440_v12, %v4181_v7  ;;  %3122 = vmatpush3.msra.mxu1 %v2140_v2  ;;  %v2968_v23 = vsel %vm1732_vm6, 1.0, %v3422_v29  ;;  %v1605_v58 = vadd.f32 %v2937_v45, %v1381_v53  ;;  %v2133_v12 = vld [vmem:[%s5818_s3 + $0x30] sm:$0xff] }
 0x213   :  { %v2936_v5 = vsel %vm1508_vm7, 1.0, %v3422_v29  ;;  %3123 = vmatprep.subr.mxu1 %v2139_v54  ;;  %v2812_v45 = vsel %vm616_vm5, 1.0, %v3422_v29 }
 0x214   :  { %v1604_v34 = vadd.f32 %v2936_v5, %v1380_v6  ;;  %3247 = vset.pattern.permute.xlu1 %v5898_v46  ;;  %v1851_v11 = vpack.c.bf16 %v1824_v9, %v1823_v32  ;;  %3124 = vmatpush3.msra.mxu1 %v2139_v54  ;;  %v3409_v9 = vld [vmem:[%s5816_s0 + $0xc0] sm:$0xff]  ;;  %v2130_v54 = vld [vmem:[%s5818_s3 + $0x18] sm:$0xff] }
 0x215   :  { %1693 = vperm.xlu1 %3247, %v4410_v36   ;;  %v4820_v14 = vpop.permute.xlu1 %782  ;;  %3125 = vmatprep.subr.mxu1 %v2138_v10  ;;  %v934_v36 = vadd.f32 %v2842_v31, %v710_v17  ;;  %v2131_v5 = vld [vmem:[%s5818_s3 + $0x20] sm:$0xff]  ;;  %v2129_v31 = vld [vmem:[%s5818_s3 + $0x10] sm:$0xff] }
 0x216   :  { %v1828_v4 = vadd.f32 %v2968_v23, %v1604_v34  ;;  %3093 = vmatprep.mubr.bf16.mxu0 %v1851_v11  ;;  %3126 = vmatpush3.msra.mxu1 %v2138_v10  ;;  %v2128_v34 = vld [vmem:[%s5818_s3 + $0x8] sm:$0xff]  ;;  %v2127_v11 = vld [vmem:[%s5818_s3] sm:$0xff]  ;;  %vm841_vm5 = vcmp.eq.s32.totalorder %v4820_v14, %v4181_v7 }
 0x217   :  { %3094 = vmatmul.mubr.bf16.gmra.mxu0 %v1852_v22  ;;  %3127 = vmatprep.subr.mxu1 %v2137_v8  ;;  %v1158_v52 = vadd.f32 %v2874_v35, %v934_v36  ;;  %v6001_v10 = vld [vmem:[#allocation11_spill] sm:$0xff]  ;;  %v4912_v35 = vld [vmem:[%s5816_s0 + $0xe0] sm:$0xff]  ;;  %v2845_v14 = vsel %vm841_vm5, 1.0, %v3422_v29 }
 0x218   :  { %v1853_v51 = vpack.c.bf16 %v1828_v4, %v1827_v48  ;;  %3128 = vmatpush3.msra.mxu1 %v2137_v8  ;;  %vm167_vm0 = vcmp.eq.s32.totalorder %v6001_v10, %v4181_v7  ;;  %v6004_v4 = vld [vmem:[#allocation10_spill] sm:$0xff] }
 0x219   :  { %3248 = vset.pattern.permute.xlu1 %v5903_v47  ;;  %3129 = vmatprep.subr.mxu1 %v2136_v25  ;;  %v1382_v21 = vadd.f32 %v2906_v44, %v1158_v52  ;;  %vm168_vm3 = vcmp.eq.s32.totalorder %v6004_v4, %v4181_v7  ;;  %v6005_v36 = vld [vmem:[#allocation58_spill] sm:$0xff]  ;;  %v2747_v8 = vsel %vm167_vm0, 1.0, %v3422_v29  ;;  %v6007_v52 = vld [vmem:[#allocation88_spill] sm:$0xff]  ;;  %vm1288_vm0 = vcmp.eq.s32.totalorder %v4570_v13, %v4181_v7 }
 0x21a   :  { %1027 = vperm.xlu1 %3248, %v4662_v28   ;;  %v1667_v30 = vpop.permute.xlu1 %1666  ;;  %3097 = vmatprep.mubr.bf16.mxu0 %v1853_v51  ;;  %vm615_vm4 = vcmp.eq.s32.totalorder %v6005_v36, %v4181_v7  ;;  %vm839_vm6 = vcmp.eq.s32.totalorder %v6007_v52, %v4181_v7  ;;  %v2748_v44 = vsel %vm168_vm3, 1.0, %v3422_v29  ;;  %v2908_v4 = vsel %vm1288_vm0, 1.0, %v3422_v29 }
 0x21b   :  { %vm1733_vm14 = vcmp.eq.s32.totalorder %v1667_v30, %v4181_v7  ;;  %3130 = vmatpush3.msra.mxu1 %v2136_v25  ;;  %v1606_v6 = vadd.f32 %v2938_v57, %v1382_v21  ;;  %v2811_v41 = vsel %vm615_vm4, 1.0, %v3422_v29  ;;  %v6008_v30 = vld [vmem:[#allocation97_spill] sm:$0xff]  ;;  %v6010_v57 = vld [vmem:[#allocation106_spill] sm:$0xff]  ;;  %v2843_v53 = vsel %vm839_vm6, 1.0, %v3422_v29  ;;  %v6011_v21 = vld [vmem:[#allocation36_spill] sm:$0xff] }
 0x21c   :  { %3131 = vmatprep.subr.mxu1 %v2135_v42  ;;  %v2969_v43 = vsel %vm1733_vm14, 1.0, %v3422_v29  ;;  %vm840_vm7 = vcmp.eq.s32.totalorder %v6008_v30, %v4181_v7  ;;  %vm1063_vm9 = vcmp.eq.s32.totalorder %v6010_v57, %v4181_v7  ;;  %vm393_vm11 = vcmp.eq.s32.totalorder %v6011_v21, %v4181_v7 }
 0x21d   :  { %3132 = vmatpush3.msra.mxu1 %v2135_v42  ;;  %v1829_v27 = vadd.f32 %v2969_v43, %v1605_v58  ;;  %v487_v42 = vadd.f32 %v2779_v33, %v2747_v8  ;;  %v6012_v58 = vld [vmem:[#allocation12_spill] sm:$0xff]  ;;  %v4980_v8 = vld [vmem:[%s5816_s0 + $0xf8] sm:$0xff] }
 0x21e   :  { %1030 = vperm.xlu1 %3248, %v4743_v15   ;;  %v1670_v38 = vpop.permute.xlu1 %1669  ;;  %3133 = vmatprep.subr.mxu1 %v2134_v62  ;;  %vm170_vm13 = vcmp.eq.s32.totalorder %v6012_v58, %v4181_v7 }
 0x21f   :  { %vm1734_vm15 = vcmp.eq.s32.totalorder %v1670_v38, %v4181_v7  ;;  %3134 = vmatpush3.msra.mxu1 %v2134_v62  ;;  %v711_v43 = vadd.f32 %v2811_v41, %v487_v42  ;;  %v2844_v38 = vsel %vm840_vm7, 1.0, %v3422_v29  ;;  %v6017_v41 = vld [vmem:[#allocation107_spill] sm:$0xff] }
 0x220   :  { %v2970_v32 = vsel %vm1734_vm15, 1.0, %v3422_v29  ;;  %3135 = vmatprep.subr.mxu1 %v2133_v12  ;;  %vm1066_vm7 = vcmp.eq.s32.totalorder %v6017_v41, %v4181_v7 }
 0x221   :  { %v1830_v2 = vadd.f32 %v2970_v32, %v1606_v6  ;;  %3136 = vmatpush3.msra.mxu1 %v2133_v12  ;;  %v2749_v6 = vsel %vm169_vm8, 1.0, %v3422_v29  ;;  %v2875_v32 = vsel %vm1063_vm9, 1.0, %v3422_v29 }
 0x222   :  { %3249 = vset.pattern.permute.xlu1 %v5910_v56  ;;  %3137 = vmatprep.subr.mxu1 %v2132_v49 }
 0x223   :  { %1248 = vperm.xlu1 %3249, %v3409_v9   ;;  %v4876_v17 = vpop.permute.xlu1 %1003  ;;  %v1854_v18 = vpack.c.bf16 %v1830_v2, %v1829_v27  ;;  %3138 = vmatpush3.msra.mxu1 %v2132_v49  ;;  %v1449_v27 = vpop.permute.xlu0 %1448  ;;  %v6013_v49 = vld [vmem:[#allocation37_spill] sm:$0xff] }
 0x224   :  { %3139 = vmatprep.subr.mxu1 %v2131_v5  ;;  %vm1064_vm10 = vcmp.eq.s32.totalorder %v4876_v17, %v4181_v7  ;;  %vm394_vm14 = vcmp.eq.s32.totalorder %v6013_v49, %v4181_v7  ;;  %v935_v17 = vadd.f32 %v2843_v53, %v711_v43  ;;  %v2878_v53 = vsel %vm1066_vm7, 1.0, %v3422_v29 }
 0x225   :  { %3098 = vmatmul.mubr.bf16.gmra.mxu0 %v1854_v18  ;;  %3140 = vmatpush3.msra.mxu1 %v2131_v5  ;;  %v2876_v18 = vsel %vm1064_vm10, 1.0, %v3422_v29  ;;  %v2781_v5 = vsel %vm393_vm11, 1.0, %v3422_v29  ;;  %vm1068_vm7 = vcmp.eq.s32.totalorder %v4278_v55, %v4181_v7 }
 0x226   :  { %3141 = vmatprep.subr.mxu1 %v2130_v54  ;;  %v489_v13 = vadd.f32 %v2781_v5, %v2749_v6  ;;  %v6018_v5 = vld [vmem:[#allocation87_spill] sm:$0xff] }
 0x227   :  { %1254 = vperm.xlu1 %3249, %v4743_v15   ;;  %v4885_v24 = vpop.permute.xlu1 %1006  ;;  %3142 = vmatpush3.msra.mxu1 %v2130_v54  ;;  %v1458_v43 = vpop.permute.xlu0 %1457 }
 0x228   :  { %3143 = vmatprep.subr.mxu1 %v2129_v31  ;;  %vm1065_vm8 = vcmp.eq.s32.totalorder %v4885_v24, %v4181_v7 }
 0x229   :  { %3144 = vmatpush3.msra.mxu1 %v2129_v31  ;;  %v2877_v21 = vsel %vm1065_vm8, 1.0, %v3422_v29 }
 0x22a   :  { %3145 = vmatprep.subr.mxu1 %v2128_v34 }
 0x22b   :  { %1257 = vperm.xlu1 %3249, %v4779_v16   ;;  %3146 = vmatpush3.msra.mxu1 %v2128_v34  ;;  %v6015_v34 = vld [vmem:[#allocation63_spill] sm:$0xff] }
 0x22c   :  { %v1225_v61 = vpop.permute.xlu1 %1224  ;;  %3147 = vmatprep.subr.mxu1 %v2127_v11  ;;  %vm618_vm1 = vcmp.eq.s32.totalorder %v6015_v34, %v4181_v7 }
 0x22d   :  { %3148 = vmatpush3.msra.mxu1 %v2127_v11  ;;  %vm1287_vm12 = vcmp.eq.s32.totalorder %v1225_v61, %v4181_v7  ;;  %v1159_v11 = vadd.f32 %v2875_v32, %v935_v17  ;;  %v2782_v61 = vsel %vm394_vm14, 1.0, %v3422_v29  ;;  %v2814_v26 = vsel %vm618_vm1, 1.0, %v3422_v29 }
 0x22e   :  { %v2907_v31 = vsel %vm1287_vm12, 1.0, %v3422_v29  ;;  %vm1737_vm14 = vcmp.eq.s32.totalorder %v6018_v5, %v4181_v7 }
 0x22f   :  { %3250 = vset.pattern.permute.xlu1 %v5894_v50  ;;  %v1383_v36 = vadd.f32 %v2907_v31, %v1159_v11  ;;  %v2973_v34 = vsel %vm1737_vm14, 1.0, %v3422_v29 }
 0x230   :  { %1475 = vperm.xlu1 %3250, %v4662_v28   ;;  %v4899_v23 = vpop.permute.xlu1 %1230 }
 0x231   :  { %vm1289_vm9 = vcmp.eq.s32.totalorder %v4899_v23, %v4181_v7 }
 0x234   :  { %1478 = vperm.xlu1 %3250, %v4743_v15   ;;  %v4902_v22 = vpop.permute.xlu1 %1233  ;;  %v6003_v15 = vld [vmem:[#allocation35_spill] sm:$0xff] }
 0x235   :  { %vm392_vm2 = vcmp.eq.s32.totalorder %v6003_v15, %v4181_v7  ;;  %v6016_v15 = vld [vmem:[#allocation99_spill] sm:$0xff]  ;;  %vm1290_vm10 = vcmp.eq.s32.totalorder %v4902_v22, %v4181_v7  ;;  %v2909_v22 = vsel %vm1289_vm9, 1.0, %v3422_v29 }
 0x236   :  { %v2780_v51 = vsel %vm392_vm2, 1.0, %v3422_v29  ;;  %vm1511_vm2 = vcmp.eq.s32.totalorder %v1449_v27, %v4181_v7  ;;  %vm842_vm4 = vcmp.eq.s32.totalorder %v6016_v15, %v4181_v7  ;;  %v3413_v15 = vld [vmem:[%s5816_s0 + $0xe8] sm:$0xff] }
 0x237   :  { %v488_v62 = vadd.f32 %v2780_v51, %v2748_v44  ;;  %v2846_v44 = vsel %vm842_vm4, 1.0, %v3422_v29 }
 0x238   :  { %3251 = vset.pattern.permute.xlu1 %v5888_v60 }
 0x239   :  { %812 = vperm.xlu1 %3251, %v4912_v35   ;;  %v4915_v48 = vpop.permute.xlu1 %1451  ;;  %v712_v12 = vadd.f32 %v2812_v45, %v488_v62 }
 0x23a   :  { %vm1512_vm3 = vcmp.eq.s32.totalorder %v4915_v48, %v4181_v7 }
 0x23b   :  { %v936_v54 = vadd.f32 %v2844_v38, %v712_v12  ;;  %v2940_v52 = vsel %vm1512_vm3, 1.0, %v3422_v29  ;;  %v2910_v12 = vsel %vm1290_vm10, 1.0, %v3422_v29 }
 0x23d   :  { %3252 = vset.pattern.permute.xlu1 %v5898_v46  ;;  %v4931_v25 = vpop.permute.xlu1 %1454  ;;  %v1160_v59 = vadd.f32 %v2876_v18, %v936_v54 }
 0x23e   :  { %1696 = vperm.xlu1 %3252, %v3409_v9   ;;  %v6014_v9 = vld [vmem:[#allocation60_spill] sm:$0xff]  ;;  %vm1513_vm12 = vcmp.eq.s32.totalorder %v4931_v25, %v4181_v7 }
 0x23f   :  { %vm617_vm15 = vcmp.eq.s32.totalorder %v6014_v9, %v4181_v7  ;;  %v1384_v30 = vadd.f32 %v2908_v4, %v1160_v59  ;;  %v2941_v9 = vsel %vm1513_vm12, 1.0, %v3422_v29 }
 0x240   :  { %v2813_v10 = vsel %vm617_vm15, 1.0, %v3422_v29 }
 0x241   :  { %v713_v51 = vadd.f32 %v2813_v10, %v489_v13  ;;  %v1608_v62 = vadd.f32 %v2940_v52, %v1384_v30 }
 0x242   :  { %1699 = vperm.xlu1 %3252, %v4662_v28   ;;  %v4954_v2 = vpop.permute.xlu1 %788  ;;  %v2750_v28 = vsel %vm170_vm13, 1.0, %v3422_v29  ;;  %vm1514_vm13 = vcmp.eq.s32.totalorder %v1458_v43, %v4181_v7  ;;  %v1464_v43 = vpop.permute.xlu0 %1463 }
 0x243   :  { %v490_v48 = vadd.f32 %v2782_v61, %v2750_v28  ;;  %v937_v58 = vadd.f32 %v2845_v14, %v713_v51  ;;  %v2942_v18 = vsel %vm1514_vm13, 1.0, %v3422_v29  ;;  %v6021_v51 = vld [vmem:[#allocation15_spill] sm:$0xff]  ;;  %vm843_vm8 = vcmp.eq.s32.totalorder %v4954_v2, %v4181_v7 }
 0x244   :  { %vm1516_vm12 = vcmp.eq.s32.totalorder %v1464_v43, %v4181_v7 }
 0x245   :  { %v714_v20 = vadd.f32 %v2814_v26, %v490_v48  ;;  %v6020_v48 = vld [vmem:[#allocation14_spill] sm:$0xff] }
 0x246   :  { %3254 = vset.pattern.permute.xlu1 %v5888_v60  ;;  %v2939_v60 = vsel %vm1511_vm2, 1.0, %v3422_v29  ;;  %vm172_vm1 = vcmp.eq.s32.totalorder %v6020_v48, %v4181_v7  ;;  %vm171_vm2 = vcmp.eq.s32.totalorder %v6021_v51, %v4181_v7 }
 0x247   :  { %821 = vperm.xlu1 %3254, %v4980_v8   ;;  %v1673_v33 = vpop.permute.xlu1 %1672  ;;  %v1607_v42 = vadd.f32 %v2939_v60, %v1383_v36  ;;  %v938_v24 = vadd.f32 %v2846_v44, %v714_v20  ;;  %v6024_v44 = vld [vmem:[#allocation62_spill] sm:$0xff]  ;;  %v2752_v41 = vsel %vm172_vm1, 1.0, %v3422_v29  ;;  %v2751_v30 = vsel %vm171_vm2, 1.0, %v3422_v29 }
 0x248   :  { %vm1735_vm6 = vcmp.eq.s32.totalorder %v1673_v33, %v4181_v7  ;;  %vm619_vm5 = vcmp.eq.s32.totalorder %v6024_v44, %v4181_v7 }
 0x249   :  { %v2971_v45 = vsel %vm1735_vm6, 1.0, %v3422_v29  ;;  %v1162_v32 = vadd.f32 %v2878_v53, %v938_v24  ;;  %v2880_v53 = vsel %vm1068_vm7, 1.0, %v3422_v29 }
 0x24a   :  { %v1831_v23 = vadd.f32 %v2971_v45, %v1607_v42 }
 0x24b   :  { %3255 = vset.pattern.permute.xlu1 %v5898_v46  ;;  %v1676_v57 = vpop.permute.xlu1 %1675  ;;  %v1386_v17 = vadd.f32 %v2910_v12, %v1162_v32  ;;  %v6026_v12 = vld [vmem:[#allocation17_spill] sm:$0xff]  ;;  %v6027_v32 = vld [vmem:[#allocation40_spill] sm:$0xff] }
 0x24c   :  { %vm1736_vm11 = vcmp.eq.s32.totalorder %v1676_v57, %v4181_v7  ;;  %1705 = vperm.xlu1 %3255, %v4779_v16   ;;  %v1161_v16 = vadd.f32 %v2877_v21, %v937_v58  ;;  %v2847_v21 = vsel %vm843_vm8, 1.0, %v3422_v29  ;;  %vm173_vm13 = vcmp.eq.s32.totalorder %v6026_v12, %v4181_v7 }
 0x24d   :  { %v2972_v38 = vsel %vm1736_vm11, 1.0, %v3422_v29  ;;  %v1610_v28 = vadd.f32 %v2942_v18, %v1386_v17  ;;  %vm1291_vm11 = vcmp.eq.s32.totalorder %v4594_v3, %v4181_v7  ;;  %vm397_vm14 = vcmp.eq.s32.totalorder %v6027_v32, %v4181_v7 }
 0x24e   :  { %v1832_v6 = vadd.f32 %v2972_v38, %v1608_v62  ;;  %v1385_v25 = vadd.f32 %v2909_v22, %v1161_v16  ;;  %v6028_v16 = vld [vmem:[#allocation41_spill] sm:$0xff]  ;;  %v2911_v17 = vsel %vm1291_vm11, 1.0, %v3422_v29  ;;  %v2944_v18 = vsel %vm1516_vm12, 1.0, %v3422_v29 }
 0x24f   :  { %v2753_v5 = vsel %vm173_vm13, 1.0, %v3422_v29  ;;  %vm1294_vm11 = vcmp.eq.s32.totalorder %v4617_v19, %v4181_v7 }
 0x250   :  { %3256 = vset.pattern.permute.xlu1 %v5903_v47  ;;  %v5012_v27 = vpop.permute.xlu1 %797  ;;  %v1855_v49 = vpack.c.bf16 %v1832_v6, %v1831_v23  ;;  %v1609_v54 = vadd.f32 %v2941_v9, %v1385_v25  ;;  %v3412_v47 = vld [vmem:[%s5816_s0 + $0xf0] sm:$0xff] }
 0x251   :  { %1036 = vperm.xlu1 %3256, %v4912_v35  }
 0x252   :  { %3101 = vmatprep.mubr.bf16.mxu0 %v1855_v49  ;;  %v1833_v61 = vadd.f32 %v2973_v34, %v1609_v54  ;;  %v6029_v49 = vld [vmem:[#allocation16_spill] sm:$0xff]  ;;  %v2785_v54 = vsel %vm397_vm14, 1.0, %v3422_v29 }
 0x255   :  { %1042 = vperm.xlu1 %3256, %v3412_v47   ;;  %v1682_v31 = vpop.permute.xlu1 %1681 }
 0x256   :  { %vm1738_vm15 = vcmp.eq.s32.totalorder %v1682_v31, %v4181_v7 }
 0x257   :  { %v2974_v11 = vsel %vm1738_vm15, 1.0, %v3422_v29  ;;  %vm398_vm15 = vcmp.eq.s32.totalorder %v6028_v16, %v4181_v7 }
 0x258   :  { %v1834_v10 = vadd.f32 %v2974_v11, %v1610_v28  ;;  %v6030_v28 = vld [vmem:[#allocation64_spill] sm:$0xff]  ;;  %v6031_v11 = vld [vmem:[#allocation67_spill] sm:$0xff] }
 0x259   :  { %1045 = vperm.xlu1 %3256, %v4980_v8   ;;  %vm621_vm2 = vcmp.eq.s32.totalorder %v6030_v28, %v4181_v7  ;;  %v6035_v28 = vld [vmem:[#allocation19_spill] sm:$0xff] }
 0x25a   :  { %v1013_v59 = vpop.permute.xlu1 %1012  ;;  %v1856_v13 = vpack.c.bf16 %v1834_v10, %v1833_v61  ;;  %v6032_v61 = vld [vmem:[#allocation89_spill] sm:$0xff]  ;;  %v2817_v48 = vsel %vm621_vm2, 1.0, %v3422_v29 }
 0x25b   :  { %vm1067_vm9 = vcmp.eq.s32.totalorder %v1013_v59, %v4181_v7 }
 0x25c   :  { %3102 = vmatmul.mubr.bf16.gmra.mxu0 %v1856_v13  ;;  %v2879_v58 = vsel %vm1067_vm9, 1.0, %v3422_v29  ;;  %v493_v13 = vadd.f32 %v2785_v54, %v2753_v5 }
 0x25d   :  { %3258 = vset.pattern.permute.xlu1 %v5910_v56  ;;  %v6019_v56 = vld [vmem:[#allocation39_spill] sm:$0xff] }
 0x25e   :  { %1263 = vperm.xlu1 %3258, %v3413_v15   ;;  %v5030_v4 = vpop.permute.xlu1 %1018  ;;  %vm396_vm0 = vcmp.eq.s32.totalorder %v6019_v56, %v4181_v7  ;;  %v6033_v56 = vld [vmem:[#allocation102_spill] sm:$0xff] }
 0x25f   :  { %v2784_v52 = vsel %vm396_vm0, 1.0, %v3422_v29  ;;  %vm174_vm0 = vcmp.eq.s32.totalorder %v6029_v49, %v4181_v7  ;;  %vm1069_vm8 = vcmp.eq.s32.totalorder %v5030_v4, %v4181_v7 }
 0x260   :  { %v492_v45 = vadd.f32 %v2784_v52, %v2752_v41  ;;  %v2754_v31 = vsel %vm174_vm0, 1.0, %v3422_v29  ;;  %v717_v41 = vadd.f32 %v2817_v48, %v493_v13  ;;  %vm175_vm0 = vcmp.eq.s32.totalorder %v6035_v28, %v4181_v7 }
 0x262   :  { %1266 = vperm.xlu1 %3258, %v3412_v47   ;;  %v5032_v36 = vpop.permute.xlu1 %1021 }
 0x263   :  { %vm1070_vm9 = vcmp.eq.s32.totalorder %v5032_v36, %v4181_v7 }
 0x264   :  { %v2882_v4 = vsel %vm1070_vm9, 1.0, %v3422_v29 }
 0x266   :  { %3260 = vset.pattern.permute.xlu1 %v5894_v50  ;;  %v6022_v50 = vld [vmem:[#allocation38_spill] sm:$0xff] }
 0x267   :  { %1484 = vperm.xlu1 %3260, %v4912_v35   ;;  %v1240_v33 = vpop.permute.xlu1 %1239  ;;  %vm395_vm3 = vcmp.eq.s32.totalorder %v6022_v50, %v4181_v7  ;;  %v6023_v35 = vld [vmem:[#allocation65_spill] sm:$0xff] }
 0x268   :  { %vm620_vm4 = vcmp.eq.s32.totalorder %v6023_v35, %v4181_v7  ;;  %v2783_v20 = vsel %vm395_vm3, 1.0, %v3422_v29  ;;  %vm1292_vm10 = vcmp.eq.s32.totalorder %v1240_v33, %v4181_v7  ;;  %vm622_vm3 = vcmp.eq.s32.totalorder %v6031_v11, %v4181_v7  ;;  %v6036_v11 = vld [vmem:[#allocation42_spill] sm:$0xff] }
 0x269   :  { %v2816_v14 = vsel %vm620_vm4, 1.0, %v3422_v29  ;;  %v491_v62 = vadd.f32 %v2783_v20, %v2751_v30  ;;  %v2912_v23 = vsel %vm1292_vm10, 1.0, %v3422_v29  ;;  %vm1740_vm4 = vcmp.eq.s32.totalorder %v6032_v61, %v4181_v7 }
 0x26a   :  { %v716_v24 = vadd.f32 %v2816_v14, %v492_v45  ;;  %v2818_v51 = vsel %vm622_vm3, 1.0, %v3422_v29  ;;  %v2976_v50 = vsel %vm1740_vm4, 1.0, %v3422_v29  ;;  %v2881_v45 = vsel %vm1069_vm8, 1.0, %v3422_v29 }
 0x26b   :  { %1490 = vperm.xlu1 %3260, %v3412_v47   ;;  %v5036_v26 = vpop.permute.xlu1 %1242 }
 0x26c   :  { %vm1293_vm10 = vcmp.eq.s32.totalorder %v5036_v26, %v4181_v7 }
 0x26f   :  { %1493 = vperm.xlu1 %3260, %v4980_v8   ;;  %v6025_v8 = vld [vmem:[#allocation100_spill] sm:$0xff] }
 0x270   :  { %v1461_v60 = vpop.permute.xlu1 %1460  ;;  %vm844_vm6 = vcmp.eq.s32.totalorder %v6025_v8, %v4181_v7 }
 0x271   :  { %v2848_v57 = vsel %vm844_vm6, 1.0, %v3422_v29  ;;  %vm1515_vm1 = vcmp.eq.s32.totalorder %v1461_v60, %v4181_v7  ;;  %vm846_vm6 = vcmp.eq.s32.totalorder %v5012_v27, %v4181_v7 }
 0x272   :  { %v940_v2 = vadd.f32 %v2848_v57, %v716_v24  ;;  %v2943_v34 = vsel %vm1515_vm1, 1.0, %v3422_v29  ;;  %v2850_v8 = vsel %vm846_vm6, 1.0, %v3422_v29  ;;  %v2913_v57 = vsel %vm1293_vm10, 1.0, %v3422_v29 }
 0x273   :  { %3262 = vset.pattern.permute.xlu1 %v5898_v46  ;;  %v2815_v46 = vsel %vm619_vm5, 1.0, %v3422_v29  ;;  %vm845_vm5 = vcmp.eq.s32.totalorder %v6033_v56, %v4181_v7  ;;  %vm399_vm1 = vcmp.eq.s32.totalorder %v6036_v11, %v4181_v7  ;;  %v6039_v56 = vld [vmem:[#allocation21_spill] sm:$0xff] }
 0x274   :  { %1711 = vperm.xlu1 %3262, %v3413_v15   ;;  %v5059_v42 = vpop.permute.xlu1 %1466  ;;  %v715_v38 = vadd.f32 %v2815_v46, %v491_v62  ;;  %v1164_v6 = vadd.f32 %v2880_v53, %v940_v2  ;;  %v2849_v27 = vsel %vm845_vm5, 1.0, %v3422_v29  ;;  %v2914_v53 = vsel %vm1294_vm11, 1.0, %v3422_v29 }
 0x275   :  { %v941_v46 = vadd.f32 %v2849_v27, %v717_v41  ;;  %vm1517_vm12 = vcmp.eq.s32.totalorder %v5059_v42, %v4181_v7  ;;  %vm177_vm4 = vcmp.eq.s32.totalorder %v6039_v56, %v4181_v7  ;;  %v6042_v27 = vld [vmem:[#allocation69_spill] sm:$0xff]  ;;  %vm1071_vm11 = vcmp.eq.s32.totalorder %v4305_v0, %v4181_v7 }
 0x276   :  { %v939_v22 = vadd.f32 %v2847_v21, %v715_v38  ;;  %v1388_v25 = vadd.f32 %v2912_v23, %v1164_v6  ;;  %v2945_v21 = vsel %vm1517_vm12, 1.0, %v3422_v29  ;;  %v6034_v38 = vld [vmem:[#allocation90_spill] sm:$0xff] }
 0x277   :  { %v1165_v62 = vadd.f32 %v2881_v45, %v941_v46  ;;  %vm1741_vm14 = vcmp.eq.s32.totalorder %v6034_v38, %v4181_v7  ;;  %v2757_v46 = vsel %vm177_vm4, 1.0, %v3422_v29 }
 0x278   :  { %1714 = vperm.xlu1 %3262, %v3412_v47   ;;  %v5071_v55 = vpop.permute.xlu1 %1469  ;;  %v1163_v9 = vadd.f32 %v2879_v58, %v939_v22  ;;  %v2786_v47 = vsel %vm398_vm15, 1.0, %v3422_v29  ;;  %v1612_v10 = vadd.f32 %v2944_v18, %v1388_v25  ;;  %v5151_v18 = vld [vmem:[%s5819_s2] ss:$0 sm:$0xff] }
 0x279   :  { %v494_v15 = vadd.f32 %v2786_v47, %v2754_v31  ;;  %vm1518_vm13 = vcmp.eq.s32.totalorder %v5071_v55, %v4181_v7  ;;  %v1389_v43 = vadd.f32 %v2913_v57, %v1165_v62  ;;  %v2977_v55 = vsel %vm1741_vm14, 1.0, %v3422_v29  ;;  %v6043_v62 = vld [vmem:[#allocation103_spill] sm:$0xff] }
 0x27a   :  { %v1387_v59 = vadd.f32 %v2911_v17, %v1163_v9  ;;  %v1836_v52 = vadd.f32 %v2976_v50, %v1612_v10  ;;  %v2946_v19 = vsel %vm1518_vm13, 1.0, %v3422_v29  ;;  %v2787_v50 = vsel %vm399_vm1, 1.0, %v3422_v29 }
 0x27b   :  { %v718_v30 = vadd.f32 %v2818_v51, %v494_v15  ;;  %v1613_v42 = vadd.f32 %v2945_v21, %v1389_v43  ;;  %v2755_v15 = vsel %vm175_vm0, 1.0, %v3422_v29  ;;  %vm847_vm8 = vcmp.eq.s32.totalorder %v6043_v62, %v4181_v7 }
 0x27c   :  { %v1611_v60 = vadd.f32 %v2943_v34, %v1387_v59  ;;  %v6037_v59 = vld [vmem:[#allocation18_spill] sm:$0xff] }
 0x27d   :  { %v5087_v3 = vpop.permute.xlu1 %803  ;;  %v942_v36 = vadd.f32 %v2850_v8, %v718_v30  ;;  %v1837_v22 = vadd.f32 %v2977_v55, %v1613_v42  ;;  %vm176_vm2 = vcmp.eq.s32.totalorder %v6037_v59, %v4181_v7  ;;  %v6044_v42 = vld [vmem:[#allocation44_spill] sm:$0xff]  ;;  %v6045_v55 = vld [vmem:[#allocation45_spill] sm:$0xff] }
 0x27e   :  { %v2756_v30 = vsel %vm176_vm2, 1.0, %v3422_v29  ;;  %vm848_vm9 = vcmp.eq.s32.totalorder %v5087_v3, %v4181_v7  ;;  %vm401_vm10 = vcmp.eq.s32.totalorder %v6044_v42, %v4181_v7  ;;  %vm402_vm12 = vcmp.eq.s32.totalorder %v6045_v55, %v4181_v7 }
 0x27f   :  { %v1166_v26 = vadd.f32 %v2882_v4, %v942_v36  ;;  %v495_v36 = vadd.f32 %v2787_v50, %v2755_v15  ;;  %v2852_v0 = vsel %vm848_vm9, 1.0, %v3422_v29  ;;  %v2789_v3 = vsel %vm401_vm10, 1.0, %v3422_v29 }
 0x281   :  { %v1390_v2 = vadd.f32 %v2914_v53, %v1166_v26 }
 0x282   :  { %v1685_v33 = vpop.permute.xlu1 %1684 }
 0x283   :  { %vm1739_vm7 = vcmp.eq.s32.totalorder %v1685_v33, %v4181_v7  ;;  %v1614_v23 = vadd.f32 %v2946_v19, %v1390_v2  ;;  %v6038_v33 = vld [vmem:[#allocation20_spill] sm:$0xff]  ;;  %v1473_v2 = vpop.permute.xlu0 %1472 }
 0x284   :  { %v2975_v35 = vsel %vm1739_vm7, 1.0, %v3422_v29  ;;  %vm178_vm3 = vcmp.eq.s32.totalorder %v6038_v33, %v4181_v7  ;;  %vm624_vm7 = vcmp.eq.s32.totalorder %v6042_v27, %v4181_v7  ;;  %vm1519_vm2 = vcmp.eq.s32.totalorder %v1473_v2, %v4181_v7 }
 0x285   :  { %v1835_v44 = vadd.f32 %v2975_v35, %v1611_v60  ;;  %v6040_v60 = vld [vmem:[#allocation43_spill] sm:$0xff]  ;;  %v6041_v35 = vld [vmem:[#allocation66_spill] sm:$0xff]  ;;  %v2820_v21 = vsel %vm624_vm7, 1.0, %v3422_v29  ;;  %v2947_v27 = vsel %vm1519_vm2, 1.0, %v3422_v29  ;;  %vm1074_vm7 = vcmp.eq.s32.totalorder %v4338_v63, %v4181_v7 }
 0x286   :  { %vm400_vm5 = vcmp.eq.s32.totalorder %v6040_v60, %v4181_v7  ;;  %vm623_vm6 = vcmp.eq.s32.totalorder %v6041_v35, %v4181_v7 }
 0x287   :  { %v5119_v20 = vpop.permute.xlu1 %806  ;;  %v1857_v14 = vpack.c.bf16 %v1836_v52, %v1835_v44  ;;  %v2788_v45 = vsel %vm400_vm5, 1.0, %v3422_v29  ;;  %v2819_v57 = vsel %vm623_vm6, 1.0, %v3422_v29 }
 0x288   :  { %v496_v38 = vadd.f32 %v2788_v45, %v2756_v30  ;;  %vm849_vm5 = vcmp.eq.s32.totalorder %v5119_v20, %v4181_v7 }
 0x289   :  { %3105 = vmatprep.mubr.bf16.mxu0 %v1857_v14  ;;  %v2758_v14 = vsel %vm178_vm3, 1.0, %v3422_v29  ;;  %vm1296_vm3 = vcmp.eq.s32.totalorder %v4644_v1, %v4181_v7 }
 0x28b   :  { %v5130_v24 = vpop.permute.xlu1 %809 }
 0x28c   :  { %vm850_vm1 = vcmp.eq.s32.totalorder %v5130_v24, %v4181_v7 }
 0x28d   :  { %v2854_v24 = vsel %vm850_vm1, 1.0, %v3422_v29 }
 0x290   :  { %v1694_v58 = vpop.permute.xlu1 %1693 }
 0x291   :  { %vm1742_vm15 = vcmp.eq.s32.totalorder %v1694_v58, %v4181_v7 }
 0x292   :  { %v2978_v6 = vsel %vm1742_vm15, 1.0, %v3422_v29 }
 0x293   :  { %v1838_v12 = vadd.f32 %v2978_v6, %v1614_v23  ;;  %v2851_v6 = vsel %vm847_vm8, 1.0, %v3422_v29 }
 0x295   :  { %v5140_v32 = vpop.permute.xlu1 %1027  ;;  %v1858_v16 = vpack.c.bf16 %v1838_v12, %v1837_v22  ;;  %v719_v12 = vadd.f32 %v2819_v57, %v495_v36 }
 0x296   :  { %vm1072_vm13 = vcmp.eq.s32.totalorder %v5140_v32, %v4181_v7 }
 0x297   :  { %3106 = vmatmul.mubr.bf16.gmra.mxu0 %v1858_v16  ;;  %v720_v16 = vadd.f32 %v2820_v21, %v496_v38  ;;  %v943_v28 = vadd.f32 %v2851_v6, %v719_v12 }
 0x299   :  { %v5142_v49 = vpop.permute.xlu1 %1030  ;;  %v944_v59 = vadd.f32 %v2852_v0, %v720_v16 }
 0x29a   :  { %vm1073_vm8 = vcmp.eq.s32.totalorder %v5142_v49, %v4181_v7 }
 0x29b   :  { %v2885_v62 = vsel %vm1073_vm8, 1.0, %v3422_v29 }
 0x29e   :  { %v5144_v9 = vpop.permute.xlu1 %1248 }
 0x29f   :  { %vm1295_vm14 = vcmp.eq.s32.totalorder %v5144_v9, %v4181_v7  ;;  %v5226_v9 = vpop.permute.xlu0 %1481 }
 0x2a2   :  { %v5146_v25 = vpop.permute.xlu1 %1254 }
 0x2a3   :  { %v3087_v17 = vpop.f32.mrf.mxu0  ;;  %vm1297_vm9 = vcmp.eq.s32.totalorder %v5146_v25, %v4181_v7  ;;  %v2886_v25 = vsel %vm1074_vm7, 1.0, %v3422_v29 }
 0x2a4   :  { %v1977_v61 = vadd.f32 %v3087_v17, %v5151_v18  ;;  %v6046_v17 = vld [vmem:[#allocation71_spill] sm:$0xff] }
 0x2a5   :  { %v1968_v5 = vpop.f32.mrf.mxu0  ;;  %vm626_vm15 = vcmp.eq.s32.totalorder %v6046_v17, %v4181_v7 }
 0x2a6   :  { %v5153_v54 = vpop.permute.xlu1 %1257  ;;  %v1969_v47 = vadd.f32 %v5151_v18, %v1968_v5  ;;  %v2097_v8 = vmax.f32 %v1977_v61, 0.0  ;;  %v2883_v5 = vsel %vm1071_vm11, 1.0, %v3422_v29  ;;  %v2790_v61 = vsel %vm402_vm12, 1.0, %v3422_v29 }
 0x2a7   :  { %v3088_v31 = vpop.f32.mrf.mxu0  ;;  %v2822_v15 = vsel %vm626_vm15, 1.0, %v3422_v29  ;;  %v1167_v33 = vadd.f32 %v2883_v5, %v943_v28  ;;  %v498_v50 = vadd.f32 %v2790_v61, %v2758_v14  ;;  %v2853_v14 = vsel %vm849_vm5, 1.0, %v3422_v29 }
 0x2a8   :  { %v2095_v34 = vmax.f32 %v1969_v47, 0.0  ;;  %v1980_v52 = vadd.f32 %v3088_v31, %v5151_v18  ;;  %vm1298_vm10 = vcmp.eq.s32.totalorder %v5153_v54, %v4181_v7  ;;  %v2917_v54 = vsel %vm1297_vm9, 1.0, %v3422_v29 }
 0x2a9   :  { %v1971_v10 = vpop.f32.mrf.mxu0  ;;  %v722_v1 = vadd.f32 %v2822_v15, %v498_v50 }
 0x2aa   :  { %v1972_v13 = vadd.f32 %v5151_v18, %v1971_v10  ;;  %3149 = vmatprep.mubr.f32.mxu1 %v2095_v34  ;;  %v2098_v43 = vmax.f32 %v1980_v52, 0.0  ;;  %v2884_v34 = vsel %vm1072_vm13, 1.0, %v3422_v29  ;;  %v6047_v10 = vld [vmem:[#allocation68_spill] sm:$0xff]  ;;  %vm1522_vm13 = vcmp.eq.s32.totalorder %v5226_v9, %v4181_v7  ;;  %v6048_v9 = vld [vmem:[#allocation23_spill] sm:$0xff] }
 0x2ab   :  { %v5171_v48 = vpop.permute.xlu1 %1475  ;;  %v3091_v51 = vpop.f32.mrf.mxu0  ;;  %vm625_vm0 = vcmp.eq.s32.totalorder %v6047_v10, %v4181_v7  ;;  %v1168_v56 = vadd.f32 %v2884_v34, %v944_v59  ;;  %v946_v45 = vadd.f32 %v2854_v24, %v722_v1  ;;  %v2950_v63 = vsel %vm1522_vm13, 1.0, %v3422_v29  ;;  %v6050_v10 = vld [vmem:[#allocation47_spill] sm:$0xff]  ;;  %v6051_v59 = vld [vmem:[#allocation22_spill] sm:$0xff] }
 0x2ac   :  { %v2096_v44 = vmax.f32 %v1972_v13, 0.0  ;;  %v1993_v58 = vadd.f32 %v3091_v51, %v5151_v18  ;;  %v2915_v13 = vsel %vm1295_vm14, 1.0, %v3422_v29  ;;  %vm1520_vm4 = vcmp.eq.s32.totalorder %v5171_v48, %v4181_v7 }
 0x2ad   :  { %v1984_v41 = vpop.f32.mrf.mxu0  ;;  %v497_v51 = vadd.f32 %v2789_v3, %v2757_v46  ;;  %v2821_v35 = vsel %vm625_vm0, 1.0, %v3422_v29  ;;  %v1391_v52 = vadd.f32 %v2915_v13, %v1167_v33  ;;  %v2916_v48 = vsel %vm1296_vm3, 1.0, %v3422_v29  ;;  %v6052_v13 = vld [vmem:[#allocation24_spill] sm:$0xff] }
 0x2ae   :  { %v1985_v4 = vadd.f32 %v5151_v18, %v1984_v41  ;;  %3150 = vmatmul.mubr.f32.vlgmr.msra.gmra.mxu1 %v2096_v44  ;;  %v2101_v11 = vmax.f32 %v1993_v58, 0.0  ;;  %v5251_v41 = vpop.permute.xlu0 %1487  ;;  %v1392_v20 = vadd.f32 %v2916_v48, %v1168_v56  ;;  %v1170_v2 = vadd.f32 %v2886_v25, %v946_v45  ;;  %v6056_v48 = vld [vmem:[#allocation70_spill] sm:$0xff] }
 0x2af   :  { %v5193_v26 = vpop.permute.xlu1 %1478  ;;  %v3092_v53 = vpop.f32.mrf.mxu0  ;;  %3152 = vmatprep.mubr.f32.mxu1 %v2097_v8  ;;  %v2948_v8 = vsel %vm1520_vm4, 1.0, %v3422_v29  ;;  %v721_v30 = vadd.f32 %v2821_v35, %v497_v51  ;;  %vm179_vm0 = vcmp.eq.s32.totalorder %v6048_v9, %v4181_v7  ;;  %vm404_vm2 = vcmp.eq.s32.totalorder %v6050_v10, %v4181_v7 }
 0x2b0   :  { %v2099_v19 = vmax.f32 %v1985_v4, 0.0  ;;  %v1996_v32 = vadd.f32 %v3092_v53, %v5151_v18  ;;  %v1615_v4 = vadd.f32 %v2947_v27, %v1391_v52  ;;  %v1616_v57 = vadd.f32 %v2948_v8, %v1392_v20  ;;  %v6054_v52 = vld [vmem:[#allocation48_spill] sm:$0xff] }
 0x2b1   :  { %v1987_v23 = vpop.f32.mrf.mxu0  ;;  %v945_v53 = vadd.f32 %v2853_v14, %v721_v30  ;;  %vm1521_vm12 = vcmp.eq.s32.totalorder %v5193_v26, %v4181_v7  ;;  %vm180_vm3 = vcmp.eq.s32.totalorder %v6051_v59, %v4181_v7  ;;  %vm182_vm4 = vcmp.eq.s32.totalorder %v6052_v13, %v4181_v7  ;;  %v6057_v14 = vld [vmem:[#allocation73_spill] sm:$0xff] }
 0x2b2   :  { %v1988_v22 = vadd.f32 %v5151_v18, %v1987_v23  ;;  %3153 = vmatmul.mubr.f32.gmra.mxu1 %v2098_v43  ;;  %v2102_v60 = vmax.f32 %v1996_v32, 0.0  ;;  %v1703_v38 = vpop.permute.xlu0 %1702  ;;  %v2949_v23 = vsel %vm1521_vm12, 1.0, %v3422_v29  ;;  %v2759_v56 = vsel %vm179_vm0, 1.0, %v3422_v29 }
 0x2b3   :  { %3155 = vmatprep.mubr.f32.mxu1 %v2099_v19  ;;  %v2918_v19 = vsel %vm1298_vm10, 1.0, %v3422_v29  ;;  %v1169_v42 = vadd.f32 %v2885_v62, %v945_v53  ;;  %vm1745_vm14 = vcmp.eq.s32.totalorder %v1703_v38, %v4181_v7  ;;  %v2792_v35 = vsel %vm404_vm2, 1.0, %v3422_v29 }
 0x2b4   :  { %v2100_v47 = vmax.f32 %v1988_v22, 0.0  ;;  %v5219_v31 = vpop.permute.xlu1 %812  ;;  %v1394_v6 = vadd.f32 %v2918_v19, %v1170_v2  ;;  %v2981_v12 = vsel %vm1745_vm14, 1.0, %v3422_v29  ;;  %v2760_v27 = vsel %vm180_vm3, 1.0, %v3422_v29 }
 0x2b5   :  { %v1393_v55 = vadd.f32 %v2917_v54, %v1169_v42  ;;  %v2762_v1 = vsel %vm182_vm4, 1.0, %v3422_v29  ;;  %vm627_vm8 = vcmp.eq.s32.totalorder %v6056_v48, %v4181_v7  ;;  %vm628_vm9 = vcmp.eq.s32.totalorder %v6057_v14, %v4181_v7  ;;  %v6060_v54 = vld [vmem:[#allocation74_spill] sm:$0xff] }
 0x2b6   :  { %3156 = vmatmul.mubr.f32.gmra.mxu1 %v2100_v47  ;;  %v1618_v0 = vadd.f32 %v2950_v63, %v1394_v6  ;;  %v2823_v53 = vsel %vm627_vm8, 1.0, %v3422_v29  ;;  %vm851_vm12 = vcmp.eq.s32.totalorder %v5219_v31, %v4181_v7  ;;  %v2824_v25 = vsel %vm628_vm9, 1.0, %v3422_v29  ;;  %v1709_v59 = vpop.permute.xlu0 %1708 }
 0x2b7   :  { %3158 = vmatprep.mubr.f32.mxu1 %v2101_v11  ;;  %v1617_v22 = vadd.f32 %v2949_v23, %v1393_v55  ;;  %v6049_v11 = vld [vmem:[#allocation46_spill] sm:$0xff]  ;;  %vm630_vm13 = vcmp.eq.s32.totalorder %v6060_v54, %v4181_v7  ;;  %vm1076_vm14 = vcmp.eq.s32.totalorder %v4372_v39, %v4181_v7  ;;  %v2855_v31 = vsel %vm851_vm12, 1.0, %v3422_v29  ;;  %v6061_v39 = vld [vmem:[#allocation105_spill] sm:$0xff] }
 0x2b8   :  { %vm403_vm1 = vcmp.eq.s32.totalorder %v6049_v11, %v4181_v7  ;;  %vm853_vm0 = vcmp.eq.s32.totalorder %v6061_v39, %v4181_v7  ;;  %vm1299_vm2 = vcmp.eq.s32.totalorder %v4682_v40, %v4181_v7  ;;  %vm1524_vm8 = vcmp.eq.s32.totalorder %v5251_v41, %v4181_v7 }
 0x2b9   :  { %v1697_v44 = vpop.permute.xlu1 %1696  ;;  %v1841_v5 = vadd.f32 %v2981_v12, %v1617_v22  ;;  %v2791_v51 = vsel %vm403_vm1, 1.0, %v3422_v29  ;;  %v2826_v12 = vsel %vm630_vm13, 1.0, %v3422_v29  ;;  %v2952_v14 = vsel %vm1524_vm8, 1.0, %v3422_v29 }
 0x2ba   :  { %vm1743_vm6 = vcmp.eq.s32.totalorder %v1697_v44, %v4181_v7  ;;  %3159 = vmatmul.mubr.f32.gmra.mxu1 %v2102_v60  ;;  %v6053_v60 = vld [vmem:[#allocation25_spill] sm:$0xff]  ;;  %v499_v20 = vadd.f32 %v2791_v51, %v2759_v56 }
 0x2bb   :  { %v2979_v46 = vsel %vm1743_vm6, 1.0, %v3422_v29  ;;  %vm181_vm5 = vcmp.eq.s32.totalorder %v6053_v60, %v4181_v7  ;;  %vm405_vm6 = vcmp.eq.s32.totalorder %v6054_v52, %v4181_v7  ;;  %v6055_v44 = vld [vmem:[#allocation49_spill] sm:$0xff] }
 0x2bc   :  { %v1839_v21 = vadd.f32 %v2979_v46, %v1615_v4  ;;  %vm406_vm7 = vcmp.eq.s32.totalorder %v6055_v44, %v4181_v7  ;;  %v2761_v30 = vsel %vm181_vm5, 1.0, %v3422_v29  ;;  %v723_v23 = vadd.f32 %v2823_v53, %v499_v20 }
 0x2bd   :  { %v1700_v36 = vpop.permute.xlu1 %1699  ;;  %v2794_v62 = vsel %vm406_vm7, 1.0, %v3422_v29  ;;  %vm1302_vm7 = vcmp.eq.s32.totalorder %v4705_v37, %v4181_v7 }
 0x2be   :  { %vm1744_vm11 = vcmp.eq.s32.totalorder %v1700_v36, %v4181_v7  ;;  %v500_v36 = vadd.f32 %v2792_v35, %v2760_v27  ;;  %v2922_v20 = vsel %vm1302_vm7, 1.0, %v3422_v29 }
 0x2bf   :  { %v2980_v49 = vsel %vm1744_vm11, 1.0, %v3422_v29 }
 0x2c0   :  { %v1840_v43 = vadd.f32 %v2980_v49, %v1616_v57  ;;  %v2793_v57 = vsel %vm405_vm6, 1.0, %v3422_v29  ;;  %v724_v22 = vadd.f32 %v2824_v25, %v500_v36 }
 0x2c1   :  { %v501_v42 = vadd.f32 %v2793_v57, %v2761_v30 }
 0x2c2   :  { %v5276_v58 = vpop.permute.xlu1 %821  ;;  %v1859_v26 = vpack.c.bf16 %v1840_v43, %v1839_v21  ;;  %v6058_v21 = vld [vmem:[#allocation72_spill] sm:$0xff] }
 0x2c3   :  { %vm629_vm10 = vcmp.eq.s32.totalorder %v6058_v21, %v4181_v7  ;;  %v6059_v43 = vld [vmem:[#allocation104_spill] sm:$0xff]  ;;  %vm854_vm1 = vcmp.eq.s32.totalorder %v5276_v58, %v4181_v7  ;;  %v2857_v58 = vsel %vm853_vm0, 1.0, %v3422_v29 }
 0x2c4   :  { %3109 = vmatprep.mubr.bf16.mxu0 %v1859_v26  ;;  %vm852_vm11 = vcmp.eq.s32.totalorder %v6059_v43, %v4181_v7  ;;  %v502_v26 = vadd.f32 %v2794_v62, %v2762_v1  ;;  %v2825_v63 = vsel %vm629_vm10, 1.0, %v3422_v29  ;;  %v2858_v40 = vsel %vm854_vm1, 1.0, %v3422_v29 }
 0x2c5   :  { %v2856_v55 = vsel %vm852_vm11, 1.0, %v3422_v29  ;;  %vm1747_vm10 = vcmp.eq.s32.totalorder %v1709_v59, %v4181_v7 }
 0x2c6   :  { %v726_v9 = vadd.f32 %v2826_v12, %v502_v26  ;;  %v2983_v37 = vsel %vm1747_vm10, 1.0, %v3422_v29 }
 0x2c7   :  { %v1706_v16 = vpop.permute.xlu1 %1705 }
 0x2c8   :  { %vm1746_vm15 = vcmp.eq.s32.totalorder %v1706_v16, %v4181_v7  ;;  %v2888_v16 = vsel %vm1076_vm14, 1.0, %v3422_v29 }
 0x2c9   :  { %v2982_v17 = vsel %vm1746_vm15, 1.0, %v3422_v29 }
 0x2ca   :  { %v1842_v32 = vadd.f32 %v2982_v17, %v1618_v0 }
 0x2cc   :  { %v1037_v47 = vpop.permute.xlu1 %1036  ;;  %v1860_v3 = vpack.c.bf16 %v1842_v32, %v1841_v5  ;;  %v948_v5 = vadd.f32 %v2856_v55, %v724_v22  ;;  %v947_v32 = vadd.f32 %v2855_v31, %v723_v23 }
 0x2cd   :  { %vm1075_vm15 = vcmp.eq.s32.totalorder %v1037_v47, %v4181_v7 }
 0x2ce   :  { %3110 = vmatmul.mubr.bf16.gmra.mxu0 %v1860_v3  ;;  %v2887_v0 = vsel %vm1075_vm15, 1.0, %v3422_v29  ;;  %v725_v3 = vadd.f32 %v2825_v63, %v501_v42 }
 0x2cf   :  { %v1171_v10 = vadd.f32 %v2887_v0, %v947_v32 }
 0x2d0   :  { %v5284_v28 = vpop.permute.xlu1 %1042  ;;  %v949_v30 = vadd.f32 %v2857_v58, %v725_v3 }
 0x2d1   :  { %vm1077_vm5 = vcmp.eq.s32.totalorder %v5284_v28, %v4181_v7 }
 0x2d2   :  { %v2889_v44 = vsel %vm1077_vm5, 1.0, %v3422_v29 }
 0x2d4   :  { %v5286_v34 = vpop.permute.xlu1 %1045 }
 0x2d5   :  { %vm1078_vm3 = vcmp.eq.s32.totalorder %v5286_v34, %v4181_v7 }
 0x2d6   :  { %v2890_v60 = vsel %vm1078_vm3, 1.0, %v3422_v29 }
 0x2d7   :  { %v3095_v61 = vpop.f32.mrf.mxu0 }
 0x2d8   :  { %v2009_v45 = vadd.f32 %v3095_v61, %v5151_v18  ;;  %v1172_v61 = vadd.f32 %v2888_v16, %v948_v5 }
 0x2d9   :  { %v5298_v15 = vpop.permute.xlu1 %1263  ;;  %v2000_v33 = vpop.f32.mrf.mxu0 }
 0x2da   :  { %v2001_v50 = vadd.f32 %v5151_v18, %v2000_v33  ;;  %v2105_v2 = vmax.f32 %v2009_v45, 0.0  ;;  %vm1300_vm4 = vcmp.eq.s32.totalorder %v5298_v15, %v4181_v7  ;;  %v2919_v33 = vsel %vm1299_vm2, 1.0, %v3422_v29 }
 0x2db   :  { %v3096_v24 = vpop.f32.mrf.mxu0  ;;  %v2920_v28 = vsel %vm1300_vm4, 1.0, %v3422_v29 }
 0x2dc   :  { %v2103_v8 = vmax.f32 %v2001_v50, 0.0  ;;  %v2012_v19 = vadd.f32 %v3096_v24, %v5151_v18  ;;  %v950_v50 = vadd.f32 %v2858_v40, %v726_v9  ;;  %v1395_v24 = vadd.f32 %v2919_v33, %v1171_v10 }
 0x2dd   :  { %v5318_v4 = vpop.permute.xlu1 %1266  ;;  %v2003_v46 = vpop.f32.mrf.mxu0  ;;  %v1396_v15 = vadd.f32 %v2920_v28, %v1172_v61 }
 0x2de   :  { %v2004_v49 = vadd.f32 %v5151_v18, %v2003_v46  ;;  %3161 = vmatprep.mubr.f32.mxu1 %v2103_v8  ;;  %v2106_v17 = vmax.f32 %v2012_v19, 0.0  ;;  %vm1301_vm9 = vcmp.eq.s32.totalorder %v5318_v4, %v4181_v7  ;;  %v1174_v48 = vadd.f32 %v2890_v60, %v950_v50  ;;  %v1718_v46 = vpop.permute.xlu0 %1717 }
 0x2df   :  { %v2921_v45 = vsel %vm1301_vm9, 1.0, %v3422_v29  ;;  %vm1750_vm13 = vcmp.eq.s32.totalorder %v1718_v46, %v4181_v7  ;;  %v1620_v4 = vadd.f32 %v2952_v14, %v1396_v15 }
 0x2e0   :  { %v2104_v38 = vmax.f32 %v2004_v49, 0.0  ;;  %v1173_v49 = vadd.f32 %v2889_v44, %v949_v30  ;;  %v1398_v43 = vadd.f32 %v2922_v20, %v1174_v48  ;;  %v2986_v23 = vsel %vm1750_vm13, 1.0, %v3422_v29 }
 0x2e2   :  { %v1485_v6 = vpop.permute.xlu1 %1484  ;;  %3162 = vmatmul.mubr.f32.gmra.mxu1 %v2104_v38  ;;  %v1397_v25 = vadd.f32 %v2921_v45, %v1173_v49 }
 0x2e3   :  { %3164 = vmatprep.mubr.f32.mxu1 %v2105_v2  ;;  %vm1523_vm6 = vcmp.eq.s32.totalorder %v1485_v6, %v4181_v7 }
 0x2e4   :  { %v2951_v34 = vsel %vm1523_vm6, 1.0, %v3422_v29 }
 0x2e5   :  { %v3099_v47 = vpop.f32.mrf.mxu0  ;;  %v1619_v36 = vadd.f32 %v2951_v34, %v1395_v24 }
 0x2e6   :  { %v1491_v11 = vpop.permute.xlu1 %1490  ;;  %3165 = vmatmul.mubr.f32.gmra.mxu1 %v2106_v17  ;;  %v2025_v27 = vadd.f32 %v3099_v47, %v5151_v18 }
 0x2e7   :  { %v2016_v13 = vpop.f32.mrf.mxu0  ;;  %vm1525_vm12 = vcmp.eq.s32.totalorder %v1491_v11, %v4181_v7  ;;  %v1843_v38 = vadd.f32 %v2983_v37, %v1619_v36 }
 0x2e8   :  { %v2017_v56 = vadd.f32 %v5151_v18, %v2016_v13  ;;  %v2109_v53 = vmax.f32 %v2025_v27, 0.0  ;;  %v2953_v54 = vsel %vm1525_vm12, 1.0, %v3422_v29 }
 0x2e9   :  { %v3100_v51 = vpop.f32.mrf.mxu0  ;;  %v1621_v31 = vadd.f32 %v2953_v54, %v1397_v25 }
 0x2ea   :  { %v2107_v35 = vmax.f32 %v2017_v56, 0.0  ;;  %v1494_v52 = vpop.permute.xlu1 %1493  ;;  %v2028_v57 = vadd.f32 %v3100_v51, %v5151_v18 }
 0x2eb   :  { %v2019_v1 = vpop.f32.mrf.mxu0  ;;  %vm1526_vm11 = vcmp.eq.s32.totalorder %v1494_v52, %v4181_v7  ;;  %v5422_v52 = vld [vmem:[%s5820_s4] ss:$0 sm:$0xff] }
 0x2ec   :  { %v2020_v8 = vadd.f32 %v5151_v18, %v2019_v1  ;;  %3167 = vmatprep.mubr.f32.mxu1 %v2107_v35  ;;  %v2954_v41 = vsel %vm1526_vm11, 1.0, %v3422_v29  ;;  %v2110_v42 = vmax.f32 %v2028_v57, 0.0 }
 0x2ed   :  { %v1622_v2 = vadd.f32 %v2954_v41, %v1398_v43 }
 0x2ee   :  { %v2108_v62 = vmax.f32 %v2020_v8, 0.0 }
 0x2ef   :  { %v1712_v21 = vpop.permute.xlu1 %1711  ;;  %v1846_v22 = vadd.f32 %v2986_v23, %v1622_v2 }
 0x2f0   :  { %vm1748_vm14 = vcmp.eq.s32.totalorder %v1712_v21, %v4181_v7  ;;  %3168 = vmatmul.mubr.f32.gmra.mxu1 %v2108_v62 }
 0x2f1   :  { %v2984_v19 = vsel %vm1748_vm14, 1.0, %v3422_v29  ;;  %3170 = vmatprep.mubr.f32.mxu1 %v2109_v53 }
 0x2f2   :  { %v1844_v26 = vadd.f32 %v2984_v19, %v1620_v4 }
 0x2f3   :  { %v1715_v55 = vpop.permute.xlu1 %1714 }
 0x2f4   :  { %vm1749_vm15 = vcmp.eq.s32.totalorder %v1715_v55, %v4181_v7  ;;  %3171 = vmatmul.mubr.f32.gmra.mxu1 %v2110_v42  ;;  %v1861_v6 = vpack.c.bf16 %v1844_v26, %v1843_v38 }
 0x2f5   :  { %v2985_v63 = vsel %vm1749_vm15, 1.0, %v3422_v29 }
 0x2f6   :  { %v1845_v12 = vadd.f32 %v2985_v63, %v1621_v31  ;;  %3113 = vmatprep.mubr.bf16.mxu0 %v1861_v6 }
 0x2f8   :  { %v1862_v39 = vpack.c.bf16 %v1846_v22, %v1845_v12 }
 0x2fa   :  { %3114 = vmatmul.mubr.bf16.gmra.mxu0 %v1862_v39 }
 0x31c   :  { %v3103_v16 = vpop.f32.mrf.mxu0 }
 0x31d   :  { %v2041_v47 = vadd.f32 %v3103_v16, %v5151_v18 }
 0x31e   :  { %v2032_v0 = vpop.f32.mrf.mxu0 }
 0x31f   :  { %v2033_v17 = vadd.f32 %v5151_v18, %v2032_v0  ;;  %v2113_v11 = vmax.f32 %v2041_v47, 0.0 }
 0x320   :  { %v3104_v5 = vpop.f32.mrf.mxu0 }
 0x321   :  { %v2111_v32 = vmax.f32 %v2033_v17, 0.0  ;;  %v2044_v9 = vadd.f32 %v3104_v5, %v5151_v18 }
 0x322   :  { %v2035_v3 = vpop.f32.mrf.mxu0 }
 0x323   :  { %v2036_v7 = vadd.f32 %v5151_v18, %v2035_v3  ;;  %3173 = vmatprep.mubr.f32.mxu1 %v2111_v32  ;;  %v2114_v58 = vmax.f32 %v2044_v9, 0.0 }
 0x325   :  { %v2112_v29 = vmax.f32 %v2036_v7, 0.0 }
 0x327   :  { %3174 = vmatmul.mubr.f32.gmra.mxu1 %v2112_v29 }
 0x328   :  { %3176 = vmatprep.mubr.f32.mxu1 %v2113_v11 }
 0x32b   :  { %3177 = vmatmul.mubr.f32.gmra.mxu1 %v2114_v58 }
 0x357   :  { %v3107_v61 = vpop.f32.mrf.mxu0 }
 0x358   :  { %v2057_v33 = vadd.f32 %v3107_v61, %v5151_v18 }
 0x359   :  { %v2048_v40 = vpop.f32.mrf.mxu0 }
 0x35a   :  { %v2049_v10 = vadd.f32 %v5151_v18, %v2048_v40  ;;  %v2117_v50 = vmax.f32 %v2057_v33, 0.0 }
 0x35b   :  { %v3108_v59 = vpop.f32.mrf.mxu0 }
 0x35c   :  { %v2115_v13 = vmax.f32 %v2049_v10, 0.0  ;;  %v2060_v28 = vadd.f32 %v3108_v59, %v5151_v18 }
 0x35d   :  { %v2051_v56 = vpop.f32.mrf.mxu0 }
 0x35e   :  { %v2052_v60 = vadd.f32 %v5151_v18, %v2051_v56  ;;  %3179 = vmatprep.mubr.f32.mxu1 %v2115_v13  ;;  %v2118_v35 = vmax.f32 %v2060_v28, 0.0 }
 0x360   :  { %v2116_v51 = vmax.f32 %v2052_v60, 0.0 }
 0x362   :  { %3180 = vmatmul.mubr.f32.gmra.mxu1 %v2116_v51 }
 0x363   :  { %3182 = vmatprep.mubr.f32.mxu1 %v2117_v50 }
 0x366   :  { %3183 = vmatmul.mubr.f32.gmra.mxu1 %v2118_v35 }
 0x36e   :  { %v3151_v44 = vpop.f32.mrf.mxu1 }
 0x36f   :  { %v5425_v24 = vadd.f32 %v3151_v44, %v5422_v52 }
 0x370   :  { %v2216_v34 = vpop.f32.mrf.mxu1 }
 0x371   :  { %v5428_v27 = vadd.f32 %v5422_v52, %v2216_v34  ;;  %2377 = vmax.xlane.f32.xlu0 %v5425_v24 }
 0x372   :  { %v3154_v1 = vpop.f32.mrf.mxu1 }
 0x373   :  { %2375 = vmax.xlane.f32.xlu1 %v5428_v27  ;;  %v5433_v15 = vadd.f32 %v3154_v1, %v5422_v52 }
 0x374   :  { %v2226_v48 = vpop.f32.mrf.mxu1 }
 0x375   :  { %v5436_v8 = vadd.f32 %v5422_v52, %v2226_v48 }
 0x376   :  { %v3157_v30 = vpop.f32.mrf.mxu1 }
 0x377   :  { %2379 = vmax.xlane.f32.xlu0 %v5436_v8  ;;  %2381 = vmax.xlane.f32.xlu1 %v5433_v15  ;;  %v5441_v14 = vadd.f32 %v3157_v30, %v5422_v52 }
 0x378   :  { %v2236_v20 = vpop.f32.mrf.mxu1 }
 0x379   :  { %v5444_v45 = vadd.f32 %v5422_v52, %v2236_v20 }
 0x37a   :  { %v3160_v46 = vpop.f32.mrf.mxu1 }
 0x37b   :  { %2385 = vmax.xlane.f32.xlu1 %v5441_v14  ;;  %2383 = vmax.xlane.f32.xlu0 %v5444_v45  ;;  %v5449_v57 = vadd.f32 %v3160_v46, %v5422_v52 }
 0x37c   :  { %v2246_v36 = vpop.f32.mrf.mxu1 }
 0x37d   :  { %v5452_v62 = vadd.f32 %v5422_v52, %v2246_v36 }
 0x37f   :  { %2389 = vmax.xlane.f32.xlu1 %v5449_v57  ;;  %2387 = vmax.xlane.f32.xlu0 %v5452_v62 }
 0x38e   :  { %v3111_v49 = vpop.f32.mrf.mxu0 }
 0x38f   :  { %v2073_v43 = vadd.f32 %v3111_v49, %v5151_v18 }
 0x390   :  { %v2064_v37 = vpop.f32.mrf.mxu0 }
 0x391   :  { %v2065_v53 = vadd.f32 %v5151_v18, %v2064_v37  ;;  %v2121_v38 = vmax.f32 %v2073_v43, 0.0 }
 0x392   :  { %v3112_v41 = vpop.f32.mrf.mxu0 }
 0x393   :  { %v2119_v21 = vmax.f32 %v2065_v53, 0.0  ;;  %v2076_v54 = vadd.f32 %v3112_v41, %v5151_v18 }
 0x394   :  { %v2067_v4 = vpop.f32.mrf.mxu0 }
 0x395   :  { %v2068_v25 = vadd.f32 %v5151_v18, %v2067_v4  ;;  %3185 = vmatprep.mubr.f32.mxu1 %v2119_v21  ;;  %v2122_v42 = vmax.f32 %v2076_v54, 0.0 }
 0x397   :  { %v2120_v19 = vmax.f32 %v2068_v25, 0.0 }
 0x399   :  { %3186 = vmatmul.mubr.f32.gmra.mxu1 %v2120_v19 }
 0x39a   :  { %3188 = vmatprep.mubr.f32.mxu1 %v2121_v38 }
 0x39d   :  { %3189 = vmatmul.mubr.f32.gmra.mxu1 %v2122_v42 }
 0x3a2   :  { %v3163_v2 = vpop.f32.mrf.mxu1 }
 0x3a3   :  { %v5461_v26 = vadd.f32 %v3163_v2, %v5422_v52 }
 0x3a4   :  { %v2256_v23 = vpop.f32.mrf.mxu1 }
 0x3a5   :  { %v5464_v55 = vadd.f32 %v5422_v52, %v2256_v23  ;;  %2393 = vmax.xlane.f32.xlu1 %v5461_v26 }
 0x3a6   :  { %v3166_v31 = vpop.f32.mrf.mxu1 }
 0x3a7   :  { %v5468_v6 = vadd.f32 %v3166_v31, %v5422_v52  ;;  %2391 = vmax.xlane.f32.xlu0 %v5464_v55 }
 0x3a8   :  { %v2266_v63 = vpop.f32.mrf.mxu1 }
 0x3a9   :  { %v5472_v22 = vadd.f32 %v5422_v52, %v2266_v63  ;;  %2397 = vmax.xlane.f32.xlu1 %v5468_v6 }
 0x3ab   :  { %2395 = vmax.xlane.f32.xlu0 %v5472_v22 }
 0x3b0   :  { %v3169_v12 = vpop.f32.mrf.mxu1 }
 0x3b1   :  { %v5477_v39 = vadd.f32 %v3169_v12, %v5422_v52 }
 0x3b2   :  { %v2276_v16 = vpop.f32.mrf.mxu1 }
 0x3b3   :  { %v5480_v0 = vadd.f32 %v5422_v52, %v2276_v16  ;;  %2401 = vmax.xlane.f32.xlu1 %v5477_v39 }
 0x3b4   :  { %v3172_v17 = vpop.f32.mrf.mxu1 }
 0x3b5   :  { %v5484_v5 = vadd.f32 %v3172_v17, %v5422_v52  ;;  %2399 = vmax.xlane.f32.xlu0 %v5480_v0 }
 0x3b6   :  { %v2286_v32 = vpop.f32.mrf.mxu1 }
 0x3b7   :  { %v5488_v47 = vadd.f32 %v5422_v52, %v2286_v32  ;;  %2405 = vmax.xlane.f32.xlu1 %v5484_v5 }
 0x3b9   :  { %2403 = vmax.xlane.f32.xlu0 %v5488_v47 }
 0x3ba   :  { %v3115_v3 = vpop.f32.mrf.mxu0 }
 0x3bb   :  { %v2089_v58 = vadd.f32 %v3115_v3, %v5151_v18 }
 0x3bc   :  { %v2080_v7 = vpop.f32.mrf.mxu0 }
 0x3bd   :  { %v2081_v9 = vadd.f32 %v5151_v18, %v2080_v7  ;;  %v2125_v13 = vmax.f32 %v2089_v58, 0.0 }
 0x3be   :  { %v3116_v29 = vpop.f32.mrf.mxu0 }
 0x3bf   :  { %v2123_v11 = vmax.f32 %v2081_v9, 0.0  ;;  %v2092_v10 = vadd.f32 %v3116_v29, %v5151_v18 }
 0x3c0   :  { %v2083_v61 = vpop.f32.mrf.mxu0 }
 0x3c1   :  { %v2084_v40 = vadd.f32 %v5151_v18, %v2083_v61  ;;  %3191 = vmatprep.mubr.f32.mxu1 %v2123_v11  ;;  %v2126_v33 = vmax.f32 %v2092_v10, 0.0 }
 0x3c3   :  { %v2124_v59 = vmax.f32 %v2084_v40, 0.0 }
 0x3c5   :  { %3192 = vmatmul.mubr.f32.gmra.mxu1 %v2124_v59 }
 0x3c6   :  { %3194 = vmatprep.mubr.f32.mxu1 %v2125_v13 }
 0x3c9   :  { %3195 = vmatmul.mubr.f32.gmra.mxu1 %v2126_v33 }
 0x3e7   :  { %v3175_v56 = vpop.f32.mrf.mxu1 }
 0x3e8   :  { %v5497_v60 = vadd.f32 %v3175_v56, %v5422_v52 }
 0x3e9   :  { %v2296_v28 = vpop.f32.mrf.mxu1 }
 0x3ea   :  { %v5500_v51 = vadd.f32 %v5422_v52, %v2296_v28  ;;  %2409 = vmax.xlane.f32.xlu1 %v5497_v60 }
 0x3eb   :  { %v3178_v50 = vpop.f32.mrf.mxu1 }
 0x3ec   :  { %v5504_v35 = vadd.f32 %v3178_v50, %v5422_v52  ;;  %2407 = vmax.xlane.f32.xlu0 %v5500_v51 }
 0x3ed   :  { %v2306_v18 = vpop.f32.mrf.mxu1 }
 0x3ee   :  { %v5508_v44 = vadd.f32 %v5422_v52, %v2306_v18  ;;  %2413 = vmax.xlane.f32.xlu1 %v5504_v35 }
 0x3f0   :  { %2411 = vmax.xlane.f32.xlu0 %v5508_v44 }
 0x3fa   :  { %v2378_v38 = vpop.xlane.xlu0 %2377 }
 0x3fb   :  { %v5545_v63 = vsub.f32 %v5425_v24, %v2378_v38 }
 0x3fc   :  { %v2376_v19 = vpop.xlane.xlu1 %2375 }
 0x3fd   :  { %v5548_v12 = vsub.f32 %v5428_v27, %v2376_v19  ;;  %v2473_v17 = vmul.f32 1.442695, %v5545_v63 }
 0x3ff   :  { %v2471_v7 = vmul.f32 1.442695, %v5548_v12  ;;  %3271 = vpow2.f32 %v2473_v17 }
 0x400   :  { %v2382_v42 = vpop.xlane.xlu1 %2381  ;;  %v2380_v2 = vpop.xlane.xlu0 %2379 }
 0x401   :  { %v5552_v32 = vsub.f32 %v5433_v15, %v2382_v42  ;;  %v5556_v9 = vsub.f32 %v5436_v8, %v2380_v2  ;;  %3273 = vpow2.f32 %v2471_v7 }
 0x403   :  { %v2477_v24 = vmul.f32 1.442695, %v5552_v32  ;;  %v2475_v58 = vmul.f32 1.442695, %v5556_v9 }
 0x404   :  { %v2386_v23 = vpop.xlane.xlu1 %2385  ;;  %v2384_v31 = vpop.xlane.xlu0 %2383 }
 0x405   :  { %v5560_v11 = vsub.f32 %v5441_v14, %v2386_v23  ;;  %v5564_v15 = vsub.f32 %v5444_v45, %v2384_v31  ;;  %3275 = vpow2.f32 %v2477_v24 }
 0x406   :  { %3277 = vpow2.f32 %v2475_v58 }
 0x407   :  { %v2481_v40 = vmul.f32 1.442695, %v5560_v11  ;;  %v2479_v13 = vmul.f32 1.442695, %v5564_v15 }
 0x408   :  { %v2390_v16 = vpop.xlane.xlu1 %2389  ;;  %v2388_v3 = vpop.xlane.xlu0 %2387 }
 0x409   :  { %v5568_v8 = vsub.f32 %v5449_v57, %v2390_v16  ;;  %v5575_v33 = vsub.f32 %v5452_v62, %v2388_v3  ;;  %3279 = vpow2.f32 %v2481_v40 }
 0x40a   :  { %3281 = vpow2.f32 %v2479_v13 }
 0x40b   :  { %v2485_v57 = vmul.f32 1.442695, %v5568_v8 }
 0x40d   :  { %3283 = vpow2.f32 %v2485_v57 }
 0x422   :  { %v3181_v34 = vpop.f32.mrf.mxu1 }
 0x423   :  { %v5513_v1 = vadd.f32 %v3181_v34, %v5422_v52 }
 0x424   :  { %v2316_v48 = vpop.f32.mrf.mxu1 }
 0x425   :  { %v5516_v30 = vadd.f32 %v5422_v52, %v2316_v48  ;;  %2417 = vmax.xlane.f32.xlu1 %v5513_v1  ;;  %v2483_v48 = vmul.f32 1.442695, %v5575_v33 }
 0x426   :  { %v3184_v20 = vpop.f32.mrf.mxu1 }
 0x427   :  { %v5520_v46 = vadd.f32 %v3184_v20, %v5422_v52  ;;  %2415 = vmax.xlane.f32.xlu0 %v5516_v30  ;;  %3285 = vpow2.f32 %v2483_v48 }
 0x428   :  { %v2326_v36 = vpop.f32.mrf.mxu1 }
 0x429   :  { %v5524_v49 = vadd.f32 %v5422_v52, %v2326_v36  ;;  %2421 = vmax.xlane.f32.xlu1 %v5520_v46 }
 0x42b   :  { %2419 = vmax.xlane.f32.xlu0 %v5524_v49 }
 0x42e   :  { %v2394_v29 = vpop.xlane.xlu1 %2393 }
 0x42f   :  { %v5583_v50 = vsub.f32 %v5461_v26, %v2394_v29 }
 0x430   :  { %v2392_v27 = vpop.xlane.xlu0 %2391 }
 0x431   :  { %v5591_v20 = vsub.f32 %v5464_v55, %v2392_v27 }
 0x432   :  { %v2398_v59 = vpop.xlane.xlu1 %2397 }
 0x434   :  { %v2396_v56 = vpop.xlane.xlu0 %2395 }
 0x435   :  { %v5604_v55 = vsub.f32 %v5472_v22, %v2396_v56 }
 0x437   :  { %v2491_v23 = vmul.f32 1.442695, %v5604_v55 }
 0x43c   :  { %v2402_v62 = vpop.xlane.xlu1 %2401 }
 0x43d   :  { %v5608_v42 = vsub.f32 %v5477_v39, %v2402_v62 }
 0x43e   :  { %v2400_v26 = vpop.xlane.xlu0 %2399 }
 0x43f   :  { %v5612_v31 = vsub.f32 %v5480_v0, %v2400_v26  ;;  %v2497_v17 = vmul.f32 1.442695, %v5608_v42 }
 0x440   :  { %v2406_v19 = vpop.xlane.xlu1 %2405 }
 0x441   :  { %v5616_v3 = vsub.f32 %v5484_v5, %v2406_v19  ;;  %v2495_v29 = vmul.f32 1.442695, %v5612_v31 }
 0x442   :  { %v2404_v2 = vpop.xlane.xlu0 %2403 }
 0x443   :  { %v5620_v24 = vsub.f32 %v5488_v47, %v2404_v2  ;;  %v2501_v27 = vmul.f32 1.442695, %v5616_v3 }
 0x445   :  { %v2499_v40 = vmul.f32 1.442695, %v5620_v24 }
 0x459   :  { %v3187_v37 = vpop.f32.mrf.mxu1 }
 0x45a   :  { %v5529_v53 = vadd.f32 %v3187_v37, %v5422_v52  ;;  %v2489_v37 = vmul.f32 1.442695, %v5583_v50 }
 0x45b   :  { %v2336_v41 = vpop.f32.mrf.mxu1 }
 0x45c   :  { %v5532_v21 = vadd.f32 %v5422_v52, %v2336_v41  ;;  %2425 = vmax.xlane.f32.xlu1 %v5529_v53  ;;  %v5599_v41 = vsub.f32 %v5468_v6, %v2398_v59  ;;  %3287 = vpow2.f32 %v2489_v37 }
 0x45d   :  { %v3190_v43 = vpop.f32.mrf.mxu1 }
 0x45e   :  { %v5536_v4 = vadd.f32 %v3190_v43, %v5422_v52  ;;  %2423 = vmax.xlane.f32.xlu0 %v5532_v21  ;;  %v3272_v43 = vpop.eup %3271  ;;  %v2493_v38 = vmul.f32 1.442695, %v5599_v41 }
 0x45f   :  { %v2346_v25 = vpop.f32.mrf.mxu1 }
 0x460   :  { %v5540_v54 = vadd.f32 %v5422_v52, %v2346_v25  ;;  %2429 = vmax.xlane.f32.xlu1 %v5536_v4  ;;  %v2487_v25 = vmul.f32 1.442695, %v5591_v20 }
 0x462   :  { %2427 = vmax.xlane.f32.xlu0 %v5540_v54  ;;  %3289 = vpow2.f32 %v2487_v25 }
 0x463   :  { %3291 = vpow2.f32 %v2493_v38 }
 0x464   :  { %3293 = vpow2.f32 %v2491_v23 }
 0x465   :  { %3295 = vpow2.f32 %v2497_v17 }
 0x466   :  { %3297 = vpow2.f32 %v2495_v29 }
 0x467   :  { %3299 = vpow2.f32 %v2501_v27 }
 0x468   :  { %3301 = vpow2.f32 %v2499_v40 }
 0x473   :  { %v2410_v16 = vpop.xlane.xlu1 %2409 }
 0x474   :  { %v5624_v58 = vsub.f32 %v5497_v60, %v2410_v16 }
 0x475   :  { %v2408_v7 = vpop.xlane.xlu0 %2407 }
 0x476   :  { %v5628_v59 = vsub.f32 %v5500_v51, %v2408_v7  ;;  %v2505_v13 = vmul.f32 1.442695, %v5624_v58 }
 0x478   :  { %3303 = vpow2.f32 %v2505_v13 }
 0x485   :  { %v3193_v61 = vpop.f32.mrf.mxu1 }
 0x486   :  { %v5571_v10 = vadd.f32 %v3193_v61, %v5422_v52  ;;  %v2414_v61 = vpop.xlane.xlu1 %2413 }
 0x487   :  { %v2356_v14 = vpop.f32.mrf.mxu1  ;;  %v5632_v56 = vsub.f32 %v5504_v35, %v2414_v61 }
 0x488   :  { %v5578_v45 = vadd.f32 %v5422_v52, %v2356_v14  ;;  %2433 = vmax.xlane.f32.xlu1 %v5571_v10  ;;  %v2412_v14 = vpop.xlane.xlu0 %2411 }
 0x489   :  { %v3196_v28 = vpop.f32.mrf.mxu1  ;;  %v5636_v57 = vsub.f32 %v5508_v44, %v2412_v14  ;;  %v2509_v62 = vmul.f32 1.442695, %v5632_v56 }
 0x48a   :  { %v5586_v18 = vadd.f32 %v3196_v28, %v5422_v52  ;;  %2431 = vmax.xlane.f32.xlu0 %v5578_v45  ;;  %v2503_v28 = vmul.f32 1.442695, %v5628_v59 }
 0x48b   :  { %v2366_v34 = vpop.f32.mrf.mxu1  ;;  %v2507_v48 = vmul.f32 1.442695, %v5636_v57 }
 0x48c   :  { %v5594_v36 = vadd.f32 %v5422_v52, %v2366_v34  ;;  %2437 = vmax.xlane.f32.xlu1 %v5586_v18  ;;  %v3274_v52 = vpop.eup %3273  ;;  %3305 = vpow2.f32 %v2503_v28 }
 0x48d   :  { %v3276_v6 = vpop.eup %3275  ;;  %3307 = vpow2.f32 %v2509_v62 }
 0x48e   :  { %2435 = vmax.xlane.f32.xlu0 %v5594_v36  ;;  %v3278_v22 = vpop.eup %3277  ;;  %3309 = vpow2.f32 %v2507_v48 }
 0x48f   :  { %v3280_v39 = vpop.eup %3279 }
 0x490   :  { %2537 = vadd.xlane.f32.xlu1 %v3272_v43  ;;  %v3282_v0 = vpop.eup %3281 }
 0x491   :  { %v3284_v5 = vpop.eup %3283 }
 0x492   :  { %2535 = vadd.xlane.f32.xlu0 %v3274_v52  ;;  %v3286_v47 = vpop.eup %3285 }
 0x493   :  { %v3288_v60 = vpop.eup %3287 }
 0x494   :  { %2541 = vadd.xlane.f32.xlu1 %v3276_v6  ;;  %v3290_v51 = vpop.eup %3289 }
 0x495   :  { %v3292_v34 = vpop.eup %3291 }
 0x496   :  { %2539 = vadd.xlane.f32.xlu0 %v3278_v22  ;;  %v3294_v35 = vpop.eup %3293 }
 0x497   :  { %v3296_v26 = vpop.eup %3295 }
 0x498   :  { %2545 = vadd.xlane.f32.xlu1 %v3280_v39  ;;  %v3298_v37 = vpop.eup %3297 }
 0x499   :  { %v3300_v44 = vpop.eup %3299 }
 0x49a   :  { %2543 = vadd.xlane.f32.xlu0 %v3282_v0  ;;  %v3302_v43 = vpop.eup %3301 }
 0x49b   :  { %v3304_v52 = vpop.eup %3303 }
 0x49c   :  { %2549 = vadd.xlane.f32.xlu1 %v3284_v5  ;;  %v3306_v6 = vpop.eup %3305 }
 0x49d   :  { %v3308_v16 = vpop.eup %3307 }
 0x49e   :  { %2547 = vadd.xlane.f32.xlu0 %v3286_v47  ;;  %v3310_v7 = vpop.eup %3309 }
 0x4a0   :  { %2553 = vadd.xlane.f32.xlu1 %v3288_v60 }
 0x4a2   :  { %2551 = vadd.xlane.f32.xlu0 %v3290_v51 }
 0x4a4   :  { %2557 = vadd.xlane.f32.xlu1 %v3292_v34 }
 0x4a6   :  { %2555 = vadd.xlane.f32.xlu0 %v3294_v35 }
 0x4a8   :  { %2561 = vadd.xlane.f32.xlu1 %v3296_v26 }
 0x4aa   :  { %2559 = vadd.xlane.f32.xlu0 %v3298_v37 }
 0x4ac   :  { %2565 = vadd.xlane.f32.xlu1 %v3300_v44 }
 0x4ae   :  { %v2418_v25 = vpop.xlane.xlu1 %2417  ;;  %2563 = vadd.xlane.f32.xlu0 %v3302_v43 }
 0x4af   :  { %v5641_v19 = vsub.f32 %v5513_v1, %v2418_v25 }
 0x4b0   :  { %2569 = vadd.xlane.f32.xlu1 %v3304_v52  ;;  %v2416_v38 = vpop.xlane.xlu0 %2415 }
 0x4b1   :  { %v2513_v2 = vmul.f32 1.442695, %v5641_v19  ;;  %v5645_v23 = vsub.f32 %v5516_v30, %v2416_v38 }
 0x4b2   :  { %v2422_v22 = vpop.xlane.xlu1 %2421  ;;  %2567 = vadd.xlane.f32.xlu0 %v3306_v6 }
 0x4b3   :  { %3311 = vpow2.f32 %v2513_v2  ;;  %v2511_v17 = vmul.f32 1.442695, %v5645_v23  ;;  %v5649_v39 = vsub.f32 %v5520_v46, %v2422_v22 }
 0x4b4   :  { %2573 = vadd.xlane.f32.xlu1 %v3308_v16  ;;  %v2420_v1 = vpop.xlane.xlu0 %2419 }
 0x4b5   :  { %3313 = vpow2.f32 %v2511_v17  ;;  %v2517_v29 = vmul.f32 1.442695, %v5649_v39  ;;  %v5653_v0 = vsub.f32 %v5524_v49, %v2420_v1 }
 0x4b6   :  { %2571 = vadd.xlane.f32.xlu0 %v3310_v7 }
 0x4b7   :  { %3315 = vpow2.f32 %v2517_v29  ;;  %v2515_v30 = vmul.f32 1.442695, %v5653_v0 }
 0x4b9   :  { %3317 = vpow2.f32 %v2515_v30 }
 0x4c0   :  { %v3312_v27 = vpop.eup %3311 }
 0x4c1   :  { %2577 = vadd.xlane.f32.xlu1 %v3312_v27 }
 0x4c2   :  { %v3314_v5 = vpop.eup %3313 }
 0x4c3   :  { %2575 = vadd.xlane.f32.xlu0 %v3314_v5 }
 0x4c4   :  { %v3316_v46 = vpop.eup %3315 }
 0x4c5   :  { %2581 = vadd.xlane.f32.xlu1 %v3316_v46 }
 0x4c6   :  { %v3318_v61 = vpop.eup %3317 }
 0x4c7   :  { %2579 = vadd.xlane.f32.xlu0 %v3318_v61 }
 0x4e5   :  { %v2426_v40 = vpop.xlane.xlu1 %2425 }
 0x4e6   :  { %v5657_v47 = vsub.f32 %v5529_v53, %v2426_v40 }
 0x4e7   :  { %v2424_v14 = vpop.xlane.xlu0 %2423 }
 0x4e8   :  { %v2521_v49 = vmul.f32 1.442695, %v5657_v47  ;;  %v5661_v13 = vsub.f32 %v5532_v21, %v2424_v14 }
 0x4e9   :  { %v2430_v60 = vpop.xlane.xlu1 %2429 }
 0x4ea   :  { %3319 = vpow2.f32 %v2521_v49  ;;  %v2519_v28 = vmul.f32 1.442695, %v5661_v13  ;;  %v5665_v51 = vsub.f32 %v5536_v4, %v2430_v60 }
 0x4eb   :  { %v2428_v62 = vpop.xlane.xlu0 %2427 }
 0x4ec   :  { %3321 = vpow2.f32 %v2519_v28  ;;  %v2525_v34 = vmul.f32 1.442695, %v5665_v51  ;;  %v5669_v53 = vsub.f32 %v5540_v54, %v2428_v62 }
 0x4ee   :  { %3323 = vpow2.f32 %v2525_v34  ;;  %v2523_v48 = vmul.f32 1.442695, %v5669_v53 }
 0x4f0   :  { %3325 = vpow2.f32 %v2523_v48 }
 0x4f7   :  { %v3320_v21 = vpop.eup %3319 }
 0x4f8   :  { %2585 = vadd.xlane.f32.xlu1 %v3320_v21 }
 0x4f9   :  { %v3322_v35 = vpop.eup %3321 }
 0x4fa   :  { %2583 = vadd.xlane.f32.xlu0 %v3322_v35 }
 0x4fb   :  { %v3324_v26 = vpop.eup %3323 }
 0x4fc   :  { %2589 = vadd.xlane.f32.xlu1 %v3324_v26 }
 0x4fd   :  { %v3326_v37 = vpop.eup %3325 }
 0x4fe   :  { %2587 = vadd.xlane.f32.xlu0 %v3326_v37 }
 0x511   :  { %v2434_v4 = vpop.xlane.xlu1 %2433 }
 0x512   :  { %v5673_v44 = vsub.f32 %v5571_v10, %v2434_v4 }
 0x513   :  { %v2432_v43 = vpop.xlane.xlu0 %2431 }
 0x514   :  { %v2529_v54 = vmul.f32 1.442695, %v5673_v44  ;;  %v5677_v25 = vsub.f32 %v5578_v45, %v2432_v43 }
 0x515   :  { %v2438_v52 = vpop.xlane.xlu1 %2437 }
 0x516   :  { %3327 = vpow2.f32 %v2529_v54  ;;  %v2527_v38 = vmul.f32 1.442695, %v5677_v25  ;;  %v5681_v6 = vsub.f32 %v5586_v18, %v2438_v52 }
 0x517   :  { %v2436_v2 = vpop.xlane.xlu0 %2435 }
 0x518   :  { %3329 = vpow2.f32 %v2527_v38  ;;  %v2533_v22 = vmul.f32 1.442695, %v5681_v6  ;;  %v5685_v10 = vsub.f32 %v5594_v36, %v2436_v2 }
 0x519   :  { %v2538_v16 = vpop.xlane.xlu1 %2537 }
 0x51a   :  { %3331 = vpow2.f32 %v2533_v22  ;;  %v2531_v17 = vmul.f32 1.442695, %v5685_v10 }
 0x51b   :  { %3333 = vlog2.f32 %v2538_v16  ;;  %v2536_v45 = vpop.xlane.xlu0 %2535 }
 0x51c   :  { %3335 = vpow2.f32 %v2531_v17 }
 0x51d   :  { %3337 = vlog2.f32 %v2536_v45  ;;  %v2542_v1 = vpop.xlane.xlu1 %2541 }
 0x51e   :  { %3339 = vlog2.f32 %v2542_v1 }
 0x51f   :  { %v2540_v7 = vpop.xlane.xlu0 %2539 }
 0x520   :  { %3341 = vlog2.f32 %v2540_v7 }
 0x521   :  { %v2546_v18 = vpop.xlane.xlu1 %2545 }
 0x522   :  { %3343 = vlog2.f32 %v2546_v18 }
 0x523   :  { %v3328_v29 = vpop.eup %3327  ;;  %v2544_v30 = vpop.xlane.xlu0 %2543 }
 0x524   :  { %3345 = vlog2.f32 %v2544_v30  ;;  %2593 = vadd.xlane.f32.xlu1 %v3328_v29 }
 0x525   :  { %v3330_v36 = vpop.eup %3329  ;;  %v2550_v27 = vpop.xlane.xlu1 %2549 }
 0x526   :  { %3347 = vlog2.f32 %v2550_v27  ;;  %2591 = vadd.xlane.f32.xlu0 %v3330_v36 }
 0x527   :  { %v3332_v5 = vpop.eup %3331  ;;  %v2548_v46 = vpop.xlane.xlu0 %2547 }
 0x528   :  { %v3334_v61 = vpop.eup %3333  ;;  %3349 = vlog2.f32 %v2548_v46  ;;  %2597 = vadd.xlane.f32.xlu1 %v3332_v5 }
 0x529   :  { %v3336_v40 = vpop.eup %3335  ;;  %v2602_v14 = vmul.f32 0.6931472, %v3334_v61  ;;  %v2554_v49 = vpop.xlane.xlu1 %2553 }
 0x52a   :  { %v3338_v60 = vpop.eup %3337  ;;  %3351 = vlog2.f32 %v2554_v49  ;;  %2595 = vadd.xlane.f32.xlu0 %v3336_v40 }
 0x52b   :  { %v3340_v28 = vpop.eup %3339  ;;  %v2664_v62 = vsub.f32 %v5545_v63, %v2602_v14  ;;  %v2600_v34 = vmul.f32 0.6931472, %v3338_v60  ;;  %v2552_v48 = vpop.xlane.xlu0 %2551 }
 0x52c   :  { %v2606_v21 = vmul.f32 0.6931472, %v3340_v28  ;;  %3353 = vlog2.f32 %v2552_v48 }
 0x52d   :  { %v3342_v35 = vpop.eup %3341  ;;  %2696 = vst [vmem:[%s5821_s5 + $0x8] sm:$0xff] %v2664_v62  ;;  %v2663_v26 = vsub.f32 %v5548_v12, %v2600_v34  ;;  %v2558_v37 = vpop.xlane.xlu1 %2557 }
 0x52e   :  { %v2666_v4 = vsub.f32 %v5552_v32, %v2606_v21  ;;  %v2604_v43 = vmul.f32 0.6931472, %v3342_v35  ;;  %3355 = vlog2.f32 %v2558_v37 }
 0x52f   :  { %v3344_v54 = vpop.eup %3343  ;;  %2695 = vst [vmem:[%s5821_s5] sm:$0xff] %v2663_v26  ;;  %v2556_v63 = vpop.xlane.xlu0 %2555 }
 0x530   :  { %2698 = vst [vmem:[%s5821_s5 + $0x18] sm:$0xff] %v2666_v4  ;;  %v2665_v52 = vsub.f32 %v5556_v9, %v2604_v43  ;;  %v2610_v38 = vmul.f32 0.6931472, %v3344_v54  ;;  %3357 = vlog2.f32 %v2556_v63 }
 0x531   :  { %v3346_v12 = vpop.eup %3345  ;;  %v2562_v2 = vpop.xlane.xlu1 %2561 }
 0x532   :  { %2697 = vst [vmem:[%s5821_s5 + $0x10] sm:$0xff] %v2665_v52  ;;  %v2668_v32 = vsub.f32 %v5560_v11, %v2610_v38  ;;  %v2608_v22 = vmul.f32 0.6931472, %v3346_v12  ;;  %3359 = vlog2.f32 %v2562_v2 }
 0x533   :  { %v3348_v16 = vpop.eup %3347  ;;  %v2560_v17 = vpop.xlane.xlu0 %2559 }
 0x534   :  { %2700 = vst [vmem:[%s5821_s5 + $0x28] sm:$0xff] %v2668_v32  ;;  %v2667_v9 = vsub.f32 %v5564_v15, %v2608_v22  ;;  %v2614_v45 = vmul.f32 0.6931472, %v3348_v16  ;;  %3361 = vlog2.f32 %v2560_v17 }
 0x535   :  { %v3350_v1 = vpop.eup %3349  ;;  %v2566_v7 = vpop.xlane.xlu1 %2565 }
 0x536   :  { %2699 = vst [vmem:[%s5821_s5 + $0x20] sm:$0xff] %v2667_v9  ;;  %v2670_v11 = vsub.f32 %v5568_v8, %v2614_v45  ;;  %v2612_v18 = vmul.f32 0.6931472, %v3350_v1  ;;  %3363 = vlog2.f32 %v2566_v7 }
 0x537   :  { %v3352_v29 = vpop.eup %3351  ;;  %v2564_v30 = vpop.xlane.xlu0 %2563 }
 0x538   :  { %2702 = vst [vmem:[%s5821_s5 + $0x38] sm:$0xff] %v2670_v11  ;;  %v2669_v15 = vsub.f32 %v5575_v33, %v2612_v18  ;;  %v2618_v36 = vmul.f32 0.6931472, %v3352_v29  ;;  %3365 = vlog2.f32 %v2564_v30 }
 0x539   :  { %v3354_v27 = vpop.eup %3353  ;;  %v2570_v5 = vpop.xlane.xlu1 %2569 }
 0x53a   :  { %2701 = vst [vmem:[%s5821_s5 + $0x30] sm:$0xff] %v2669_v15  ;;  %v2672_v8 = vsub.f32 %v5583_v50, %v2618_v36  ;;  %v2616_v46 = vmul.f32 0.6931472, %v3354_v27  ;;  %3367 = vlog2.f32 %v2570_v5 }
 0x53b   :  { %v3356_v61 = vpop.eup %3355  ;;  %v2568_v40 = vpop.xlane.xlu0 %2567 }
 0x53c   :  { %2704 = vst [vmem:[%s5821_s5 + $0x48] sm:$0xff] %v2672_v8  ;;  %v2671_v33 = vsub.f32 %v5591_v20, %v2616_v46  ;;  %v2622_v14 = vmul.f32 0.6931472, %v3356_v61  ;;  %3369 = vlog2.f32 %v2568_v40 }
 0x53d   :  { %v3358_v49 = vpop.eup %3357  ;;  %v2574_v60 = vpop.xlane.xlu1 %2573 }
 0x53e   :  { %2703 = vst [vmem:[%s5821_s5 + $0x40] sm:$0xff] %v2671_v33  ;;  %v2674_v50 = vsub.f32 %v5599_v41, %v2622_v14  ;;  %v2620_v28 = vmul.f32 0.6931472, %v3358_v49  ;;  %3371 = vlog2.f32 %v2574_v60 }
 0x53f   :  { %v3360_v62 = vpop.eup %3359  ;;  %v2572_v34 = vpop.xlane.xlu0 %2571 }
 0x540   :  { %2706 = vst [vmem:[%s5821_s5 + $0x58] sm:$0xff] %v2674_v50  ;;  %v2673_v20 = vsub.f32 %v5604_v55, %v2620_v28  ;;  %v2626_v48 = vmul.f32 0.6931472, %v3360_v62  ;;  %3373 = vlog2.f32 %v2572_v34 }
 0x541   :  { %v3362_v21 = vpop.eup %3361 }
 0x542   :  { %2705 = vst [vmem:[%s5821_s5 + $0x50] sm:$0xff] %v2673_v20  ;;  %v2676_v35 = vsub.f32 %v5608_v42, %v2626_v48  ;;  %v2624_v41 = vmul.f32 0.6931472, %v3362_v21 }
 0x543   :  { %v3364_v26 = vpop.eup %3363 }
 0x544   :  { %2708 = vst [vmem:[%s5821_s5 + $0x68] sm:$0xff] %v2676_v35  ;;  %v2675_v37 = vsub.f32 %v5612_v31, %v2624_v41  ;;  %v2630_v4 = vmul.f32 0.6931472, %v3364_v26 }
 0x545   :  { %v3366_v43 = vpop.eup %3365 }
 0x546   :  { %2707 = vst [vmem:[%s5821_s5 + $0x60] sm:$0xff] %v2675_v37  ;;  %v2678_v55 = vsub.f32 %v5616_v3, %v2630_v4  ;;  %v2628_v54 = vmul.f32 0.6931472, %v3366_v43 }
 0x547   :  { %v3368_v63 = vpop.eup %3367 }
 0x548   :  { %2710 = vst [vmem:[%s5821_s5 + $0x78] sm:$0xff] %v2678_v55  ;;  %v2677_v42 = vsub.f32 %v5620_v24, %v2628_v54  ;;  %v2634_v52 = vmul.f32 0.6931472, %v3368_v63 }
 0x549   :  { %v3370_v38 = vpop.eup %3369 }
 0x54a   :  { %2709 = vst [vmem:[%s5821_s5 + $0x70] sm:$0xff] %v2677_v42  ;;  %v2680_v31 = vsub.f32 %v5624_v58, %v2634_v52  ;;  %v2632_v12 = vmul.f32 0.6931472, %v3370_v38  ;;  %v2578_v2 = vpop.xlane.xlu1 %2577 }
 0x54b   :  { %v3372_v32 = vpop.eup %3371  ;;  %3375 = vlog2.f32 %v2578_v2 }
 0x54c   :  { %2712 = vst [vmem:[%s5821_s5 + $0x88] sm:$0xff] %v2680_v31  ;;  %v2679_v3 = vsub.f32 %v5628_v59, %v2632_v12  ;;  %v2638_v22 = vmul.f32 0.6931472, %v3372_v32  ;;  %v2576_v24 = vpop.xlane.xlu0 %2575 }
 0x54d   :  { %v3374_v16 = vpop.eup %3373  ;;  %3377 = vlog2.f32 %v2576_v24 }
 0x54e   :  { %2711 = vst [vmem:[%s5821_s5 + $0x80] sm:$0xff] %v2679_v3  ;;  %v2682_v58 = vsub.f32 %v5632_v56, %v2638_v22  ;;  %v2636_v17 = vmul.f32 0.6931472, %v3374_v16  ;;  %v2582_v9 = vpop.xlane.xlu1 %2581 }
 0x54f   :  { %3379 = vlog2.f32 %v2582_v9 }
 0x550   :  { %2714 = vst [vmem:[%s5821_s5 + $0x98] sm:$0xff] %v2682_v58  ;;  %v2681_v45 = vsub.f32 %v5636_v57, %v2636_v17  ;;  %v2580_v59 = vpop.xlane.xlu0 %2579 }
 0x551   :  { %3381 = vlog2.f32 %v2580_v59 }
 0x552   :  { %2713 = vst [vmem:[%s5821_s5 + $0x90] sm:$0xff] %v2681_v45 }
 0x558   :  { %v3376_v1 = vpop.eup %3375 }
 0x559   :  { %v2642_v7 = vmul.f32 0.6931472, %v3376_v1 }
 0x55a   :  { %v3378_v11 = vpop.eup %3377 }
 0x55b   :  { %v2684_v56 = vsub.f32 %v5641_v19, %v2642_v7  ;;  %v2640_v18 = vmul.f32 0.6931472, %v3378_v11 }
 0x55c   :  { %v3380_v29 = vpop.eup %3379 }
 0x55d   :  { %2716 = vst [vmem:[%s5821_s5 + $0xa8] sm:$0xff] %v2684_v56  ;;  %v2683_v30 = vsub.f32 %v5645_v23, %v2640_v18  ;;  %v2646_v57 = vmul.f32 0.6931472, %v3380_v29 }
 0x55e   :  { %v3382_v15 = vpop.eup %3381 }
 0x55f   :  { %2715 = vst [vmem:[%s5821_s5 + $0xa0] sm:$0xff] %v2683_v30  ;;  %v2686_v36 = vsub.f32 %v5649_v39, %v2646_v57  ;;  %v2644_v27 = vmul.f32 0.6931472, %v3382_v15 }
 0x561   :  { %2718 = vst [vmem:[%s5821_s5 + $0xb8] sm:$0xff] %v2686_v36  ;;  %v2685_v19 = vsub.f32 %v5653_v0, %v2644_v27 }
 0x563   :  { %2717 = vst [vmem:[%s5821_s5 + $0xb0] sm:$0xff] %v2685_v19 }
 0x581   :  { %v2586_v23 = vpop.xlane.xlu1 %2585 }
 0x582   :  { %3383 = vlog2.f32 %v2586_v23 }
 0x583   :  { %v2584_v5 = vpop.xlane.xlu0 %2583 }
 0x584   :  { %3385 = vlog2.f32 %v2584_v5 }
 0x585   :  { %v2590_v8 = vpop.xlane.xlu1 %2589 }
 0x586   :  { %3387 = vlog2.f32 %v2590_v8 }
 0x587   :  { %v2588_v46 = vpop.xlane.xlu0 %2587 }
 0x588   :  { %3389 = vlog2.f32 %v2588_v46 }
 0x58f   :  { %v3384_v39 = vpop.eup %3383 }
 0x590   :  { %v2650_v61 = vmul.f32 0.6931472, %v3384_v39 }
 0x591   :  { %v3386_v40 = vpop.eup %3385 }
 0x592   :  { %v2688_v33 = vsub.f32 %v5657_v47, %v2650_v61  ;;  %v2648_v14 = vmul.f32 0.6931472, %v3386_v40 }
 0x593   :  { %v3388_v49 = vpop.eup %3387 }
 0x594   :  { %2720 = vst [vmem:[%s5821_s5 + $0xc8] sm:$0xff] %v2688_v33  ;;  %v2687_v0 = vsub.f32 %v5661_v13, %v2648_v14  ;;  %v2654_v60 = vmul.f32 0.6931472, %v3388_v49 }
 0x595   :  { %v3390_v50 = vpop.eup %3389 }
 0x596   :  { %2719 = vst [vmem:[%s5821_s5 + $0xc0] sm:$0xff] %v2687_v0  ;;  %v2690_v28 = vsub.f32 %v5665_v51, %v2654_v60  ;;  %v2652_v62 = vmul.f32 0.6931472, %v3390_v50 }
 0x598   :  { %2722 = vst [vmem:[%s5821_s5 + $0xd8] sm:$0xff] %v2690_v28  ;;  %v2689_v47 = vsub.f32 %v5669_v53, %v2652_v62 }
 0x59a   :  { %2721 = vst [vmem:[%s5821_s5 + $0xd0] sm:$0xff] %v2689_v47 }
 0x5ad   :  { %v2594_v13 = vpop.xlane.xlu1 %2593 }
 0x5ae   :  { %3391 = vlog2.f32 %v2594_v13 }
 0x5af   :  { %v2592_v34 = vpop.xlane.xlu0 %2591 }
 0x5b0   :  { %3393 = vlog2.f32 %v2592_v34 }
 0x5b1   :  { %v2598_v20 = vpop.xlane.xlu1 %2597 }
 0x5b2   :  { %3395 = vlog2.f32 %v2598_v20 }
 0x5b3   :  { %v2596_v48 = vpop.xlane.xlu0 %2595 }
 0x5b4   :  { %3397 = vlog2.f32 %v2596_v48 }
 0x5bb   :  { %v3392_v51 = vpop.eup %3391 }
 0x5bc   :  { %v2658_v21 = vmul.f32 0.6931472, %v3392_v51 }
 0x5bd   :  { %v3394_v35 = vpop.eup %3393 }
 0x5be   :  { %v2692_v41 = vsub.f32 %v5673_v44, %v2658_v21  ;;  %v2656_v26 = vmul.f32 0.6931472, %v3394_v35 }
 0x5bf   :  { %v3396_v37 = vpop.eup %3395 }
 0x5c0   :  { %2724 = vst [vmem:[%s5821_s5 + $0xe8] sm:$0xff] %v2692_v41  ;;  %v2691_v53 = vsub.f32 %v5677_v25, %v2656_v26  ;;  %v2662_v4 = vmul.f32 0.6931472, %v3396_v37 }
 0x5c1   :  { %v3398_v43 = vpop.eup %3397 }
 0x5c2   :  { %2723 = vst [vmem:[%s5821_s5 + $0xe0] sm:$0xff] %v2691_v53  ;;  %v2694_v55 = vsub.f32 %v5681_v6, %v2662_v4  ;;  %v2660_v54 = vmul.f32 0.6931472, %v3398_v43 }
 0x5c4   :  { %2726 = vst [vmem:[%s5821_s5 + $0xf8] sm:$0xff] %v2694_v55  ;;  %v2693_v44 = vsub.f32 %v5685_v10, %v2660_v54 }
 0x5c6   :  { %2725 = vst [vmem:[%s5821_s5 + $0xf0] sm:$0xff] %v2693_v44 }

</bundles_post_ra>
